<compile_context>
chip_gen: v6e
topology: v6e:2x2x1
jax: 0.10.0
libtpu: 0.0.40
codegen_flags: <defaults>
</compile_context>

<pallas_src>
import functools

import jax
import jax.numpy as jnp
from jax import lax
from jax.experimental import pallas as pl
from jax.experimental.pallas import tpu as pltpu


# -----------------------------------------------------------------------------
# Kernel 1: Conv2d(KxK, stride s, pad (K-1)//2) + ReLU
# -----------------------------------------------------------------------------

def _conv2d_relu_kernel(x_ref, w_ref, b_ref, o_ref, col_ref, *, K, s, C_in, Ho, Wh):
    """One grid step = one batch element.

    x_ref:   (1, s*s*C_in, Hh*Wh + d)  flat stride-phase planes of the padded image
    w_ref:   (C_out, K*K*C_in)         weights, tap-major / channel-minor
    b_ref:   (C_out, 1)                bias (f32)
    o_ref:   (1, C_out, Ho*Wh)         "wide" output (Wh-strided rows, cropped later)
    col_ref: (K*K*C_in, Ho*Wh)         im2col VMEM scratch
    """
    L = Ho * Wh
    x = x_ref[0]
    # im2col: every tap is a static lane-offset window of one phase plane.
    for kh in range(K):
        for kw in range(K):
            t = kh * K + kw
            ph = (kh % s) * s + (kw % s)
            off = (kh // s) * Wh + (kw // s)
            col_ref[t * C_in:(t + 1) * C_in, :] = x[ph * C_in:(ph + 1) * C_in, off:off + L]
    # Single fused MXU matmul over all taps.
    acc = jnp.dot(w_ref[...], col_ref[...], preferred_element_type=jnp.float32)
    o_ref[0] = jnp.maximum(acc + b_ref[...], 0.0).astype(o_ref.dtype)


def conv2d_relu(x_nchw, w_oihw, bias, *, stride=1):
    """Conv2d(kernel KxK, stride in {1,2}, padding=(K-1)//2) + ReLU.  NCHW/OIHW."""
    N, C_in, H, W = x_nchw.shape
    C_out, _, KH, KW = w_oihw.shape
    assert KH == KW and KH % 2 == 1, "odd square kernel expected"
    assert stride in (1, 2), "STN localization only needs stride 1 or 2"
    K, s = KH, stride
    p = (K - 1) // 2
    Hp, Wp = H + 2 * p, W + 2 * p
    Ho = (Hp - K) // s + 1
    Wo = (Wp - K) // s + 1
    d = (K - 1) // s                   # max tap offset inside a phase plane
    Hh, Wh = Ho + d, Wo + d            # phase-plane dims
    L = Ho * Wh                        # "wide" output length (Wh-strided rows)
    Cp = -(-C_in // 8) * 8             # channel pad -> all sublane slices 8-aligned
    Lx = Hh * Wh + d                   # flat length (+d keeps every tap window in-bounds)

    # Layout prep in plain XLA: channel pad, spatial pad, space-to-depth phases, flatten.
    x_pad = jnp.pad(x_nchw, ((0, 0), (0, Cp - C_in), (p, p), (p, p)))
    Ht, Wt = s * Hh, s * Wh
    x_pad = jnp.pad(
        x_pad, ((0, 0), (0, 0), (0, max(0, Ht - Hp)), (0, max(0, Wt - Wp)))
    )[:, :, :Ht, :Wt]
    x_ph = (x_pad.reshape(N, Cp, Hh, s, Wh, s)
            .transpose(0, 3, 5, 1, 2, 4)          # (N, a, b, C, i, j)
            .reshape(N, s * s * Cp, Hh * Wh))
    x_ph = jnp.pad(x_ph, ((0, 0), (0, 0), (0, d))).astype(jnp.float32)

    w_p = jnp.pad(w_oihw, ((0, 0), (0, Cp - C_in), (0, 0), (0, 0)))
    w_flat = jnp.transpose(w_p, (0, 2, 3, 1)).reshape(C_out, K * K * Cp).astype(jnp.float32)
    b_col = bias.reshape(C_out, 1).astype(jnp.float32)

    kernel = functools.partial(_conv2d_relu_kernel, K=K, s=s, C_in=Cp, Ho=Ho, Wh=Wh)

    out_wide = pl.pallas_call(
        kernel,
        out_shape=jax.ShapeDtypeStruct((N, C_out, L), jnp.float32),
        grid_spec=pltpu.PrefetchScalarGridSpec(
            num_scalar_prefetch=0,
            grid=(N,),  # cheap serial loop on v5e/v6e, split across v7x's 2 TCs
            in_specs=[
                pl.BlockSpec((1, s * s * Cp, Lx), lambda n: (n, 0, 0)),
                pl.BlockSpec((C_out, K * K * Cp), lambda n: (0, 0)),
                pl.BlockSpec((C_out, 1), lambda n: (0, 0)),
            ],
            out_specs=pl.BlockSpec((1, C_out, L), lambda n: (n, 0, 0)),
            scratch_shapes=[pltpu.VMEM((K * K * Cp, L), jnp.float32)],
        ),
        compiler_params=pltpu.CompilerParams(dimension_semantics=("parallel",)),
        cost_estimate=pl.CostEstimate(
            flops=2 * N * Ho * Wo * K * K * C_in * C_out,
            transcendentals=0,
            bytes_accessed=4 * (x_ph.size + w_flat.size + b_col.size + N * C_out * L),
        ),
    )(x_ph, w_flat, b_col)

    # Crop the Wh -> Wo overhang; result stays NCHW.
    # TODO(synk): at 400x400 inputs, tile Ho into row blocks with a halo instead of
    # whole-image-per-step (re-derive for v7x's 64 MiB VMEM).
    return out_wide.reshape(N, C_out, Ho, Wh)[:, :, :, :Wo]


# -----------------------------------------------------------------------------
# Kernel 2: Flatten -> Dense(F,128)+ReLU -> Linear(128,6), F K-tiled
# -----------------------------------------------------------------------------

def _loc_head_kernel(x_ref, w1_ref, b1_ref, w2_ref, b2_ref, th_ref, acc_ref):
    k = pl.program_id(0)

    @pl.when(k == 0)
    def _():
        acc_ref[...] = jnp.zeros_like(acc_ref)

    acc_ref[...] += jnp.dot(x_ref[...], w1_ref[...], preferred_element_type=jnp.float32)

    @pl.when(k == pl.num_programs(0) - 1)
    def _():
        h = jnp.maximum(acc_ref[...] + b1_ref[...], 0.0)
        th_ref[...] = (jnp.dot(h, w2_ref[...], preferred_element_type=jnp.float32)
                       + b2_ref[...]).astype(th_ref.dtype)


def localization_head(feat, w_dense, b_dense, w_lin, b_lin, *, tk=256):
    """theta = Linear(ReLU(feat @ Wd^T + bd)) with the reduction axis tiled."""
    N, F = feat.shape
    Hd = w_dense.shape[0]
    Od = w_lin.shape[0]
    tk = min(tk, F)
    Kt = pl.cdiv(F, tk)
    Fp = Kt * tk
    feat_p = jnp.pad(feat.astype(jnp.float32), ((0, 0), (0, Fp - F)))
    w1 = jnp.pad(w_dense.T.astype(jnp.float32), ((0, Fp - F), (0, 0)))   # (Fp, Hd)
    b1 = b_dense.reshape(1, Hd).astype(jnp.float32)
    w2 = w_lin.T.astype(jnp.float32)                                     # (Hd, Od)
    b2 = b_lin.reshape(1, Od).astype(jnp.float32)

    return pl.pallas_call(
        _loc_head_kernel,
        out_shape=jax.ShapeDtypeStruct((N, Od), jnp.float32),
        grid_spec=pltpu.PrefetchScalarGridSpec(
            num_scalar_prefetch=0,
            grid=(Kt,),
            in_specs=[
                pl.BlockSpec((N, tk), lambda k: (0, k)),
                pl.BlockSpec((tk, Hd), lambda k: (k, 0)),
                pl.BlockSpec((1, Hd), lambda k: (0, 0)),
                pl.BlockSpec((Hd, Od), lambda k: (0, 0)),
                pl.BlockSpec((1, Od), lambda k: (0, 0)),
            ],
            out_specs=pl.BlockSpec((N, Od), lambda k: (0, 0)),
            scratch_shapes=[pltpu.VMEM((N, Hd), jnp.float32)],
        ),
        compiler_params=pltpu.CompilerParams(dimension_semantics=("arbitrary",)),
    )(feat_p, w1, b1, w2, b2)


# -----------------------------------------------------------------------------
# Kernel 3: affine_grid + grid_sample (bilinear, zeros, align_corners=False)
# -----------------------------------------------------------------------------

def _grid_sample_kernel(img_ref, th_ref, o_ref, *, H, W):
    """img_ref: (1, C, H*W), th_ref: (1, 1, 6), o_ref: (1, C, H*W)."""
    L = H * W
    th = th_ref[0]                                     # (1, 6)
    t00, t01, t02 = th[:, 0:1], th[:, 1:2], th[:, 2:3]
    t10, t11, t12 = th[:, 3:4], th[:, 4:5], th[:, 5:6]

    # Output pixel coordinates from a lane iota (all float math, no int div).
    pidx = lax.broadcasted_iota(jnp.int32, (1, L), 1).astype(jnp.float32)
    oh = jnp.floor((pidx + 0.5) / W)
    ow = pidx - oh * W

    # affine_grid (align_corners=False): normalized pixel-center base grid.
    xn = (2.0 * ow + 1.0) / W - 1.0
    yn = (2.0 * oh + 1.0) / H - 1.0
    gx = t00 * xn + t01 * yn + t02
    gy = t10 * xn + t11 * yn + t12

    # grid_sample unnormalize + bilinear corner weights.
    ix = ((gx + 1.0) * W - 1.0) * 0.5
    iy = ((gy + 1.0) * H - 1.0) * 0.5
    x0 = jnp.floor(ix)
    y0 = jnp.floor(iy)
    x1 = x0 + 1.0
    y1 = y0 + 1.0
    wx1 = ix - x0
    wx0 = 1.0 - wx1
    wy1 = iy - y0
    wy0 = 1.0 - wy1

    # Build the (L_in, L_out) interpolation matrix with iota == index compares.
    q = lax.broadcasted_iota(jnp.int32, (L, L), 0).astype(jnp.float32)
    s_mat = jnp.zeros((L, L), jnp.float32)
    for xc, wx in ((x0, wx0), (x1, wx1)):
        for yc, wy in ((y0, wy0), (y1, wy1)):
            valid = (xc >= 0.0) & (xc < W) & (yc >= 0.0) & (yc < H)
            idx = jnp.where(valid, yc * W + xc, -1.0)      # -1 never matches (zeros pad)
            s_mat = s_mat + jnp.where(q == idx, wx * wy, 0.0)

    out = jnp.dot(img_ref[0], s_mat, preferred_element_type=jnp.float32)
    o_ref[0] = out.astype(o_ref.dtype)


def affine_grid_sample(image_nchw, theta6):
    """F.grid_sample(image, F.affine_grid(theta, image.size())), theta6: (N, 6)."""
    N, C, H, W = image_nchw.shape
    L = H * W
    img_flat = image_nchw.reshape(N, C, L).astype(jnp.float32)
    th = theta6.reshape(N, 1, 6).astype(jnp.float32)
    kernel = functools.partial(_grid_sample_kernel, H=H, W=W)
    out = pl.pallas_call(
        kernel,
        out_shape=jax.ShapeDtypeStruct((N, C, L), jnp.float32),
        grid_spec=pltpu.PrefetchScalarGridSpec(
            num_scalar_prefetch=0,
            grid=(N,),
            in_specs=[
                pl.BlockSpec((1, C, L), lambda n: (n, 0, 0)),
                pl.BlockSpec((1, 1, 6), lambda n: (n, 0, 0)),
            ],
            out_specs=pl.BlockSpec((1, C, L), lambda n: (n, 0, 0)),
        ),
        compiler_params=pltpu.CompilerParams(dimension_semantics=("parallel",)),
    )(img_flat, th)
    return out.reshape(N, C, H, W)


# -----------------------------------------------------------------------------
# Full SpatialTransformerNetwork forward
# -----------------------------------------------------------------------------

def stn_forward(image, params):
    x = conv2d_relu(image, params["w1"], params["b1"], stride=2)
    x = conv2d_relu(x, params["w2"], params["b2"], stride=2)
    x = conv2d_relu(x, params["w3"], params["b3"], stride=2)
    feat = x.reshape(image.shape[0], -1)                      # Flatten (NCHW contiguous)
    theta = localization_head(feat, params["wd"], params["bd"],
                              params["wl"], params["bl"])     # (N, 6)
    return affine_grid_sample(image, theta), x, theta


# -----------------------------------------------------------------------------
# Plain-JAX references (for verification only)
# -----------------------------------------------------------------------------

def _conv_relu_ref(x, w, b, stride):
    y = lax.conv_general_dilated(x, w, (stride, stride), ((1, 1), (1, 1)),
                                 dimension_numbers=("NCHW", "OIHW", "NCHW"))
    return jnp.maximum(y + b.reshape(1, -1, 1, 1), 0.0)


def _grid_sample_ref(image, theta23):
    N, C, H, W = image.shape

    def one(img, th):
        xs = (2.0 * jnp.arange(W, dtype=jnp.float32) + 1.0) / W - 1.0
        ys = (2.0 * jnp.arange(H, dtype=jnp.float32) + 1.0) / H - 1.0
        xn = jnp.broadcast_to(xs[None, :], (H, W))
        yn = jnp.broadcast_to(ys[:, None], (H, W))
        gx = th[0, 0] * xn + th[0, 1] * yn + th[0, 2]
        gy = th[1, 0] * xn + th[1, 1] * yn + th[1, 2]
        ix = ((gx + 1.0) * W - 1.0) * 0.5
        iy = ((gy + 1.0) * H - 1.0) * 0.5
        x0 = jnp.floor(ix)
        y0 = jnp.floor(iy)
        out = jnp.zeros((C, H, W), jnp.float32)
        for xc, wx in ((x0, x0 + 1.0 - ix), (x0 + 1.0, ix - x0)):
            for yc, wy in ((y0, y0 + 1.0 - iy), (y0 + 1.0, iy - y0)):
                valid = (xc >= 0) & (xc < W) & (yc >= 0) & (yc < H)
                xi = jnp.clip(xc, 0, W - 1).astype(jnp.int32)
                yi = jnp.clip(yc, 0, H - 1).astype(jnp.int32)
                out = out + jnp.where(valid, wx * wy, 0.0)[None] * img[:, yi, xi]
        return out

    return jax.vmap(one)(image, theta23)


if __name__ == "__main__":
    # Small shapes consistent with the module: 3-channel image, 16x16 spatial.
    N, C, H, W = 2, 3, 16, 16
    key = jax.random.PRNGKey(0)
    ks = jax.random.split(key, 10)

    def kaiming(k, shape, fan_in):
        return jax.random.normal(k, shape, jnp.float32) * (2.0 / fan_in) ** 0.5

    def unif_bias(k, shape, fan_in):
        b = 1.0 / fan_in ** 0.5
        return jax.random.uniform(k, shape, jnp.float32, minval=-b, maxval=b)

    # Localization conv stack 3 -> 32 -> 64 -> 128 (3x3, stride 2, ReLU).
    w1 = kaiming(ks[0], (32, C, 3, 3), C * 9);    b1 = unif_bias(ks[1], (32,), C * 9)
    w2 = kaiming(ks[2], (64, 32, 3, 3), 32 * 9);  b2 = unif_bias(ks[3], (64,), 32 * 9)
    w3 = kaiming(ks[4], (128, 64, 3, 3), 64 * 9); b3 = unif_bias(ks[5], (128,), 64 * 9)

    h = H
    for _ in range(3):
        h = (h + 2 - 3) // 2 + 1
    F_in = 128 * h * h   # 512 for 16x16 input (the real module's 320000 is the 400x400 case)

    wd = kaiming(ks[6], (128, F_in), F_in)
    bd = unif_bias(ks[7], (128,), F_in)
    # Module init: final Linear weight zeroed, bias = identity affine.
    wl = jnp.zeros((6, 128), jnp.float32)
    bl = jnp.array([1.0, 0.0, 0.0, 0.0, 1.0, 0.0], jnp.float32)

    params = dict(w1=w1, b1=b1, w2=w2, b2=b2, w3=w3, b3=b3, wd=wd, bd=bd, wl=wl, bl=bl)
    image = jax.random.normal(ks[8], (N, C, H, W), jnp.float32)

    # --- Pallas forward ---
    out, conv_feat, theta = jax.jit(stn_forward)(image, params)
    out = jax.block_until_ready(out)
    assert out.shape == (N, C, H, W)

    # --- verify the conv stack against lax ---
    xr = _conv_relu_ref(image, w1, b1, 2)
    xr = _conv_relu_ref(xr, w2, b2, 2)
    xr = _conv_relu_ref(xr, w3, b3, 2)
    assert jnp.allclose(conv_feat, xr, atol=1e-4, rtol=1e-4), "conv stack mismatch"

    # --- verify the head (with the prescribed init and with a random final layer) ---
    feat_r = xr.reshape(N, -1)
    h_r = jnp.maximum(feat_r @ wd.T + bd, 0.0)
    theta_r = h_r @ wl.T + bl
    assert jnp.allclose(theta, theta_r, atol=1e-4, rtol=1e-4), "head mismatch"
    wl_rand = jax.random.normal(ks[9], (6, 128), jnp.float32) * 0.1
    th_test = localization_head(feat_r, wd, bd, wl_rand, bl)
    assert jnp.allclose(th_test, h_r @ wl_rand.T + bl, atol=1e-4, rtol=1e-4), \
        "head (random final layer) mismatch"

    # --- verify grid_sample with a non-identity affine ---
    theta_t = jnp.array([[0.9, 0.15, 0.05, -0.15, 0.85, -0.10],
                         [1.1, -0.10, -0.20, 0.10, 1.05, 0.15]], jnp.float32)
    gs = affine_grid_sample(image, theta_t)
    gs_ref = _grid_sample_ref(image, theta_t.reshape(N, 2, 3))
    assert jnp.allclose(gs, gs_ref, atol=1e-4, rtol=1e-4), "grid_sample mismatch"

    # --- full forward: with the module's init theta is the identity warp ---
    ref_out = _grid_sample_ref(image, theta_r.reshape(N, 2, 3))
    assert jnp.allclose(out, ref_out, atol=1e-4, rtol=1e-4), "STN forward mismatch"
    assert jnp.allclose(out, image, atol=1e-4, rtol=1e-4), "identity warp should return input"

    print("KERNEL_OK")
</pallas_src>

<mosaic_0001>
module attributes {stable_mosaic.version = 11 : i64} {
  func.func @_conv2d_relu_kernel(%arg0: i32, %arg1: memref<1x32x82xf32, #tpu.memory_space<vmem>>, %arg2: memref<32x72xf32, #tpu.memory_space<vmem>>, %arg3: memref<32x1xf32, #tpu.memory_space<vmem>>, %arg4: memref<1x32x72xf32, #tpu.memory_space<vmem>>, %arg5: memref<72x72xf32, #tpu.memory_space<vmem>>) attributes {dimension_semantics = [#tpu.dimension_semantics<parallel>], iteration_bounds = array<i64: 2>, scalar_prefetch = 0 : i64, scratch_operands = 1 : i64, tpu.core_type = #tpu.core_type<tc>, window_params = [{transform_indices = @transform_0, window_bounds = array<i64: 1, 32, 82>}, {pipeline_mode = #tpu.pipeline_mode<synchronous>, transform_indices = @transform_1, window_bounds = array<i64: 32, 72>}, {pipeline_mode = #tpu.pipeline_mode<synchronous>, transform_indices = @transform_2, window_bounds = array<i64: 32, 1>}, {transform_indices = @transform_3, window_bounds = array<i64: 1, 32, 72>}]} {
    %c0 = arith.constant 0 : index
    %c0_0 = arith.constant 0 : index
    %c0_1 = arith.constant 0 : index
    %0 = vector.load %arg1[%c0, %c0_0, %c0_1] : memref<1x32x82xf32, #tpu.memory_space<vmem>>, vector<1x32x82xf32>
    %1 = vector.shape_cast %0 : vector<1x32x82xf32> to vector<32x82xf32>
    %2 = vector.extract_strided_slice %1 {offsets = [0, 0], sizes = [8, 72], strides = [1, 1]} : vector<32x82xf32> to vector<8x72xf32>
    %c0_2 = arith.constant 0 : index
    %c0_3 = arith.constant 0 : index
    %3 = vector.load %arg5[%c0_2, %c0_3] : memref<72x72xf32, #tpu.memory_space<vmem>>, vector<8x72xf32>
    tpu.vector_store %arg5[%c0_2, %c0_3], %2 {strides = array<i32>} : memref<72x72xf32, #tpu.memory_space<vmem>>, vector<8x72xf32>,
    %4 = vector.extract_strided_slice %1 {offsets = [8, 0], sizes = [8, 72], strides = [1, 1]} : vector<32x82xf32> to vector<8x72xf32>
    %c8 = arith.constant 8 : index
    %c0_4 = arith.constant 0 : index
    %5 = vector.load %arg5[%c8, %c0_4] : memref<72x72xf32, #tpu.memory_space<vmem>>, vector<8x72xf32>
    tpu.vector_store %arg5[%c8, %c0_4], %4 {strides = array<i32>} : memref<72x72xf32, #tpu.memory_space<vmem>>, vector<8x72xf32>,
    %6 = vector.extract_strided_slice %1 {offsets = [0, 1], sizes = [8, 72], strides = [1, 1]} : vector<32x82xf32> to vector<8x72xf32>
    %c16 = arith.constant 16 : index
    %c0_5 = arith.constant 0 : index
    %7 = vector.load %arg5[%c16, %c0_5] : memref<72x72xf32, #tpu.memory_space<vmem>>, vector<8x72xf32>
    tpu.vector_store %arg5[%c16, %c0_5], %6 {strides = array<i32>} : memref<72x72xf32, #tpu.memory_space<vmem>>, vector<8x72xf32>,
    %8 = vector.extract_strided_slice %1 {offsets = [16, 0], sizes = [8, 72], strides = [1, 1]} : vector<32x82xf32> to vector<8x72xf32>
    %c24 = arith.constant 24 : index
    %c0_6 = arith.constant 0 : index
    %9 = vector.load %arg5[%c24, %c0_6] : memref<72x72xf32, #tpu.memory_space<vmem>>, vector<8x72xf32>
    tpu.vector_store %arg5[%c24, %c0_6], %8 {strides = array<i32>} : memref<72x72xf32, #tpu.memory_space<vmem>>, vector<8x72xf32>,
    %10 = vector.extract_strided_slice %1 {offsets = [24, 0], sizes = [8, 72], strides = [1, 1]} : vector<32x82xf32> to vector<8x72xf32>
    %c32 = arith.constant 32 : index
    %c0_7 = arith.constant 0 : index
    %11 = vector.load %arg5[%c32, %c0_7] : memref<72x72xf32, #tpu.memory_space<vmem>>, vector<8x72xf32>
    tpu.vector_store %arg5[%c32, %c0_7], %10 {strides = array<i32>} : memref<72x72xf32, #tpu.memory_space<vmem>>, vector<8x72xf32>,
    %12 = vector.extract_strided_slice %1 {offsets = [16, 1], sizes = [8, 72], strides = [1, 1]} : vector<32x82xf32> to vector<8x72xf32>
    %c40 = arith.constant 40 : index
    %c0_8 = arith.constant 0 : index
    %13 = vector.load %arg5[%c40, %c0_8] : memref<72x72xf32, #tpu.memory_space<vmem>>, vector<8x72xf32>
    tpu.vector_store %arg5[%c40, %c0_8], %12 {strides = array<i32>} : memref<72x72xf32, #tpu.memory_space<vmem>>, vector<8x72xf32>,
    %14 = vector.extract_strided_slice %1 {offsets = [0, 9], sizes = [8, 72], strides = [1, 1]} : vector<32x82xf32> to vector<8x72xf32>
    %c48 = arith.constant 48 : index
    %c0_9 = arith.constant 0 : index
    %15 = vector.load %arg5[%c48, %c0_9] : memref<72x72xf32, #tpu.memory_space<vmem>>, vector<8x72xf32>
    tpu.vector_store %arg5[%c48, %c0_9], %14 {strides = array<i32>} : memref<72x72xf32, #tpu.memory_space<vmem>>, vector<8x72xf32>,
    %16 = vector.extract_strided_slice %1 {offsets = [8, 9], sizes = [8, 72], strides = [1, 1]} : vector<32x82xf32> to vector<8x72xf32>
    %c56 = arith.constant 56 : index
    %c0_10 = arith.constant 0 : index
    %17 = vector.load %arg5[%c56, %c0_10] : memref<72x72xf32, #tpu.memory_space<vmem>>, vector<8x72xf32>
    tpu.vector_store %arg5[%c56, %c0_10], %16 {strides = array<i32>} : memref<72x72xf32, #tpu.memory_space<vmem>>, vector<8x72xf32>,
    %18 = vector.extract_strided_slice %1 {offsets = [0, 10], sizes = [8, 72], strides = [1, 1]} : vector<32x82xf32> to vector<8x72xf32>
    %c64 = arith.constant 64 : index
    %c0_11 = arith.constant 0 : index
    %19 = vector.load %arg5[%c64, %c0_11] : memref<72x72xf32, #tpu.memory_space<vmem>>, vector<8x72xf32>
    tpu.vector_store %arg5[%c64, %c0_11], %18 {strides = array<i32>} : memref<72x72xf32, #tpu.memory_space<vmem>>, vector<8x72xf32>,
    %c0_12 = arith.constant 0 : index
    %c0_13 = arith.constant 0 : index
    %20 = vector.load %arg2[%c0_12, %c0_13] : memref<32x72xf32, #tpu.memory_space<vmem>>, vector<32x72xf32>
    %c0_14 = arith.constant 0 : index
    %c0_15 = arith.constant 0 : index
    %21 = vector.load %arg5[%c0_14, %c0_15] : memref<72x72xf32, #tpu.memory_space<vmem>>, vector<72x72xf32>
    %cst = arith.constant dense<0.000000e+00> : vector<32x72xf32>
    %22 = tpu.matmul %20, %21, %cst {dimension_numbers = #tpu.dot_dimension_numbers<[1], [0], [0], [1], [0, 0, 1, 1], [], []>} : vector<32x72xf32>, vector<72x72xf32>, vector<32x72xf32> -> vector<32x72xf32>
    %c0_16 = arith.constant 0 : index
    %c0_17 = arith.constant 0 : index
    %23 = vector.load %arg3[%c0_16, %c0_17] : memref<32x1xf32, #tpu.memory_space<vmem>>, vector<32x1xf32>
    %24 = vector.broadcast %23 : vector<32x1xf32> to vector<32x72xf32>
    %25 = arith.addf %22, %24 : vector<32x72xf32>
    %cst_18 = arith.constant 0.000000e+00 : f32
    %26 = vector.broadcast %cst_18 : f32 to vector<32x72xf32>
    %27 = arith.maximumf %25, %26 : vector<32x72xf32>
    %c0_19 = arith.constant 0 : index
    %c0_20 = arith.constant 0 : index
    %c0_21 = arith.constant 0 : index
    %28 = vector.load %arg4[%c0_19, %c0_20, %c0_21] : memref<1x32x72xf32, #tpu.memory_space<vmem>>, vector<1x32x72xf32>
    %29 = vector.shape_cast %28 : vector<1x32x72xf32> to vector<32x72xf32>
    %30 = vector.shape_cast %27 : vector<32x72xf32> to vector<1x32x72xf32>
    tpu.vector_store %arg4[%c0_19, %c0_20, %c0_21], %30 {strides = array<i32>} : memref<1x32x72xf32, #tpu.memory_space<vmem>>, vector<1x32x72xf32>,
    return
  }
  func.func @transform_0(%arg0: i32) -> (i32, i32, i32) {
    %c0_i32 = arith.constant 0 : i32
    %c0_i32_0 = arith.constant 0 : i32
    %c0_i32_1 = arith.constant 0 : i32
    return %arg0, %c0_i32, %c0_i32_0 : i32, i32, i32
  }
  func.func @transform_1(%arg0: i32) -> (i32, i32) {
    %c0_i32 = arith.constant 0 : i32
    %c0_i32_0 = arith.constant 0 : i32
    %c0_i32_1 = arith.constant 0 : i32
    return %c0_i32, %c0_i32_0 : i32, i32
  }
  func.func @transform_2(%arg0: i32) -> (i32, i32) {
    %c0_i32 = arith.constant 0 : i32
    %c0_i32_0 = arith.constant 0 : i32
    %c0_i32_1 = arith.constant 0 : i32
    return %c0_i32, %c0_i32_0 : i32, i32
  }
  func.func @transform_3(%arg0: i32) -> (i32, i32, i32) {
    %c0_i32 = arith.constant 0 : i32
    %c0_i32_0 = arith.constant 0 : i32
    %c0_i32_1 = arith.constant 0 : i32
    return %arg0, %c0_i32, %c0_i32_0 : i32, i32, i32
  }
}

module attributes {stable_mosaic.version = 11 : i64} {
  func.func @_conv2d_relu_kernel(%arg0: i32, %arg1: memref<1x128x26xf32, #tpu.memory_space<vmem>>, %arg2: memref<64x288xf32, #tpu.memory_space<vmem>>, %arg3: memref<64x1xf32, #tpu.memory_space<vmem>>, %arg4: memref<1x64x20xf32, #tpu.memory_space<vmem>>, %arg5: memref<288x20xf32, #tpu.memory_space<vmem>>) attributes {dimension_semantics = [#tpu.dimension_semantics<parallel>], iteration_bounds = array<i64: 2>, scalar_prefetch = 0 : i64, scratch_operands = 1 : i64, tpu.core_type = #tpu.core_type<tc>, window_params = [{transform_indices = @transform_0, window_bounds = array<i64: 1, 128, 26>}, {pipeline_mode = #tpu.pipeline_mode<synchronous>, transform_indices = @transform_1, window_bounds = array<i64: 64, 288>}, {pipeline_mode = #tpu.pipeline_mode<synchronous>, transform_indices = @transform_2, window_bounds = array<i64: 64, 1>}, {transform_indices = @transform_3, window_bounds = array<i64: 1, 64, 20>}]} {
    %c0 = arith.constant 0 : index
    %c0_0 = arith.constant 0 : index
    %c0_1 = arith.constant 0 : index
    %0 = vector.load %arg1[%c0, %c0_0, %c0_1] : memref<1x128x26xf32, #tpu.memory_space<vmem>>, vector<1x128x26xf32>
    %1 = vector.shape_cast %0 : vector<1x128x26xf32> to vector<128x26xf32>
    %2 = vector.extract_strided_slice %1 {offsets = [0, 0], sizes = [32, 20], strides = [1, 1]} : vector<128x26xf32> to vector<32x20xf32>
    %c0_2 = arith.constant 0 : index
    %c0_3 = arith.constant 0 : index
    %3 = vector.load %arg5[%c0_2, %c0_3] : memref<288x20xf32, #tpu.memory_space<vmem>>, vector<32x20xf32>
    tpu.vector_store %arg5[%c0_2, %c0_3], %2 {strides = array<i32>} : memref<288x20xf32, #tpu.memory_space<vmem>>, vector<32x20xf32>,
    %4 = vector.extract_strided_slice %1 {offsets = [32, 0], sizes = [32, 20], strides = [1, 1]} : vector<128x26xf32> to vector<32x20xf32>
    %c32 = arith.constant 32 : index
    %c0_4 = arith.constant 0 : index
    %5 = vector.load %arg5[%c32, %c0_4] : memref<288x20xf32, #tpu.memory_space<vmem>>, vector<32x20xf32>
    tpu.vector_store %arg5[%c32, %c0_4], %4 {strides = array<i32>} : memref<288x20xf32, #tpu.memory_space<vmem>>, vector<32x20xf32>,
    %6 = vector.extract_strided_slice %1 {offsets = [0, 1], sizes = [32, 20], strides = [1, 1]} : vector<128x26xf32> to vector<32x20xf32>
    %c64 = arith.constant 64 : index
    %c0_5 = arith.constant 0 : index
    %7 = vector.load %arg5[%c64, %c0_5] : memref<288x20xf32, #tpu.memory_space<vmem>>, vector<32x20xf32>
    tpu.vector_store %arg5[%c64, %c0_5], %6 {strides = array<i32>} : memref<288x20xf32, #tpu.memory_space<vmem>>, vector<32x20xf32>,
    %8 = vector.extract_strided_slice %1 {offsets = [64, 0], sizes = [32, 20], strides = [1, 1]} : vector<128x26xf32> to vector<32x20xf32>
    %c96 = arith.constant 96 : index
    %c0_6 = arith.constant 0 : index
    %9 = vector.load %arg5[%c96, %c0_6] : memref<288x20xf32, #tpu.memory_space<vmem>>, vector<32x20xf32>
    tpu.vector_store %arg5[%c96, %c0_6], %8 {strides = array<i32>} : memref<288x20xf32, #tpu.memory_space<vmem>>, vector<32x20xf32>,
    %10 = vector.extract_strided_slice %1 {offsets = [96, 0], sizes = [32, 20], strides = [1, 1]} : vector<128x26xf32> to vector<32x20xf32>
    %c128 = arith.constant 128 : index
    %c0_7 = arith.constant 0 : index
    %11 = vector.load %arg5[%c128, %c0_7] : memref<288x20xf32, #tpu.memory_space<vmem>>, vector<32x20xf32>
    tpu.vector_store %arg5[%c128, %c0_7], %10 {strides = array<i32>} : memref<288x20xf32, #tpu.memory_space<vmem>>, vector<32x20xf32>,
    %12 = vector.extract_strided_slice %1 {offsets = [64, 1], sizes = [32, 20], strides = [1, 1]} : vector<128x26xf32> to vector<32x20xf32>
    %c160 = arith.constant 160 : index
    %c0_8 = arith.constant 0 : index
    %13 = vector.load %arg5[%c160, %c0_8] : memref<288x20xf32, #tpu.memory_space<vmem>>, vector<32x20xf32>
    tpu.vector_store %arg5[%c160, %c0_8], %12 {strides = array<i32>} : memref<288x20xf32, #tpu.memory_space<vmem>>, vector<32x20xf32>,
    %14 = vector.extract_strided_slice %1 {offsets = [0, 5], sizes = [32, 20], strides = [1, 1]} : vector<128x26xf32> to vector<32x20xf32>
    %c192 = arith.constant 192 : index
    %c0_9 = arith.constant 0 : index
    %15 = vector.load %arg5[%c192, %c0_9] : memref<288x20xf32, #tpu.memory_space<vmem>>, vector<32x20xf32>
    tpu.vector_store %arg5[%c192, %c0_9], %14 {strides = array<i32>} : memref<288x20xf32, #tpu.memory_space<vmem>>, vector<32x20xf32>,
    %16 = vector.extract_strided_slice %1 {offsets = [32, 5], sizes = [32, 20], strides = [1, 1]} : vector<128x26xf32> to vector<32x20xf32>
    %c224 = arith.constant 224 : index
    %c0_10 = arith.constant 0 : index
    %17 = vector.load %arg5[%c224, %c0_10] : memref<288x20xf32, #tpu.memory_space<vmem>>, vector<32x20xf32>
    tpu.vector_store %arg5[%c224, %c0_10], %16 {strides = array<i32>} : memref<288x20xf32, #tpu.memory_space<vmem>>, vector<32x20xf32>,
    %18 = vector.extract_strided_slice %1 {offsets = [0, 6], sizes = [32, 20], strides = [1, 1]} : vector<128x26xf32> to vector<32x20xf32>
    %c256 = arith.constant 256 : index
    %c0_11 = arith.constant 0 : index
    %19 = vector.load %arg5[%c256, %c0_11] : memref<288x20xf32, #tpu.memory_space<vmem>>, vector<32x20xf32>
    tpu.vector_store %arg5[%c256, %c0_11], %18 {strides = array<i32>} : memref<288x20xf32, #tpu.memory_space<vmem>>, vector<32x20xf32>,
    %c0_12 = arith.constant 0 : index
    %c0_13 = arith.constant 0 : index
    %20 = vector.load %arg2[%c0_12, %c0_13] : memref<64x288xf32, #tpu.memory_space<vmem>>, vector<64x288xf32>
    %c0_14 = arith.constant 0 : index
    %c0_15 = arith.constant 0 : index
    %21 = vector.load %arg5[%c0_14, %c0_15] : memref<288x20xf32, #tpu.memory_space<vmem>>, vector<288x20xf32>
    %cst = arith.constant dense<0.000000e+00> : vector<64x20xf32>
    %22 = tpu.matmul %20, %21, %cst {dimension_numbers = #tpu.dot_dimension_numbers<[1], [0], [0], [1], [0, 0, 1, 1], [], []>} : vector<64x288xf32>, vector<288x20xf32>, vector<64x20xf32> -> vector<64x20xf32>
    %c0_16 = arith.constant 0 : index
    %c0_17 = arith.constant 0 : index
    %23 = vector.load %arg3[%c0_16, %c0_17] : memref<64x1xf32, #tpu.memory_space<vmem>>, vector<64x1xf32>
    %24 = vector.broadcast %23 : vector<64x1xf32> to vector<64x20xf32>
    %25 = arith.addf %22, %24 : vector<64x20xf32>
    %cst_18 = arith.constant 0.000000e+00 : f32
    %26 = vector.broadcast %cst_18 : f32 to vector<64x20xf32>
    %27 = arith.maximumf %25, %26 : vector<64x20xf32>
    %c0_19 = arith.constant 0 : index
    %c0_20 = arith.constant 0 : index
    %c0_21 = arith.constant 0 : index
    %28 = vector.load %arg4[%c0_19, %c0_20, %c0_21] : memref<1x64x20xf32, #tpu.memory_space<vmem>>, vector<1x64x20xf32>
    %29 = vector.shape_cast %28 : vector<1x64x20xf32> to vector<64x20xf32>
    %30 = vector.shape_cast %27 : vector<64x20xf32> to vector<1x64x20xf32>
    tpu.vector_store %arg4[%c0_19, %c0_20, %c0_21], %30 {strides = array<i32>} : memref<1x64x20xf32, #tpu.memory_space<vmem>>, vector<1x64x20xf32>,
    return
  }
  func.func @transform_0(%arg0: i32) -> (i32, i32, i32) {
    %c0_i32 = arith.constant 0 : i32
    %c0_i32_0 = arith.constant 0 : i32
    %c0_i32_1 = arith.constant 0 : i32
    return %arg0, %c0_i32, %c0_i32_0 : i32, i32, i32
  }
  func.func @transform_1(%arg0: i32) -> (i32, i32) {
    %c0_i32 = arith.constant 0 : i32
    %c0_i32_0 = arith.constant 0 : i32
    %c0_i32_1 = arith.constant 0 : i32
    return %c0_i32, %c0_i32_0 : i32, i32
  }
  func.func @transform_2(%arg0: i32) -> (i32, i32) {
    %c0_i32 = arith.constant 0 : i32
    %c0_i32_0 = arith.constant 0 : i32
    %c0_i32_1 = arith.constant 0 : i32
    return %c0_i32, %c0_i32_0 : i32, i32
  }
  func.func @transform_3(%arg0: i32) -> (i32, i32, i32) {
    %c0_i32 = arith.constant 0 : i32
    %c0_i32_0 = arith.constant 0 : i32
    %c0_i32_1 = arith.constant 0 : i32
    return %arg0, %c0_i32, %c0_i32_0 : i32, i32, i32
  }
}

module attributes {stable_mosaic.version = 11 : i64} {
  func.func @_conv2d_relu_kernel(%arg0: i32, %arg1: memref<1x256x10xf32, #tpu.memory_space<vmem>>, %arg2: memref<128x576xf32, #tpu.memory_space<vmem>>, %arg3: memref<128x1xf32, #tpu.memory_space<vmem>>, %arg4: memref<1x128x6xf32, #tpu.memory_space<vmem>>, %arg5: memref<576x6xf32, #tpu.memory_space<vmem>>) attributes {dimension_semantics = [#tpu.dimension_semantics<parallel>], iteration_bounds = array<i64: 2>, scalar_prefetch = 0 : i64, scratch_operands = 1 : i64, tpu.core_type = #tpu.core_type<tc>, window_params = [{transform_indices = @transform_0, window_bounds = array<i64: 1, 256, 10>}, {pipeline_mode = #tpu.pipeline_mode<synchronous>, transform_indices = @transform_1, window_bounds = array<i64: 128, 576>}, {pipeline_mode = #tpu.pipeline_mode<synchronous>, transform_indices = @transform_2, window_bounds = array<i64: 128, 1>}, {transform_indices = @transform_3, window_bounds = array<i64: 1, 128, 6>}]} {
    %c0 = arith.constant 0 : index
    %c0_0 = arith.constant 0 : index
    %c0_1 = arith.constant 0 : index
    %0 = vector.load %arg1[%c0, %c0_0, %c0_1] : memref<1x256x10xf32, #tpu.memory_space<vmem>>, vector<1x256x10xf32>
    %1 = vector.shape_cast %0 : vector<1x256x10xf32> to vector<256x10xf32>
    %2 = vector.extract_strided_slice %1 {offsets = [0, 0], sizes = [64, 6], strides = [1, 1]} : vector<256x10xf32> to vector<64x6xf32>
    %c0_2 = arith.constant 0 : index
    %c0_3 = arith.constant 0 : index
    %3 = vector.load %arg5[%c0_2, %c0_3] : memref<576x6xf32, #tpu.memory_space<vmem>>, vector<64x6xf32>
    tpu.vector_store %arg5[%c0_2, %c0_3], %2 {strides = array<i32>} : memref<576x6xf32, #tpu.memory_space<vmem>>, vector<64x6xf32>,
    %4 = vector.extract_strided_slice %1 {offsets = [64, 0], sizes = [64, 6], strides = [1, 1]} : vector<256x10xf32> to vector<64x6xf32>
    %c64 = arith.constant 64 : index
    %c0_4 = arith.constant 0 : index
    %5 = vector.load %arg5[%c64, %c0_4] : memref<576x6xf32, #tpu.memory_space<vmem>>, vector<64x6xf32>
    tpu.vector_store %arg5[%c64, %c0_4], %4 {strides = array<i32>} : memref<576x6xf32, #tpu.memory_space<vmem>>, vector<64x6xf32>,
    %6 = vector.extract_strided_slice %1 {offsets = [0, 1], sizes = [64, 6], strides = [1, 1]} : vector<256x10xf32> to vector<64x6xf32>
    %c128 = arith.constant 128 : index
    %c0_5 = arith.constant 0 : index
    %7 = vector.load %arg5[%c128, %c0_5] : memref<576x6xf32, #tpu.memory_space<vmem>>, vector<64x6xf32>
    tpu.vector_store %arg5[%c128, %c0_5], %6 {strides = array<i32>} : memref<576x6xf32, #tpu.memory_space<vmem>>, vector<64x6xf32>,
    %8 = vector.extract_strided_slice %1 {offsets = [128, 0], sizes = [64, 6], strides = [1, 1]} : vector<256x10xf32> to vector<64x6xf32>
    %c192 = arith.constant 192 : index
    %c0_6 = arith.constant 0 : index
    %9 = vector.load %arg5[%c192, %c0_6] : memref<576x6xf32, #tpu.memory_space<vmem>>, vector<64x6xf32>
    tpu.vector_store %arg5[%c192, %c0_6], %8 {strides = array<i32>} : memref<576x6xf32, #tpu.memory_space<vmem>>, vector<64x6xf32>,
    %10 = vector.extract_strided_slice %1 {offsets = [192, 0], sizes = [64, 6], strides = [1, 1]} : vector<256x10xf32> to vector<64x6xf32>
    %c256 = arith.constant 256 : index
    %c0_7 = arith.constant 0 : index
    %11 = vector.load %arg5[%c256, %c0_7] : memref<576x6xf32, #tpu.memory_space<vmem>>, vector<64x6xf32>
    tpu.vector_store %arg5[%c256, %c0_7], %10 {strides = array<i32>} : memref<576x6xf32, #tpu.memory_space<vmem>>, vector<64x6xf32>,
    %12 = vector.extract_strided_slice %1 {offsets = [128, 1], sizes = [64, 6], strides = [1, 1]} : vector<256x10xf32> to vector<64x6xf32>
    %c320 = arith.constant 320 : index
    %c0_8 = arith.constant 0 : index
    %13 = vector.load %arg5[%c320, %c0_8] : memref<576x6xf32, #tpu.memory_space<vmem>>, vector<64x6xf32>
    tpu.vector_store %arg5[%c320, %c0_8], %12 {strides = array<i32>} : memref<576x6xf32, #tpu.memory_space<vmem>>, vector<64x6xf32>,
    %14 = vector.extract_strided_slice %1 {offsets = [0, 3], sizes = [64, 6], strides = [1, 1]} : vector<256x10xf32> to vector<64x6xf32>
    %c384 = arith.constant 384 : index
    %c0_9 = arith.constant 0 : index
    %15 = vector.load %arg5[%c384, %c0_9] : memref<576x6xf32, #tpu.memory_space<vmem>>, vector<64x6xf32>
    tpu.vector_store %arg5[%c384, %c0_9], %14 {strides = array<i32>} : memref<576x6xf32, #tpu.memory_space<vmem>>, vector<64x6xf32>,
    %16 = vector.extract_strided_slice %1 {offsets = [64, 3], sizes = [64, 6], strides = [1, 1]} : vector<256x10xf32> to vector<64x6xf32>
    %c448 = arith.constant 448 : index
    %c0_10 = arith.constant 0 : index
    %17 = vector.load %arg5[%c448, %c0_10] : memref<576x6xf32, #tpu.memory_space<vmem>>, vector<64x6xf32>
    tpu.vector_store %arg5[%c448, %c0_10], %16 {strides = array<i32>} : memref<576x6xf32, #tpu.memory_space<vmem>>, vector<64x6xf32>,
    %18 = vector.extract_strided_slice %1 {offsets = [0, 4], sizes = [64, 6], strides = [1, 1]} : vector<256x10xf32> to vector<64x6xf32>
    %c512 = arith.constant 512 : index
    %c0_11 = arith.constant 0 : index
    %19 = vector.load %arg5[%c512, %c0_11] : memref<576x6xf32, #tpu.memory_space<vmem>>, vector<64x6xf32>
    tpu.vector_store %arg5[%c512, %c0_11], %18 {strides = array<i32>} : memref<576x6xf32, #tpu.memory_space<vmem>>, vector<64x6xf32>,
    %c0_12 = arith.constant 0 : index
    %c0_13 = arith.constant 0 : index
    %20 = vector.load %arg2[%c0_12, %c0_13] : memref<128x576xf32, #tpu.memory_space<vmem>>, vector<128x576xf32>
    %c0_14 = arith.constant 0 : index
    %c0_15 = arith.constant 0 : index
    %21 = vector.load %arg5[%c0_14, %c0_15] : memref<576x6xf32, #tpu.memory_space<vmem>>, vector<576x6xf32>
    %cst = arith.constant dense<0.000000e+00> : vector<128x6xf32>
    %22 = tpu.matmul %20, %21, %cst {dimension_numbers = #tpu.dot_dimension_numbers<[1], [0], [0], [1], [0, 0, 1, 1], [], []>} : vector<128x576xf32>, vector<576x6xf32>, vector<128x6xf32> -> vector<128x6xf32>
    %c0_16 = arith.constant 0 : index
    %c0_17 = arith.constant 0 : index
    %23 = vector.load %arg3[%c0_16, %c0_17] : memref<128x1xf32, #tpu.memory_space<vmem>>, vector<128x1xf32>
    %24 = vector.broadcast %23 : vector<128x1xf32> to vector<128x6xf32>
    %25 = arith.addf %22, %24 : vector<128x6xf32>
    %cst_18 = arith.constant 0.000000e+00 : f32
    %26 = vector.broadcast %cst_18 : f32 to vector<128x6xf32>
    %27 = arith.maximumf %25, %26 : vector<128x6xf32>
    %c0_19 = arith.constant 0 : index
    %c0_20 = arith.constant 0 : index
    %c0_21 = arith.constant 0 : index
    %28 = vector.load %arg4[%c0_19, %c0_20, %c0_21] : memref<1x128x6xf32, #tpu.memory_space<vmem>>, vector<1x128x6xf32>
    %29 = vector.shape_cast %28 : vector<1x128x6xf32> to vector<128x6xf32>
    %30 = vector.shape_cast %27 : vector<128x6xf32> to vector<1x128x6xf32>
    tpu.vector_store %arg4[%c0_19, %c0_20, %c0_21], %30 {strides = array<i32>} : memref<1x128x6xf32, #tpu.memory_space<vmem>>, vector<1x128x6xf32>,
    return
  }
  func.func @transform_0(%arg0: i32) -> (i32, i32, i32) {
    %c0_i32 = arith.constant 0 : i32
    %c0_i32_0 = arith.constant 0 : i32
    %c0_i32_1 = arith.constant 0 : i32
    return %arg0, %c0_i32, %c0_i32_0 : i32, i32, i32
  }
  func.func @transform_1(%arg0: i32) -> (i32, i32) {
    %c0_i32 = arith.constant 0 : i32
    %c0_i32_0 = arith.constant 0 : i32
    %c0_i32_1 = arith.constant 0 : i32
    return %c0_i32, %c0_i32_0 : i32, i32
  }
  func.func @transform_2(%arg0: i32) -> (i32, i32) {
    %c0_i32 = arith.constant 0 : i32
    %c0_i32_0 = arith.constant 0 : i32
    %c0_i32_1 = arith.constant 0 : i32
    return %c0_i32, %c0_i32_0 : i32, i32
  }
  func.func @transform_3(%arg0: i32) -> (i32, i32, i32) {
    %c0_i32 = arith.constant 0 : i32
    %c0_i32_0 = arith.constant 0 : i32
    %c0_i32_1 = arith.constant 0 : i32
    return %arg0, %c0_i32, %c0_i32_0 : i32, i32, i32
  }
}

module attributes {stable_mosaic.version = 11 : i64} {
  func.func @_loc_head_kernel(%arg0: i32, %arg1: memref<2x256xf32, #tpu.memory_space<vmem>>, %arg2: memref<256x128xf32, #tpu.memory_space<vmem>>, %arg3: memref<1x128xf32, #tpu.memory_space<vmem>>, %arg4: memref<128x6xf32, #tpu.memory_space<vmem>>, %arg5: memref<1x6xf32, #tpu.memory_space<vmem>>, %arg6: memref<2x6xf32, #tpu.memory_space<vmem>>, %arg7: memref<2x128xf32, #tpu.memory_space<vmem>>) attributes {dimension_semantics = [#tpu.dimension_semantics<arbitrary>], iteration_bounds = array<i64: 2>, scalar_prefetch = 0 : i64, scratch_operands = 1 : i64, tpu.core_type = #tpu.core_type<tc>, window_params = [{transform_indices = @transform_0, window_bounds = array<i64: 2, 256>}, {transform_indices = @transform_1, window_bounds = array<i64: 256, 128>}, {pipeline_mode = #tpu.pipeline_mode<synchronous>, transform_indices = @transform_2, window_bounds = array<i64: 1, 128>}, {pipeline_mode = #tpu.pipeline_mode<synchronous>, transform_indices = @transform_3, window_bounds = array<i64: 128, 6>}, {pipeline_mode = #tpu.pipeline_mode<synchronous>, transform_indices = @transform_4, window_bounds = array<i64: 1, 6>}, {pipeline_mode = #tpu.pipeline_mode<synchronous>, transform_indices = @transform_5, window_bounds = array<i64: 2, 6>}]} {
    %c0_i32 = arith.constant 0 : i32
    %0 = arith.cmpi eq, %arg0, %c0_i32 : i32
    %1 = arith.extui %0 : i1 to i32
    %c0_i32_0 = arith.constant 0 : i32
    %2 = arith.cmpi ne, %1, %c0_i32_0 : i32
    scf.if %2 {
      %cst_9 = arith.constant 0.000000e+00 : f32
      %12 = vector.broadcast %cst_9 : f32 to vector<2x128xf32>
      %c0_10 = arith.constant 0 : index
      %c0_11 = arith.constant 0 : index
      %13 = vector.load %arg7[%c0_10, %c0_11] : memref<2x128xf32, #tpu.memory_space<vmem>>, vector<2x128xf32>
      tpu.vector_store %arg7[%c0_10, %c0_11], %12 {strides = array<i32>} : memref<2x128xf32, #tpu.memory_space<vmem>>, vector<2x128xf32>,
    } else {
    }
    %c0 = arith.constant 0 : index
    %c0_1 = arith.constant 0 : index
    %3 = vector.load %arg7[%c0, %c0_1] : memref<2x128xf32, #tpu.memory_space<vmem>>, vector<2x128xf32>
    %c0_2 = arith.constant 0 : index
    %c0_3 = arith.constant 0 : index
    %4 = vector.load %arg1[%c0_2, %c0_3] : memref<2x256xf32, #tpu.memory_space<vmem>>, vector<2x256xf32>
    %c0_4 = arith.constant 0 : index
    %c0_5 = arith.constant 0 : index
    %5 = vector.load %arg2[%c0_4, %c0_5] : memref<256x128xf32, #tpu.memory_space<vmem>>, vector<256x128xf32>
    %cst = arith.constant dense<0.000000e+00> : vector<2x128xf32>
    %6 = tpu.matmul %4, %5, %cst {dimension_numbers = #tpu.dot_dimension_numbers<[1], [0], [0], [1], [0, 0, 1, 1], [], []>} : vector<2x256xf32>, vector<256x128xf32>, vector<2x128xf32> -> vector<2x128xf32>
    %7 = arith.addf %3, %6 : vector<2x128xf32>
    %c0_6 = arith.constant 0 : index
    %c0_7 = arith.constant 0 : index
    %8 = vector.load %arg7[%c0_6, %c0_7] : memref<2x128xf32, #tpu.memory_space<vmem>>, vector<2x128xf32>
    tpu.vector_store %arg7[%c0_6, %c0_7], %7 {strides = array<i32>} : memref<2x128xf32, #tpu.memory_space<vmem>>, vector<2x128xf32>,
    %c1_i32 = arith.constant 1 : i32
    %9 = arith.cmpi eq, %arg0, %c1_i32 : i32
    %10 = arith.extui %9 : i1 to i32
    %c0_i32_8 = arith.constant 0 : i32
    %11 = arith.cmpi ne, %10, %c0_i32_8 : i32
    scf.if %11 {
      %c0_9 = arith.constant 0 : index
      %c0_10 = arith.constant 0 : index
      %12 = vector.load %arg7[%c0_9, %c0_10] : memref<2x128xf32, #tpu.memory_space<vmem>>, vector<2x128xf32>
      %c0_11 = arith.constant 0 : index
      %c0_12 = arith.constant 0 : index
      %13 = vector.load %arg3[%c0_11, %c0_12] : memref<1x128xf32, #tpu.memory_space<vmem>>, vector<1x128xf32>
      %14 = vector.broadcast %13 : vector<1x128xf32> to vector<2x128xf32>
      %15 = arith.addf %12, %14 : vector<2x128xf32>
      %cst_13 = arith.constant 0.000000e+00 : f32
      %16 = vector.broadcast %cst_13 : f32 to vector<2x128xf32>
      %17 = arith.maximumf %15, %16 : vector<2x128xf32>
      %c0_14 = arith.constant 0 : index
      %c0_15 = arith.constant 0 : index
      %18 = vector.load %arg4[%c0_14, %c0_15] : memref<128x6xf32, #tpu.memory_space<vmem>>, vector<128x6xf32>
      %cst_16 = arith.constant dense<0.000000e+00> : vector<2x6xf32>
      %19 = tpu.matmul %17, %18, %cst_16 {dimension_numbers = #tpu.dot_dimension_numbers<[1], [0], [0], [1], [0, 0, 1, 1], [], []>} : vector<2x128xf32>, vector<128x6xf32>, vector<2x6xf32> -> vector<2x6xf32>
      %c0_17 = arith.constant 0 : index
      %c0_18 = arith.constant 0 : index
      %20 = vector.load %arg5[%c0_17, %c0_18] : memref<1x6xf32, #tpu.memory_space<vmem>>, vector<1x6xf32>
      %21 = vector.broadcast %20 : vector<1x6xf32> to vector<2x6xf32>
      %22 = arith.addf %19, %21 : vector<2x6xf32>
      %c0_19 = arith.constant 0 : index
      %c0_20 = arith.constant 0 : index
      %23 = vector.load %arg6[%c0_19, %c0_20] : memref<2x6xf32, #tpu.memory_space<vmem>>, vector<2x6xf32>
      tpu.vector_store %arg6[%c0_19, %c0_20], %22 {strides = array<i32>} : memref<2x6xf32, #tpu.memory_space<vmem>>, vector<2x6xf32>,
    } else {
    }
    return
  }
  func.func @transform_0(%arg0: i32) -> (i32, i32) {
    %c0_i32 = arith.constant 0 : i32
    %c0_i32_0 = arith.constant 0 : i32
    return %c0_i32, %arg0 : i32, i32
  }
  func.func @transform_1(%arg0: i32) -> (i32, i32) {
    %c0_i32 = arith.constant 0 : i32
    %c0_i32_0 = arith.constant 0 : i32
    return %arg0, %c0_i32 : i32, i32
  }
  func.func @transform_2(%arg0: i32) -> (i32, i32) {
    %c0_i32 = arith.constant 0 : i32
    %c0_i32_0 = arith.constant 0 : i32
    %c0_i32_1 = arith.constant 0 : i32
    return %c0_i32, %c0_i32_0 : i32, i32
  }
  func.func @transform_3(%arg0: i32) -> (i32, i32) {
    %c0_i32 = arith.constant 0 : i32
    %c0_i32_0 = arith.constant 0 : i32
    %c0_i32_1 = arith.constant 0 : i32
    return %c0_i32, %c0_i32_0 : i32, i32
  }
  func.func @transform_4(%arg0: i32) -> (i32, i32) {
    %c0_i32 = arith.constant 0 : i32
    %c0_i32_0 = arith.constant 0 : i32
    %c0_i32_1 = arith.constant 0 : i32
    return %c0_i32, %c0_i32_0 : i32, i32
  }
  func.func @transform_5(%arg0: i32) -> (i32, i32) {
    %c0_i32 = arith.constant 0 : i32
    %c0_i32_0 = arith.constant 0 : i32
    %c0_i32_1 = arith.constant 0 : i32
    return %c0_i32, %c0_i32_0 : i32, i32
  }
}

module attributes {stable_mosaic.version = 11 : i64} {
  func.func @_grid_sample_kernel(%arg0: i32, %arg1: memref<1x3x256xf32, #tpu.memory_space<vmem>>, %arg2: memref<1x1x6xf32, #tpu.memory_space<vmem>>, %arg3: memref<1x3x256xf32, #tpu.memory_space<vmem>>) attributes {dimension_semantics = [#tpu.dimension_semantics<parallel>], iteration_bounds = array<i64: 2>, scalar_prefetch = 0 : i64, scratch_operands = 0 : i64, tpu.core_type = #tpu.core_type<tc>, window_params = [{transform_indices = @transform_0, window_bounds = array<i64: 1, 3, 256>}, {transform_indices = @transform_1, window_bounds = array<i64: 1, 1, 6>}, {transform_indices = @transform_2, window_bounds = array<i64: 1, 3, 256>}]} {
    %c0 = arith.constant 0 : index
    %c0_0 = arith.constant 0 : index
    %c0_1 = arith.constant 0 : index
    %0 = vector.load %arg2[%c0, %c0_0, %c0_1] : memref<1x1x6xf32, #tpu.memory_space<vmem>>, vector<1x1x6xf32>
    %1 = vector.shape_cast %0 : vector<1x1x6xf32> to vector<1x6xf32>
    %2 = vector.extract_strided_slice %1 {offsets = [0, 0], sizes = [1, 1], strides = [1, 1]} : vector<1x6xf32> to vector<1x1xf32>
    %3 = vector.extract_strided_slice %1 {offsets = [0, 1], sizes = [1, 1], strides = [1, 1]} : vector<1x6xf32> to vector<1x1xf32>
    %4 = vector.extract_strided_slice %1 {offsets = [0, 2], sizes = [1, 1], strides = [1, 1]} : vector<1x6xf32> to vector<1x1xf32>
    %5 = vector.extract_strided_slice %1 {offsets = [0, 3], sizes = [1, 1], strides = [1, 1]} : vector<1x6xf32> to vector<1x1xf32>
    %6 = vector.extract_strided_slice %1 {offsets = [0, 4], sizes = [1, 1], strides = [1, 1]} : vector<1x6xf32> to vector<1x1xf32>
    %7 = vector.extract_strided_slice %1 {offsets = [0, 5], sizes = [1, 1], strides = [1, 1]} : vector<1x6xf32> to vector<1x1xf32>
    %8 = tpu.iota {dimensions = array<i32: 1>} : vector<1x256xi32>
    %9 = arith.sitofp %8 : vector<1x256xi32> to vector<1x256xf32>
    %cst = arith.constant 5.000000e-01 : f32
    %10 = vector.broadcast %cst : f32 to vector<1x256xf32>
    %11 = arith.addf %9, %10 : vector<1x256xf32>
    %cst_2 = arith.constant 1.600000e+01 : f32
    %12 = vector.broadcast %cst_2 : f32 to vector<1x256xf32>
    %13 = arith.divf %11, %12 : vector<1x256xf32>
    %14 = math.floor %13 : vector<1x256xf32>
    %cst_3 = arith.constant 1.600000e+01 : f32
    %15 = vector.broadcast %cst_3 : f32 to vector<1x256xf32>
    %16 = arith.mulf %14, %15 : vector<1x256xf32>
    %17 = arith.subf %9, %16 : vector<1x256xf32>
    %cst_4 = arith.constant 2.000000e+00 : f32
    %18 = vector.broadcast %cst_4 : f32 to vector<1x256xf32>
    %19 = arith.mulf %18, %17 : vector<1x256xf32>
    %cst_5 = arith.constant 1.000000e+00 : f32
    %20 = vector.broadcast %cst_5 : f32 to vector<1x256xf32>
    %21 = arith.addf %19, %20 : vector<1x256xf32>
    %cst_6 = arith.constant 1.600000e+01 : f32
    %22 = vector.broadcast %cst_6 : f32 to vector<1x256xf32>
    %23 = arith.divf %21, %22 : vector<1x256xf32>
    %cst_7 = arith.constant 1.000000e+00 : f32
    %24 = vector.broadcast %cst_7 : f32 to vector<1x256xf32>
    %25 = arith.subf %23, %24 : vector<1x256xf32>
    %cst_8 = arith.constant 2.000000e+00 : f32
    %26 = vector.broadcast %cst_8 : f32 to vector<1x256xf32>
    %27 = arith.mulf %26, %14 : vector<1x256xf32>
    %cst_9 = arith.constant 1.000000e+00 : f32
    %28 = vector.broadcast %cst_9 : f32 to vector<1x256xf32>
    %29 = arith.addf %27, %28 : vector<1x256xf32>
    %cst_10 = arith.constant 1.600000e+01 : f32
    %30 = vector.broadcast %cst_10 : f32 to vector<1x256xf32>
    %31 = arith.divf %29, %30 : vector<1x256xf32>
    %cst_11 = arith.constant 1.000000e+00 : f32
    %32 = vector.broadcast %cst_11 : f32 to vector<1x256xf32>
    %33 = arith.subf %31, %32 : vector<1x256xf32>
    %34 = vector.broadcast %2 : vector<1x1xf32> to vector<1x256xf32>
    %35 = arith.mulf %34, %25 : vector<1x256xf32>
    %36 = vector.broadcast %3 : vector<1x1xf32> to vector<1x256xf32>
    %37 = arith.mulf %36, %33 : vector<1x256xf32>
    %38 = arith.addf %35, %37 : vector<1x256xf32>
    %39 = vector.broadcast %4 : vector<1x1xf32> to vector<1x256xf32>
    %40 = arith.addf %38, %39 : vector<1x256xf32>
    %41 = vector.broadcast %5 : vector<1x1xf32> to vector<1x256xf32>
    %42 = arith.mulf %41, %25 : vector<1x256xf32>
    %43 = vector.broadcast %6 : vector<1x1xf32> to vector<1x256xf32>
    %44 = arith.mulf %43, %33 : vector<1x256xf32>
    %45 = arith.addf %42, %44 : vector<1x256xf32>
    %46 = vector.broadcast %7 : vector<1x1xf32> to vector<1x256xf32>
    %47 = arith.addf %45, %46 : vector<1x256xf32>
    %cst_12 = arith.constant 1.000000e+00 : f32
    %48 = vector.broadcast %cst_12 : f32 to vector<1x256xf32>
    %49 = arith.addf %40, %48 : vector<1x256xf32>
    %cst_13 = arith.constant 1.600000e+01 : f32
    %50 = vector.broadcast %cst_13 : f32 to vector<1x256xf32>
    %51 = arith.mulf %49, %50 : vector<1x256xf32>
    %cst_14 = arith.constant 1.000000e+00 : f32
    %52 = vector.broadcast %cst_14 : f32 to vector<1x256xf32>
    %53 = arith.subf %51, %52 : vector<1x256xf32>
    %cst_15 = arith.constant 5.000000e-01 : f32
    %54 = vector.broadcast %cst_15 : f32 to vector<1x256xf32>
    %55 = arith.mulf %53, %54 : vector<1x256xf32>
    %cst_16 = arith.constant 1.000000e+00 : f32
    %56 = vector.broadcast %cst_16 : f32 to vector<1x256xf32>
    %57 = arith.addf %47, %56 : vector<1x256xf32>
    %cst_17 = arith.constant 1.600000e+01 : f32
    %58 = vector.broadcast %cst_17 : f32 to vector<1x256xf32>
    %59 = arith.mulf %57, %58 : vector<1x256xf32>
    %cst_18 = arith.constant 1.000000e+00 : f32
    %60 = vector.broadcast %cst_18 : f32 to vector<1x256xf32>
    %61 = arith.subf %59, %60 : vector<1x256xf32>
    %cst_19 = arith.constant 5.000000e-01 : f32
    %62 = vector.broadcast %cst_19 : f32 to vector<1x256xf32>
    %63 = arith.mulf %61, %62 : vector<1x256xf32>
    %64 = math.floor %55 : vector<1x256xf32>
    %65 = math.floor %63 : vector<1x256xf32>
    %cst_20 = arith.constant 1.000000e+00 : f32
    %66 = vector.broadcast %cst_20 : f32 to vector<1x256xf32>
    %67 = arith.addf %64, %66 : vector<1x256xf32>
    %cst_21 = arith.constant 1.000000e+00 : f32
    %68 = vector.broadcast %cst_21 : f32 to vector<1x256xf32>
    %69 = arith.addf %65, %68 : vector<1x256xf32>
    %70 = arith.subf %55, %64 : vector<1x256xf32>
    %cst_22 = arith.constant 1.000000e+00 : f32
    %71 = vector.broadcast %cst_22 : f32 to vector<1x256xf32>
    %72 = arith.subf %71, %70 : vector<1x256xf32>
    %73 = arith.subf %63, %65 : vector<1x256xf32>
    %cst_23 = arith.constant 1.000000e+00 : f32
    %74 = vector.broadcast %cst_23 : f32 to vector<1x256xf32>
    %75 = arith.subf %74, %73 : vector<1x256xf32>
    %76 = tpu.iota {dimensions = array<i32: 0>} : vector<256x256xi32>
    %77 = arith.sitofp %76 : vector<256x256xi32> to vector<256x256xf32>
    %cst_24 = arith.constant 0.000000e+00 : f32
    %78 = vector.broadcast %cst_24 : f32 to vector<256x256xf32>
    %cst_25 = arith.constant 0.000000e+00 : f32
    %79 = vector.broadcast %cst_25 : f32 to vector<1x256xf32>
    %80 = arith.cmpf oge, %64, %79 : vector<1x256xf32>
    %cst_26 = arith.constant 1.600000e+01 : f32
    %81 = vector.broadcast %cst_26 : f32 to vector<1x256xf32>
    %82 = arith.cmpf olt, %64, %81 : vector<1x256xf32>
    %83 = arith.andi %80, %82 : vector<1x256xi1>
    %cst_27 = arith.constant 0.000000e+00 : f32
    %84 = vector.broadcast %cst_27 : f32 to vector<1x256xf32>
    %85 = arith.cmpf oge, %65, %84 : vector<1x256xf32>
    %86 = arith.andi %83, %85 : vector<1x256xi1>
    %cst_28 = arith.constant 1.600000e+01 : f32
    %87 = vector.broadcast %cst_28 : f32 to vector<1x256xf32>
    %88 = arith.cmpf olt, %65, %87 : vector<1x256xf32>
    %89 = arith.andi %86, %88 : vector<1x256xi1>
    %cst_29 = arith.constant 1.600000e+01 : f32
    %90 = vector.broadcast %cst_29 : f32 to vector<1x256xf32>
    %91 = arith.mulf %65, %90 : vector<1x256xf32>
    %92 = arith.addf %91, %64 : vector<1x256xf32>
    %cst_30 = arith.constant -1.000000e+00 : f32
    %93 = vector.broadcast %cst_30 : f32 to vector<1x256xf32>
    %94 = arith.select %89, %92, %93 : vector<1x256xi1>, vector<1x256xf32>
    %95 = vector.broadcast %94 : vector<1x256xf32> to vector<256x256xf32>
    %96 = arith.cmpf oeq, %77, %95 : vector<256x256xf32>
    %97 = arith.mulf %72, %75 : vector<1x256xf32>
    %cst_31 = arith.constant 0.000000e+00 : f32
    %98 = vector.shape_cast %97 : vector<1x256xf32> to vector<1x256xf32>
    %99 = vector.broadcast %98 : vector<1x256xf32> to vector<256x256xf32>
    %100 = vector.broadcast %cst_31 : f32 to vector<256x256xf32>
    %101 = arith.select %96, %99, %100 : vector<256x256xi1>, vector<256x256xf32>
    %102 = arith.addf %78, %101 : vector<256x256xf32>
    %cst_32 = arith.constant 0.000000e+00 : f32
    %103 = vector.broadcast %cst_32 : f32 to vector<1x256xf32>
    %104 = arith.cmpf oge, %64, %103 : vector<1x256xf32>
    %cst_33 = arith.constant 1.600000e+01 : f32
    %105 = vector.broadcast %cst_33 : f32 to vector<1x256xf32>
    %106 = arith.cmpf olt, %64, %105 : vector<1x256xf32>
    %107 = arith.andi %104, %106 : vector<1x256xi1>
    %cst_34 = arith.constant 0.000000e+00 : f32
    %108 = vector.broadcast %cst_34 : f32 to vector<1x256xf32>
    %109 = arith.cmpf oge, %69, %108 : vector<1x256xf32>
    %110 = arith.andi %107, %109 : vector<1x256xi1>
    %cst_35 = arith.constant 1.600000e+01 : f32
    %111 = vector.broadcast %cst_35 : f32 to vector<1x256xf32>
    %112 = arith.cmpf olt, %69, %111 : vector<1x256xf32>
    %113 = arith.andi %110, %112 : vector<1x256xi1>
    %cst_36 = arith.constant 1.600000e+01 : f32
    %114 = vector.broadcast %cst_36 : f32 to vector<1x256xf32>
    %115 = arith.mulf %69, %114 : vector<1x256xf32>
    %116 = arith.addf %115, %64 : vector<1x256xf32>
    %cst_37 = arith.constant -1.000000e+00 : f32
    %117 = vector.broadcast %cst_37 : f32 to vector<1x256xf32>
    %118 = arith.select %113, %116, %117 : vector<1x256xi1>, vector<1x256xf32>
    %119 = vector.broadcast %118 : vector<1x256xf32> to vector<256x256xf32>
    %120 = arith.cmpf oeq, %77, %119 : vector<256x256xf32>
    %121 = arith.mulf %72, %73 : vector<1x256xf32>
    %cst_38 = arith.constant 0.000000e+00 : f32
    %122 = vector.shape_cast %121 : vector<1x256xf32> to vector<1x256xf32>
    %123 = vector.broadcast %122 : vector<1x256xf32> to vector<256x256xf32>
    %124 = vector.broadcast %cst_38 : f32 to vector<256x256xf32>
    %125 = arith.select %120, %123, %124 : vector<256x256xi1>, vector<256x256xf32>
    %126 = arith.addf %102, %125 : vector<256x256xf32>
    %cst_39 = arith.constant 0.000000e+00 : f32
    %127 = vector.broadcast %cst_39 : f32 to vector<1x256xf32>
    %128 = arith.cmpf oge, %67, %127 : vector<1x256xf32>
    %cst_40 = arith.constant 1.600000e+01 : f32
    %129 = vector.broadcast %cst_40 : f32 to vector<1x256xf32>
    %130 = arith.cmpf olt, %67, %129 : vector<1x256xf32>
    %131 = arith.andi %128, %130 : vector<1x256xi1>
    %cst_41 = arith.constant 0.000000e+00 : f32
    %132 = vector.broadcast %cst_41 : f32 to vector<1x256xf32>
    %133 = arith.cmpf oge, %65, %132 : vector<1x256xf32>
    %134 = arith.andi %131, %133 : vector<1x256xi1>
    %cst_42 = arith.constant 1.600000e+01 : f32
    %135 = vector.broadcast %cst_42 : f32 to vector<1x256xf32>
    %136 = arith.cmpf olt, %65, %135 : vector<1x256xf32>
    %137 = arith.andi %134, %136 : vector<1x256xi1>
    %cst_43 = arith.constant 1.600000e+01 : f32
    %138 = vector.broadcast %cst_43 : f32 to vector<1x256xf32>
    %139 = arith.mulf %65, %138 : vector<1x256xf32>
    %140 = arith.addf %139, %67 : vector<1x256xf32>
    %cst_44 = arith.constant -1.000000e+00 : f32
    %141 = vector.broadcast %cst_44 : f32 to vector<1x256xf32>
    %142 = arith.select %137, %140, %141 : vector<1x256xi1>, vector<1x256xf32>
    %143 = vector.broadcast %142 : vector<1x256xf32> to vector<256x256xf32>
    %144 = arith.cmpf oeq, %77, %143 : vector<256x256xf32>
    %145 = arith.mulf %70, %75 : vector<1x256xf32>
    %cst_45 = arith.constant 0.000000e+00 : f32
    %146 = vector.shape_cast %145 : vector<1x256xf32> to vector<1x256xf32>
    %147 = vector.broadcast %146 : vector<1x256xf32> to vector<256x256xf32>
    %148 = vector.broadcast %cst_45 : f32 to vector<256x256xf32>
    %149 = arith.select %144, %147, %148 : vector<256x256xi1>, vector<256x256xf32>
    %150 = arith.addf %126, %149 : vector<256x256xf32>
    %cst_46 = arith.constant 0.000000e+00 : f32
    %151 = vector.broadcast %cst_46 : f32 to vector<1x256xf32>
    %152 = arith.cmpf oge, %67, %151 : vector<1x256xf32>
    %cst_47 = arith.constant 1.600000e+01 : f32
    %153 = vector.broadcast %cst_47 : f32 to vector<1x256xf32>
    %154 = arith.cmpf olt, %67, %153 : vector<1x256xf32>
    %155 = arith.andi %152, %154 : vector<1x256xi1>
    %cst_48 = arith.constant 0.000000e+00 : f32
    %156 = vector.broadcast %cst_48 : f32 to vector<1x256xf32>
    %157 = arith.cmpf oge, %69, %156 : vector<1x256xf32>
    %158 = arith.andi %155, %157 : vector<1x256xi1>
    %cst_49 = arith.constant 1.600000e+01 : f32
    %159 = vector.broadcast %cst_49 : f32 to vector<1x256xf32>
    %160 = arith.cmpf olt, %69, %159 : vector<1x256xf32>
    %161 = arith.andi %158, %160 : vector<1x256xi1>
    %cst_50 = arith.constant 1.600000e+01 : f32
    %162 = vector.broadcast %cst_50 : f32 to vector<1x256xf32>
    %163 = arith.mulf %69, %162 : vector<1x256xf32>
    %164 = arith.addf %163, %67 : vector<1x256xf32>
    %cst_51 = arith.constant -1.000000e+00 : f32
    %165 = vector.broadcast %cst_51 : f32 to vector<1x256xf32>
    %166 = arith.select %161, %164, %165 : vector<1x256xi1>, vector<1x256xf32>
    %167 = vector.broadcast %166 : vector<1x256xf32> to vector<256x256xf32>
    %168 = arith.cmpf oeq, %77, %167 : vector<256x256xf32>
    %169 = arith.mulf %70, %73 : vector<1x256xf32>
    %cst_52 = arith.constant 0.000000e+00 : f32
    %170 = vector.shape_cast %169 : vector<1x256xf32> to vector<1x256xf32>
    %171 = vector.broadcast %170 : vector<1x256xf32> to vector<256x256xf32>
    %172 = vector.broadcast %cst_52 : f32 to vector<256x256xf32>
    %173 = arith.select %168, %171, %172 : vector<256x256xi1>, vector<256x256xf32>
    %174 = arith.addf %150, %173 : vector<256x256xf32>
    %c0_53 = arith.constant 0 : index
    %c0_54 = arith.constant 0 : index
    %c0_55 = arith.constant 0 : index
    %175 = vector.load %arg1[%c0_53, %c0_54, %c0_55] : memref<1x3x256xf32, #tpu.memory_space<vmem>>, vector<1x3x256xf32>
    %176 = vector.shape_cast %175 : vector<1x3x256xf32> to vector<3x256xf32>
    %cst_56 = arith.constant dense<0.000000e+00> : vector<3x256xf32>
    %177 = tpu.matmul %176, %174, %cst_56 {dimension_numbers = #tpu.dot_dimension_numbers<[1], [0], [0], [1], [0, 0, 1, 1], [], []>} : vector<3x256xf32>, vector<256x256xf32>, vector<3x256xf32> -> vector<3x256xf32>
    %c0_57 = arith.constant 0 : index
    %c0_58 = arith.constant 0 : index
    %c0_59 = arith.constant 0 : index
    %178 = vector.load %arg3[%c0_57, %c0_58, %c0_59] : memref<1x3x256xf32, #tpu.memory_space<vmem>>, vector<1x3x256xf32>
    %179 = vector.shape_cast %178 : vector<1x3x256xf32> to vector<3x256xf32>
    %180 = vector.shape_cast %177 : vector<3x256xf32> to vector<1x3x256xf32>
    tpu.vector_store %arg3[%c0_57, %c0_58, %c0_59], %180 {strides = array<i32>} : memref<1x3x256xf32, #tpu.memory_space<vmem>>, vector<1x3x256xf32>,
    return
  }
  func.func @transform_0(%arg0: i32) -> (i32, i32, i32) {
    %c0_i32 = arith.constant 0 : i32
    %c0_i32_0 = arith.constant 0 : i32
    %c0_i32_1 = arith.constant 0 : i32
    return %arg0, %c0_i32, %c0_i32_0 : i32, i32, i32
  }
  func.func @transform_1(%arg0: i32) -> (i32, i32, i32) {
    %c0_i32 = arith.constant 0 : i32
    %c0_i32_0 = arith.constant 0 : i32
    %c0_i32_1 = arith.constant 0 : i32
    return %arg0, %c0_i32, %c0_i32_0 : i32, i32, i32
  }
  func.func @transform_2(%arg0: i32) -> (i32, i32, i32) {
    %c0_i32 = arith.constant 0 : i32
    %c0_i32_0 = arith.constant 0 : i32
    %c0_i32_1 = arith.constant 0 : i32
    return %arg0, %c0_i32, %c0_i32_0 : i32, i32, i32
  }
}

</mosaic_0001>

<bundles_post_ra>
// kernel: stn_forward.5
= control target key start
LH: loop header
LB: loop body
LE: loop exit
PB: predicated region body
PF: predicated region fallthrough
CT: control target
= control target key end

     0   :  { %s518_s12 = smov 0   ;;  %s583_s0 = inlined_call_operand.vmem [shape: f32[2,32,82], index: 0, kind: input, shape index: {}]   ;;  %s584_s1 = inlined_call_operand.vmem [shape: f32[32,72], index: 1, kind: input, shape index: {}]   ;;  %s585_s2 = inlined_call_operand.vmem [shape: f32[32,1], index: 2, kind: input, shape index: {}]   ;;  %s586_s3 = inlined_call_operand.vmem [shape: f32[2,32,72], index: 3, kind: output, shape index: {}]  }
   0x1 LB: > { %s400_s13 = sadd.s32 4294967295, %s492_s12   ;;  %p404_p0 = scmp.ge.s32.totalorder %s492_s12, 1  ;;  %s492_s12 = sphi %s518_s12, %s13_s12  }
   0x2   : > { %p137_p1 = scmp.lt.s32.totalorder %s492_s12, 3 }
   0x4   : > { %p138_p2 = pnand %p404_p0, %p137_p1 }
   0x5   : > { %p161_p3 = scmp.lt.s32.totalorder (!%p138_p2), %s400_s13, 1  ;;  %s494_s18 = smov (!%p138_p2), 118  }
   0x6   : > { %141 = sbr.rel (%p138_p2) target bundleno = 358 (0x166), region = 32  ;;  %s495_s19 = smov (!%p138_p2), 119  }
   0x7   : > { %s496_s20 = smov (!%p138_p2), 127  }
   0xb   : > { %s588_s13 = smov (!%p161_p3, %s400_s13), 1  ;;  %vm175_vm0 = vcmask 588800   ;;  %v203_v4 = vld [vmem:[%s584_s1] sm:$0xff]  ;;  %v205_v5 = vld [vmem:[%s584_s1 + $0x10] sm:$0xff]  ;;  %v497_v7 = vmov 0   ;;  %v217_v8 = vld [vmem:[%s585_s2 + $0x8] sm:$0xff] }
   0xc   : > { %s415_s14 = sshll.u32 %s588_s13, 5  ;;  %448 = vmatprep.mubr.msk.f32.mxu0 %vm175_vm0, %v203_v4  ;;  %451 = vmatprep.mubr.msk.f32.mxu1 %vm175_vm0, %v205_v5  ;;  %v216_v6 = vld [vmem:[%s585_s2] sm:$0xff]  ;;  %v218_v9 = vld [vmem:[%s585_s2 + $0x10] sm:$0xff]  ;;  %v219_v10 = vld [vmem:[%s585_s2 + $0x18] sm:$0xff] }
   0xd   : > { %s165_s17 = scalar_lea.vmem %s583_s0, %s415_s14  ;;  %484 = vset.pattern.permute.xlu1 %v497_v7  ;;  %485 = vset.pattern.permute.xlu0 %v497_v7  ;;  %v204_v25 = vld [vmem:[%s584_s1 + $0x8] sm:$0xff]  ;;  %v206_v26 = vld [vmem:[%s584_s1 + $0x18] sm:$0xff]  ;;  %s170_s15 = scalar_lea.vmem %s586_s3, %s415_s14 }
   0xe   : > { %v171_v0 = vld [vmem:[%s165_s17] sm:$0xff]  ;;  %v174_v1 = vld [vmem:[%s165_s17 + $0x18] sm:$0xff]  ;;  %v172_v2 = vld [vmem:[%s165_s17 + $0x8] sm:$0xff] }
   0xf   : > { %184 = vst.msk [vmem:[#allocation2 + $0x20] sm:$0xff] %vm175_vm0, %v174_v1  ;;  %199 = vrot.lane.b32.xlu0 %v171_v0, %s494_s18  ;;  %176 = vst.msk [vmem:[#allocation2] sm:$0xff] %vm175_vm0, %v171_v0  ;;  %190 = vrot.lane.b32.xlu1 %v171_v0, %s495_s19  ;;  %v173_v3 = vld [vmem:[%s165_s17 + $0x10] sm:$0xff] }
  0x10   : > { %177 = vst.msk [vmem:[#allocation2 + $0x8] sm:$0xff] %vm175_vm0, %v172_v2  ;;  %183 = vst.msk [vmem:[#allocation2 + $0x18] sm:$0xff] %vm175_vm0, %v173_v3 }
  0x13   : > { %195 = vrot.lane.b32.xlu0 %v172_v2, %s495_s19  ;;  %186 = vrot.lane.b32.xlu1 %v173_v3, %s496_s20 }
  0x16   : > { %v211_v20 = vld [vmem:[#allocation2 + $0x20] sm:$0xff] }
  0x17   : > { %179 = vrot.lane.b32.xlu0 %v171_v0, %s496_s20  ;;  %222 = vperm.xlu1 %484, %v216_v6   ;;  %v210_v21 = vld [vmem:[#allocation2 + $0x18] sm:$0xff]  ;;  %v208_v23 = vld [vmem:[#allocation2 + $0x8] sm:$0xff]  ;;  %v207_v24 = vld [vmem:[#allocation2] sm:$0xff] }
  0x1b   : > { %227 = vperm.xlu0 %485, %v217_v8   ;;  %232 = vperm.xlu1 %484, %v218_v9  }
  0x1f   : > { %237 = vperm.xlu1 %484, %v219_v10  }
  0x81   : > { %v200_v11 = vpop.permute.xlu0 %199  ;;  %v191_v12 = vpop.permute.xlu1 %190 }
  0x82   : > { %202 = vst.msk [vmem:[#allocation2 + $0x40] sm:$0xff] %vm175_vm0, %v200_v11  ;;  %193 = vst.msk [vmem:[#allocation2 + $0x30] sm:$0xff] %vm175_vm0, %v191_v12 }
  0x85   : > { %v196_v13 = vpop.permute.xlu0 %195  ;;  %v187_v14 = vpop.permute.xlu1 %186 }
  0x86   : > { %198 = vst.msk [vmem:[#allocation2 + $0x38] sm:$0xff] %vm175_vm0, %v196_v13  ;;  %189 = vst.msk [vmem:[#allocation2 + $0x28] sm:$0xff] %vm175_vm0, %v187_v14 }
  0x89   : > { %v215_v15 = vld [vmem:[#allocation2 + $0x40] sm:$0xff]  ;;  %v180_v16 = vpop.permute.xlu0 %179  ;;  %v213_v18 = vld [vmem:[#allocation2 + $0x30] sm:$0xff] }
  0x8a   : > { %430 = vmatprep.subr.mxu0 %v215_v15  ;;  %454 = vmatprep.subr.mxu1 %v215_v15  ;;  %182 = vst.msk [vmem:[#allocation2 + $0x10] sm:$0xff] %vm175_vm0, %v180_v16 }
  0x8b   : > { %431 = vmatpush3.msra.mxu0 %v215_v15  ;;  %463 = vmatpush3.msra.mxu1 %v215_v15 }
  0x8d   : > { %v214_v17 = vld [vmem:[#allocation2 + $0x38] sm:$0xff]  ;;  %v212_v19 = vld [vmem:[#allocation2 + $0x28] sm:$0xff] }
  0x8e   : > { %432 = vmatprep.subr.mxu0 %v214_v17  ;;  %455 = vmatprep.subr.mxu1 %v214_v17 }
  0x8f   : > { %433 = vmatpush3.msra.mxu0 %v214_v17  ;;  %464 = vmatpush3.msra.mxu1 %v214_v17 }
  0x90   : > { %434 = vmatprep.subr.mxu0 %v213_v18  ;;  %456 = vmatprep.subr.mxu1 %v213_v18 }
  0x91   : > { %435 = vmatpush3.msra.mxu0 %v213_v18  ;;  %465 = vmatpush3.msra.mxu1 %v213_v18  ;;  %v209_v22 = vld [vmem:[#allocation2 + $0x10] sm:$0xff] }
  0x92   : > { %436 = vmatprep.subr.mxu0 %v212_v19  ;;  %457 = vmatprep.subr.mxu1 %v212_v19  ;;  %v223_v27 = vpop.permute.xlu1 %222 }
  0x93   : > { %437 = vmatpush3.msra.mxu0 %v212_v19  ;;  %466 = vmatpush3.msra.mxu1 %v212_v19 }
  0x94   : > { %438 = vmatprep.subr.mxu0 %v211_v20  ;;  %458 = vmatprep.subr.mxu1 %v211_v20 }
  0x95   : > { %439 = vmatpush3.msra.mxu0 %v211_v20  ;;  %467 = vmatpush3.msra.mxu1 %v211_v20 }
  0x96   : > { %440 = vmatprep.subr.mxu0 %v210_v21  ;;  %459 = vmatprep.subr.mxu1 %v210_v21  ;;  %v233_v28 = vpop.permute.xlu1 %232  ;;  %v228_v29 = vpop.permute.xlu0 %227 }
  0x97   : > { %441 = vmatpush3.msra.mxu0 %v210_v21  ;;  %468 = vmatpush3.msra.mxu1 %v210_v21 }
  0x98   : > { %442 = vmatprep.subr.mxu0 %v209_v22  ;;  %460 = vmatprep.subr.mxu1 %v209_v22 }
  0x99   : > { %443 = vmatpush3.msra.mxu0 %v209_v22  ;;  %469 = vmatpush3.msra.mxu1 %v209_v22 }
  0x9a   : > { %444 = vmatprep.subr.mxu0 %v208_v23  ;;  %461 = vmatprep.subr.mxu1 %v208_v23  ;;  %v238_v30 = vpop.permute.xlu1 %237 }
  0x9b   : > { %445 = vmatpush3.msra.mxu0 %v208_v23  ;;  %470 = vmatpush3.msra.mxu1 %v208_v23 }
  0x9c   : > { %446 = vmatprep.subr.mxu0 %v207_v24  ;;  %462 = vmatprep.subr.mxu1 %v207_v24 }
  0x9d   : > { %447 = vmatpush3.msra.mxu0 %v207_v24  ;;  %471 = vmatpush3.msra.mxu1 %v207_v24 }
  0x9e   : > { %449 = vmatmul.mubr.msk.f32.vlgmr.msra.gmra.mxu0 %vm175_vm0, %v204_v25  ;;  %452 = vmatmul.mubr.msk.f32.vlgmr.msra.gmra.mxu1 %vm175_vm0, %v206_v26 }
 0x15e   : > { %v450_v31 = vpop.f32.mrf.mxu0  ;;  %v453_v32 = vpop.f32.mrf.mxu1 }
 0x15f   : > { %v324_v33 = vadd.f32 %v450_v31, %v228_v29  ;;  %v334_v34 = vadd.f32 %v453_v32, %v238_v30 }
 0x160   : > { %v318_v35 = vpop.f32.mrf.mxu0  ;;  %v328_v36 = vpop.f32.mrf.mxu1 }
 0x161   : > { %v338_v37 = vmax.f32 %v324_v33, 0.0  ;;  %v340_v38 = vmax.f32 %v334_v34, 0.0  ;;  %v319_v39 = vadd.f32 %v318_v35, %v223_v27  ;;  %v329_v40 = vadd.f32 %v328_v36, %v233_v28 }
 0x163   : > { %342 = vst.msk [vmem:[%s170_s15 + $0x8] sm:$0xff] %vm175_vm0, %v338_v37  ;;  %344 = vst.msk [vmem:[%s170_s15 + $0x18] sm:$0xff] %vm175_vm0, %v340_v38  ;;  %v337_v41 = vmax.f32 %v319_v39, 0.0  ;;  %v339_v42 = vmax.f32 %v329_v40, 0.0 }
 0x165   : > { %341 = vst.msk [vmem:[%s170_s15] sm:$0xff] %vm175_vm0, %v337_v41  ;;  %343 = vst.msk [vmem:[%s170_s15 + $0x10] sm:$0xff] %vm175_vm0, %v339_v42 }
 0x166 PF: > { %s13_s12 = sadd.s32 1, %s492_s12  }
 0x167   : > { %p10_p4 = scmp.ge.s32.totalorder %s13_s12, 4  }
 0x169   :  { %12 = sbr.rel (!%p10_p4) target bundleno = 1 (0x1), region = 62 }

// kernel: stn_forward.6
= control target key start
LH: loop header
LB: loop body
LE: loop exit
PB: predicated region body
PF: predicated region fallthrough
CT: control target
= control target key end

     0   :  { %s897_s12 = smov 0   ;;  %s1102_s0 = inlined_call_operand.vmem [shape: f32[2,128,26], index: 0, kind: input, shape index: {}]   ;;  %s1103_s1 = inlined_call_operand.vmem [shape: f32[64,288], index: 1, kind: input, shape index: {}]   ;;  %s1104_s2 = inlined_call_operand.vmem [shape: f32[64,1], index: 2, kind: input, shape index: {}]   ;;  %s1105_s3 = inlined_call_operand.vmem [shape: f32[2,64,20], index: 3, kind: output, shape index: {}]  }
   0x1 LB: > { %s710_s13 = sadd.s32 4294967295, %s871_s12   ;;  %p714_p0 = scmp.ge.s32.totalorder %s871_s12, 1  ;;  %s871_s12 = sphi %s897_s12, %s13_s12  }
   0x2   : > { %p137_p1 = scmp.lt.s32.totalorder %s871_s12, 3 }
   0x4   : > { %p138_p2 = pnand %p714_p0, %p137_p1 }
   0x5   : > { %p161_p3 = scmp.lt.s32.totalorder (!%p138_p2), %s710_s13, 1  ;;  %s873_s18 = smov (!%p138_p2), 123  }
   0x6   : > { %141 = sbr.rel (%p138_p2) target bundleno = 402 (0x192), region = 32  ;;  %s874_s19 = smov (!%p138_p2), 127  }
   0x7   : > { %s875_s20 = smov (!%p138_p2), 122  }
   0xb   : > { %s1107_s13 = smov (!%p161_p3, %s710_s13), 1  ;;  %vm187_vm0 = vcmask 162816   ;;  %v297_v16 = vld [vmem:[%s1103_s1 + $0x8] sm:$0xff]  ;;  %v315_v17 = vld [vmem:[%s1103_s1 + $0x98] sm:$0xff]  ;;  %v356_v19 = vld [vmem:[%s1104_s2] sm:$0xff]  ;;  %v876_v20 = vmov 0  }
   0xc   : > { %s729_s14 = sshll.u32 %s1107_s13, 7  ;;  %493 = vmatprep.mubr.f32.mxu0 %v297_v16  ;;  %523 = vmatprep.mubr.f32.mxu1 %v315_v17  ;;  %v357_v18 = vld [vmem:[%s1104_s2 + $0x8] sm:$0xff]  ;;  %v358_v21 = vld [vmem:[%s1104_s2 + $0x10] sm:$0xff]  ;;  %v359_v22 = vld [vmem:[%s1104_s2 + $0x18] sm:$0xff]  ;;  %vm404_vm1 = vcmask 261120   ;;  %s730_s8 = sshll.u32 %s1107_s13, 6 }
   0xd   : > { %s911_s17 = scalar_lea.vmem %s1102_s0, %s729_s14  ;;  %864 = vset.pattern.permute.xlu1 %v876_v20  ;;  %863 = vset.pattern.permute.xlu0 %v876_v20  ;;  %v360_v23 = vld [vmem:[%s1104_s2 + $0x20] sm:$0xff]  ;;  %v361_v24 = vld [vmem:[%s1104_s2 + $0x28] sm:$0xff]  ;;  %v362_v25 = vld [vmem:[%s1104_s2 + $0x30] sm:$0xff]  ;;  %s1081_s11 = scalar_lea.vmem %s1105_s3, %s730_s8 }
   0xe   : > { %v178_v0 = vld [vmem:[%s911_s17 + $0x38] sm:$0xff]  ;;  %v176_v1 = vld [vmem:[%s911_s17 + $0x28] sm:$0xff]  ;;  %v177_v2 = vld [vmem:[%s911_s17 + $0x30] sm:$0xff] }
   0xf   : > { %270 = vrot.lane.b32.xlu0 %v178_v0, %s873_s18  ;;  %195 = vst.msk [vmem:[#allocation2 + $0x38] sm:$0xff] %vm187_vm0, %v178_v0  ;;  %266 = vrot.lane.b32.xlu1 %v176_v1, %s873_s18  ;;  %193 = vst.msk [vmem:[#allocation2 + $0x28] sm:$0xff] %vm187_vm0, %v176_v1  ;;  %v175_v3 = vld [vmem:[%s911_s17 + $0x20] sm:$0xff]  ;;  %v174_v4 = vld [vmem:[%s911_s17 + $0x18] sm:$0xff] }
  0x10   : > { %194 = vst.msk [vmem:[#allocation2 + $0x30] sm:$0xff] %vm187_vm0, %v177_v2  ;;  %192 = vst.msk [vmem:[#allocation2 + $0x20] sm:$0xff] %vm187_vm0, %v175_v3  ;;  %v173_v5 = vld [vmem:[%s911_s17 + $0x10] sm:$0xff]  ;;  %v172_v6 = vld [vmem:[%s911_s17 + $0x8] sm:$0xff] }
  0x11   : > { %191 = vst.msk [vmem:[#allocation2 + $0x18] sm:$0xff] %vm187_vm0, %v174_v4  ;;  %v171_v7 = vld [vmem:[%s911_s17] sm:$0xff]  ;;  %190 = vst.msk [vmem:[#allocation2 + $0x10] sm:$0xff] %vm187_vm0, %v173_v5  ;;  %v182_v8 = vld [vmem:[%s911_s17 + $0x58] sm:$0xff] }
  0x12   : > { %189 = vst.msk [vmem:[#allocation2 + $0x8] sm:$0xff] %vm187_vm0, %v172_v6  ;;  %188 = vst.msk [vmem:[#allocation2] sm:$0xff] %vm187_vm0, %v171_v7  ;;  %v181_v9 = vld [vmem:[%s911_s17 + $0x50] sm:$0xff]  ;;  %v180_v10 = vld [vmem:[%s911_s17 + $0x48] sm:$0xff] }
  0x13   : > { %219 = vst.msk [vmem:[#allocation2 + $0x78] sm:$0xff] %vm187_vm0, %v182_v8  ;;  %218 = vst.msk [vmem:[#allocation2 + $0x70] sm:$0xff] %vm187_vm0, %v181_v9  ;;  %v179_v11 = vld [vmem:[%s911_s17 + $0x40] sm:$0xff]  ;;  %268 = vrot.lane.b32.xlu0 %v177_v2, %s873_s18  ;;  %264 = vrot.lane.b32.xlu1 %v175_v3, %s873_s18  ;;  %v186_v12 = vld [vmem:[%s911_s17 + $0x78] sm:$0xff] }
  0x14   : > { %217 = vst.msk [vmem:[#allocation2 + $0x68] sm:$0xff] %vm187_vm0, %v180_v10  ;;  %216 = vst.msk [vmem:[#allocation2 + $0x60] sm:$0xff] %vm187_vm0, %v179_v11  ;;  %v185_v13 = vld [vmem:[%s911_s17 + $0x70] sm:$0xff]  ;;  %v184_v14 = vld [vmem:[%s911_s17 + $0x68] sm:$0xff] }
  0x15   : > { %223 = vst.msk [vmem:[#allocation2 + $0x98] sm:$0xff] %vm187_vm0, %v186_v12  ;;  %222 = vst.msk [vmem:[#allocation2 + $0x90] sm:$0xff] %vm187_vm0, %v185_v13  ;;  %v183_v15 = vld [vmem:[%s911_s17 + $0x60] sm:$0xff]  ;;  %v363_v26 = vld [vmem:[%s1104_s2 + $0x38] sm:$0xff] }
  0x16   : > { %221 = vst.msk [vmem:[#allocation2 + $0x88] sm:$0xff] %vm187_vm0, %v184_v14  ;;  %220 = vst.msk [vmem:[#allocation2 + $0x80] sm:$0xff] %vm187_vm0, %v183_v15  ;;  %v327_v59 = vld [vmem:[#allocation2 + $0x38] sm:$0xff]  ;;  %v325_v1 = vld [vmem:[#allocation2 + $0x28] sm:$0xff] }
  0x17   : > { %250 = vrot.lane.b32.xlu0 %v174_v4, %s873_s18  ;;  %206 = vrot.lane.b32.xlu1 %v174_v4, %s874_s19  ;;  %v326_v0 = vld [vmem:[#allocation2 + $0x30] sm:$0xff]  ;;  %v296_v15 = vld [vmem:[%s1103_s1] sm:$0xff] }
  0x18   : > { %v314_v16 = vld [vmem:[%s1103_s1 + $0x90] sm:$0xff] }
  0x19   : > { %v321_v12 = vld [vmem:[#allocation2 + $0x8] sm:$0xff]  ;;  %v320_v14 = vld [vmem:[#allocation2] sm:$0xff] }
  0x1a   : > { %v335_v31 = vld [vmem:[#allocation2 + $0x78] sm:$0xff]  ;;  %v334_v35 = vld [vmem:[#allocation2 + $0x70] sm:$0xff] }
  0x1b   : > { %248 = vrot.lane.b32.xlu0 %v173_v5, %s873_s18  ;;  %204 = vrot.lane.b32.xlu1 %v173_v5, %s874_s19  ;;  %v333_v39 = vld [vmem:[#allocation2 + $0x68] sm:$0xff]  ;;  %v332_v41 = vld [vmem:[#allocation2 + $0x60] sm:$0xff] }
  0x1d   : > { %v336_v13 = vld [vmem:[#allocation2 + $0x80] sm:$0xff] }
  0x1f   : > { %246 = vrot.lane.b32.xlu0 %v172_v6, %s873_s18  ;;  %202 = vrot.lane.b32.xlu1 %v172_v6, %s874_s19 }
  0x23   : > { %244 = vrot.lane.b32.xlu0 %v171_v7, %s873_s18  ;;  %200 = vrot.lane.b32.xlu1 %v171_v7, %s874_s19 }
  0x27   : > { %234 = vrot.lane.b32.xlu0 %v182_v8, %s874_s19  ;;  %232 = vrot.lane.b32.xlu1 %v181_v9, %s874_s19  ;;  %v323_v8 = vld [vmem:[#allocation2 + $0x18] sm:$0xff]  ;;  %v338_v9 = vld [vmem:[#allocation2 + $0x90] sm:$0xff] }
  0x2b   : > { %230 = vrot.lane.b32.xlu0 %v180_v10, %s874_s19  ;;  %228 = vrot.lane.b32.xlu1 %v179_v11, %s874_s19  ;;  %v322_v10 = vld [vmem:[#allocation2 + $0x10] sm:$0xff]  ;;  %v337_v11 = vld [vmem:[#allocation2 + $0x88] sm:$0xff] }
  0x2f   : > { %286 = vrot.lane.b32.xlu0 %v174_v4, %s875_s20  ;;  %284 = vrot.lane.b32.xlu1 %v173_v5, %s875_s20 }
  0x33   : > { %282 = vrot.lane.b32.xlu0 %v172_v6, %s875_s20  ;;  %280 = vrot.lane.b32.xlu1 %v171_v7, %s875_s20  ;;  %v324_v6 = vld [vmem:[#allocation2 + $0x20] sm:$0xff]  ;;  %v339_v7 = vld [vmem:[#allocation2 + $0x98] sm:$0xff] }
  0x37   : > { %371 = vperm.xlu1 %864, %v357_v18   ;;  %366 = vperm.xlu0 %863, %v356_v19   ;;  %v300_v18 = vld [vmem:[%s1103_s1 + $0x20] sm:$0xff]  ;;  %v318_v19 = vld [vmem:[%s1103_s1 + $0xb0] sm:$0xff] }
  0x3b   : > { %376 = vperm.xlu1 %864, %v358_v21   ;;  %381 = vperm.xlu0 %863, %v359_v22   ;;  %v299_v21 = vld [vmem:[%s1103_s1 + $0x18] sm:$0xff]  ;;  %v317_v22 = vld [vmem:[%s1103_s1 + $0xa8] sm:$0xff] }
  0x3f   : > { %386 = vperm.xlu1 %864, %v360_v23   ;;  %391 = vperm.xlu0 %863, %v361_v24   ;;  %v303_v24 = vld [vmem:[%s1103_s1 + $0x38] sm:$0xff] }
  0x43   : > { %396 = vperm.xlu1 %864, %v362_v25   ;;  %401 = vperm.xlu0 %863, %v363_v26   ;;  %v298_v26 = vld [vmem:[%s1103_s1 + $0x10] sm:$0xff] }
  0x81   : > { %v271_v27 = vpop.permute.xlu0 %270  ;;  %v267_v28 = vpop.permute.xlu1 %266 }
  0x82   : > { %279 = vst.msk [vmem:[#allocation2 + $0xf8] sm:$0xff] %vm187_vm0, %v271_v27  ;;  %277 = vst.msk [vmem:[#allocation2 + $0xe8] sm:$0xff] %vm187_vm0, %v267_v28  ;;  %v302_v27 = vld [vmem:[%s1103_s1 + $0x30] sm:$0xff]  ;;  %v301_v28 = vld [vmem:[%s1103_s1 + $0x28] sm:$0xff] }
  0x85   : > { %v269_v29 = vpop.permute.xlu0 %268  ;;  %v265_v30 = vpop.permute.xlu1 %264 }
  0x86   : > { %278 = vst.msk [vmem:[#allocation2 + $0xf0] sm:$0xff] %vm187_vm0, %v269_v29  ;;  %276 = vst.msk [vmem:[#allocation2 + $0xe0] sm:$0xff] %vm187_vm0, %v265_v30  ;;  %v306_v29 = vld [vmem:[%s1103_s1 + $0x50] sm:$0xff]  ;;  %v304_v30 = vld [vmem:[%s1103_s1 + $0x40] sm:$0xff] }
  0x89   : > { %v251_v32 = vpop.permute.xlu0 %250  ;;  %v351_v33 = vld [vmem:[#allocation2 + $0xf8] sm:$0xff]  ;;  %v207_v34 = vpop.permute.xlu1 %206  ;;  %v349_v40 = vld [vmem:[#allocation2 + $0xe8] sm:$0xff] }
  0x8a   : > { %259 = vst.msk [vmem:[#allocation2 + $0xd8] sm:$0xff] %vm187_vm0, %v251_v32  ;;  %731 = vmatprep.subr.mxu0 %v351_v33  ;;  %819 = vmatprep.subr.mxu1 %v351_v33  ;;  %215 = vst.msk [vmem:[#allocation2 + $0x58] sm:$0xff] %vm187_vm0, %v207_v34  ;;  %v307_v32 = vld [vmem:[%s1103_s1 + $0x58] sm:$0xff]  ;;  %v309_v33 = vld [vmem:[%s1103_s1 + $0x68] sm:$0xff] }
  0x8b   : > { %732 = vmatpush3.msra.mxu0 %v335_v31  ;;  %835 = vmatpush3.msra.mxu1 %v335_v31  ;;  %v305_v31 = vld [vmem:[%s1103_s1 + $0x48] sm:$0xff]  ;;  %v310_v34 = vld [vmem:[%s1103_s1 + $0x70] sm:$0xff] }
  0x8d   : > { %v249_v36 = vpop.permute.xlu0 %248  ;;  %v350_v37 = vld [vmem:[#allocation2 + $0xf0] sm:$0xff]  ;;  %v205_v38 = vpop.permute.xlu1 %204  ;;  %v348_v43 = vld [vmem:[#allocation2 + $0xe0] sm:$0xff] }
  0x8e   : > { %258 = vst.msk [vmem:[#allocation2 + $0xd0] sm:$0xff] %vm187_vm0, %v249_v36  ;;  %733 = vmatprep.subr.mxu0 %v350_v37  ;;  %820 = vmatprep.subr.mxu1 %v350_v37  ;;  %214 = vst.msk [vmem:[#allocation2 + $0x50] sm:$0xff] %vm187_vm0, %v205_v38  ;;  %v313_v36 = vld [vmem:[%s1103_s1 + $0x88] sm:$0xff]  ;;  %v312_v37 = vld [vmem:[%s1103_s1 + $0x80] sm:$0xff] }
  0x8f   : > { %734 = vmatpush3.msra.mxu0 %v334_v35  ;;  %836 = vmatpush3.msra.mxu1 %v334_v35  ;;  %v308_v35 = vld [vmem:[%s1103_s1 + $0x60] sm:$0xff] }
  0x90   : > { %735 = vmatprep.subr.mxu0 %v349_v40  ;;  %821 = vmatprep.subr.mxu1 %v349_v40  ;;  %v316_v38 = vld [vmem:[%s1103_s1 + $0xa0] sm:$0xff]  ;;  %v319_v40 = vld [vmem:[%s1103_s1 + $0xb8] sm:$0xff] }
  0x91   : > { %736 = vmatpush3.msra.mxu0 %v333_v39  ;;  %837 = vmatpush3.msra.mxu1 %v333_v39  ;;  %v247_v42 = vpop.permute.xlu0 %246  ;;  %v203_v44 = vpop.permute.xlu1 %202  ;;  %v331_v45 = vld [vmem:[#allocation2 + $0x58] sm:$0xff] }
  0x92   : > { %257 = vst.msk [vmem:[#allocation2 + $0xc8] sm:$0xff] %vm187_vm0, %v247_v42  ;;  %737 = vmatprep.subr.mxu0 %v348_v43  ;;  %822 = vmatprep.subr.mxu1 %v348_v43  ;;  %213 = vst.msk [vmem:[#allocation2 + $0x48] sm:$0xff] %vm187_vm0, %v203_v44  ;;  %v347_v46 = vld [vmem:[#allocation2 + $0xd8] sm:$0xff] }
  0x93   : > { %738 = vmatpush3.msra.mxu0 %v332_v41  ;;  %838 = vmatpush3.msra.mxu1 %v332_v41  ;;  %v311_v39 = vld [vmem:[%s1103_s1 + $0x78] sm:$0xff] }
  0x94   : > { %739 = vmatprep.subr.mxu0 %v347_v46  ;;  %823 = vmatprep.subr.mxu1 %v347_v46 }
  0x95   : > { %740 = vmatpush3.msra.mxu0 %v331_v45  ;;  %839 = vmatpush3.msra.mxu1 %v331_v45  ;;  %v245_v47 = vpop.permute.xlu0 %244  ;;  %v346_v48 = vld [vmem:[#allocation2 + $0xd0] sm:$0xff]  ;;  %v201_v49 = vpop.permute.xlu1 %200 }
  0x96   : > { %v330_v50 = vld [vmem:[#allocation2 + $0x50] sm:$0xff]  ;;  %256 = vst.msk [vmem:[#allocation2 + $0xc0] sm:$0xff] %vm187_vm0, %v245_v47  ;;  %741 = vmatprep.subr.mxu0 %v346_v48  ;;  %824 = vmatprep.subr.mxu1 %v346_v48  ;;  %212 = vst.msk [vmem:[#allocation2 + $0x40] sm:$0xff] %vm187_vm0, %v201_v49 }
  0x97   : > { %742 = vmatpush3.msra.mxu0 %v330_v50  ;;  %840 = vmatpush3.msra.mxu1 %v330_v50 }
  0x99   : > { %v235_v51 = vpop.permute.xlu0 %234  ;;  %v345_v52 = vld [vmem:[#allocation2 + $0xc8] sm:$0xff]  ;;  %v233_v53 = vpop.permute.xlu1 %232 }
  0x9a   : > { %v329_v54 = vld [vmem:[#allocation2 + $0x48] sm:$0xff]  ;;  %243 = vst.msk [vmem:[#allocation2 + $0xb8] sm:$0xff] %vm187_vm0, %v235_v51  ;;  %743 = vmatprep.subr.mxu0 %v345_v52  ;;  %825 = vmatprep.subr.mxu1 %v345_v52  ;;  %242 = vst.msk [vmem:[#allocation2 + $0xb0] sm:$0xff] %vm187_vm0, %v233_v53 }
  0x9b   : > { %744 = vmatpush3.msra.mxu0 %v329_v54  ;;  %841 = vmatpush3.msra.mxu1 %v329_v54 }
  0x9d   : > { %v231_v55 = vpop.permute.xlu0 %230  ;;  %v344_v56 = vld [vmem:[#allocation2 + $0xc0] sm:$0xff]  ;;  %v229_v57 = vpop.permute.xlu1 %228 }
  0x9e   : > { %v328_v58 = vld [vmem:[#allocation2 + $0x40] sm:$0xff]  ;;  %241 = vst.msk [vmem:[#allocation2 + $0xa8] sm:$0xff] %vm187_vm0, %v231_v55  ;;  %745 = vmatprep.subr.mxu0 %v344_v56  ;;  %826 = vmatprep.subr.mxu1 %v344_v56  ;;  %240 = vst.msk [vmem:[#allocation2 + $0xa0] sm:$0xff] %vm187_vm0, %v229_v57 }
  0x9f   : > { %746 = vmatpush3.msra.mxu0 %v328_v58  ;;  %842 = vmatpush3.msra.mxu1 %v328_v58 }
  0xa1   : > { %v343_v60 = vld [vmem:[#allocation2 + $0xb8] sm:$0xff]  ;;  %v342_v61 = vld [vmem:[#allocation2 + $0xb0] sm:$0xff]  ;;  %v287_v62 = vpop.permute.xlu0 %286  ;;  %v285_v63 = vpop.permute.xlu1 %284 }
  0xa2   : > { %747 = vmatprep.subr.mxu0 %v343_v60  ;;  %827 = vmatprep.subr.mxu1 %v343_v60  ;;  %295 = vst.msk [vmem:[#allocation2 + $0x118] sm:$0xff] %vm187_vm0, %v287_v62  ;;  %294 = vst.msk [vmem:[#allocation2 + $0x110] sm:$0xff] %vm187_vm0, %v285_v63 }
  0xa3   : > { %748 = vmatpush3.msra.mxu0 %v327_v59  ;;  %843 = vmatpush3.msra.mxu1 %v327_v59 }
  0xa4   : > { %749 = vmatprep.subr.mxu0 %v342_v61  ;;  %828 = vmatprep.subr.mxu1 %v342_v61 }
  0xa5   : > { %750 = vmatpush3.msra.mxu0 %v326_v0  ;;  %844 = vmatpush3.msra.mxu1 %v326_v0  ;;  %v341_v2 = vld [vmem:[#allocation2 + $0xa8] sm:$0xff]  ;;  %v340_v3 = vld [vmem:[#allocation2 + $0xa0] sm:$0xff]  ;;  %v283_v4 = vpop.permute.xlu0 %282  ;;  %v281_v5 = vpop.permute.xlu1 %280 }
  0xa6   : > { %751 = vmatprep.subr.mxu0 %v341_v2  ;;  %829 = vmatprep.subr.mxu1 %v341_v2  ;;  %293 = vst.msk [vmem:[#allocation2 + $0x108] sm:$0xff] %vm187_vm0, %v283_v4  ;;  %292 = vst.msk [vmem:[#allocation2 + $0x100] sm:$0xff] %vm187_vm0, %v281_v5 }
  0xa7   : > { %752 = vmatpush3.msra.mxu0 %v325_v1  ;;  %845 = vmatpush3.msra.mxu1 %v325_v1 }
  0xa8   : > { %753 = vmatprep.subr.mxu0 %v340_v3  ;;  %830 = vmatprep.subr.mxu1 %v340_v3 }
  0xa9   : > { %754 = vmatpush3.msra.mxu0 %v324_v6  ;;  %846 = vmatpush3.msra.mxu1 %v324_v6  ;;  %v355_v17 = vld [vmem:[#allocation2 + $0x118] sm:$0xff]  ;;  %v354_v20 = vld [vmem:[#allocation2 + $0x110] sm:$0xff] }
  0xaa   : > { %755 = vmatprep.subr.mxu0 %v339_v7  ;;  %831 = vmatprep.subr.mxu1 %v339_v7 }
  0xab   : > { %756 = vmatpush3.msra.mxu0 %v323_v8  ;;  %847 = vmatpush3.msra.mxu1 %v323_v8 }
  0xac   : > { %757 = vmatprep.subr.mxu0 %v338_v9  ;;  %832 = vmatprep.subr.mxu1 %v338_v9 }
  0xad   : > { %758 = vmatpush3.msra.mxu0 %v322_v10  ;;  %848 = vmatpush3.msra.mxu1 %v322_v10  ;;  %v353_v23 = vld [vmem:[#allocation2 + $0x108] sm:$0xff]  ;;  %v352_v25 = vld [vmem:[#allocation2 + $0x100] sm:$0xff] }
  0xae   : > { %759 = vmatprep.subr.mxu0 %v337_v11  ;;  %833 = vmatprep.subr.mxu1 %v337_v11 }
  0xaf   : > { %760 = vmatpush3.msra.mxu0 %v321_v12  ;;  %849 = vmatpush3.msra.mxu1 %v321_v12 }
  0xb0   : > { %761 = vmatprep.subr.mxu0 %v336_v13  ;;  %834 = vmatprep.subr.mxu1 %v336_v13 }
  0xb1   : > { %762 = vmatpush3.msra.mxu0 %v320_v14  ;;  %850 = vmatpush3.msra.mxu1 %v320_v14 }
  0xb2   : > { %494 = vmatmul.mubr.f32.vlgmr.msra.gmra.mxu0 %v296_v15  ;;  %524 = vmatmul.mubr.f32.vlgmr.msra.gmra.mxu1 %v314_v16  ;;  %v367_v41 = vpop.permute.xlu0 %366  ;;  %v372_v44 = vpop.permute.xlu1 %371 }
  0xb3   : > { %799 = vmatprep.subr.mxu1 %v355_v17  ;;  %498 = vmatprep.mubr.f32.mxu0 %v300_v18 }
  0xb4   : > { %800 = vmatpush3.msra.mxu1 %v355_v17  ;;  %528 = vmatprep.mubr.f32.mxu1 %v318_v19 }
  0xb5   : > { %801 = vmatprep.subr.mxu1 %v354_v20 }
  0xb6   : > { %802 = vmatpush3.msra.mxu1 %v354_v20  ;;  %499 = vmatmul.mubr.f32.gmra.mxu0 %v299_v21  ;;  %v382_v48 = vpop.permute.xlu0 %381  ;;  %v377_v52 = vpop.permute.xlu1 %376 }
  0xb7   : > { %529 = vmatmul.mubr.f32.gmra.mxu1 %v317_v22  ;;  %803 = vmatprep.subr.mxu1 %v353_v23 }
  0xb8   : > { %804 = vmatpush3.msra.mxu1 %v353_v23  ;;  %503 = vmatprep.mubr.f32.mxu0 %v303_v24 }
  0xb9   : > { %805 = vmatprep.subr.mxu1 %v352_v25  ;;  %807 = vmatprep.mubr.msk.f32.mxu1 %vm404_vm1, %v298_v26 }
  0xba   : > { %806 = vmatpush3.msra.mxu1 %v352_v25  ;;  %504 = vmatmul.mubr.f32.gmra.mxu0 %v302_v27  ;;  %v392_v60 = vpop.permute.xlu0 %391  ;;  %v387_v2 = vpop.permute.xlu1 %386 }
  0xbb   : > { %808 = vmatmul.mubr.msk.f32.vlgmr.msra.gmra.mxu1 %vm404_vm1, %v301_v28  ;;  %508 = vmatprep.mubr.f32.mxu0 %v306_v29 }
  0xbc   : > { %810 = vmatprep.mubr.msk.f32.mxu1 %vm404_vm1, %v304_v30 }
  0xbe   : > { %509 = vmatmul.mubr.f32.gmra.mxu0 %v305_v31  ;;  %v402_v13 = vpop.permute.xlu0 %401  ;;  %v397_v19 = vpop.permute.xlu1 %396 }
  0xbf   : > { %811 = vmatmul.mubr.msk.f32.gmra.mxu1 %vm404_vm1, %v307_v32  ;;  %513 = vmatprep.mubr.f32.mxu0 %v309_v33 }
  0xc0   : > { %813 = vmatprep.mubr.msk.f32.mxu1 %vm404_vm1, %v310_v34 }
  0xc2   : > { %514 = vmatmul.mubr.f32.gmra.mxu0 %v308_v35 }
  0xc3   : > { %814 = vmatmul.mubr.msk.f32.gmra.mxu1 %vm404_vm1, %v313_v36  ;;  %518 = vmatprep.mubr.f32.mxu0 %v312_v37 }
  0xc4   : > { %816 = vmatprep.mubr.msk.f32.mxu1 %vm404_vm1, %v316_v38 }
  0xc6   : > { %519 = vmatmul.mubr.f32.gmra.mxu0 %v311_v39 }
  0xc7   : > { %817 = vmatmul.mubr.msk.f32.gmra.mxu1 %vm404_vm1, %v319_v40 }
 0x172   : > { %v763_v42 = vpop.f32.mrf.mxu0  ;;  %v781_v43 = vpop.f32.mrf.mxu1 }
 0x174   : > { %v764_v45 = vpop.f32.mrf.mxu0  ;;  %v782_v46 = vpop.f32.mrf.mxu1 }
 0x175   : > { %v765_v50 = vadd.f32 %v764_v45, %v763_v42  ;;  %v783_v16 = vadd.f32 %v782_v46, %v781_v43 }
 0x176   : > { %v766_v47 = vpop.f32.mrf.mxu0 }
 0x177   : > { %v784_v49 = vpop.f32.mrf.mxu1  ;;  %v496_v59 = vadd.f32 %v765_v50, %v367_v41  ;;  %v526_v28 = vadd.f32 %v783_v16, %v397_v19 }
 0x178   : > { %v767_v51 = vpop.f32.mrf.mxu0 }
 0x179   : > { %v768_v53 = vadd.f32 %v767_v51, %v766_v47  ;;  %v785_v54 = vpop.f32.mrf.mxu1 }
 0x17a   : > { %v769_v55 = vpop.f32.mrf.mxu0  ;;  %v786_v10 = vadd.f32 %v785_v54, %v784_v49 }
 0x17b   : > { %v501_v56 = vadd.f32 %v768_v53, %v372_v44  ;;  %v809_v57 = vpop.f32.mrf.mxu1 }
 0x17c   : > { %v770_v58 = vpop.f32.mrf.mxu0  ;;  %v531_v23 = vadd.f32 %v786_v10, %v402_v13 }
 0x17d   : > { %v606_v61 = vadd.f32 %v809_v57, %v501_v56  ;;  %v771_v62 = vadd.f32 %v770_v58, %v769_v55  ;;  %v600_v63 = vpop.f32.mrf.mxu1 }
 0x17e   : > { %v601_v0 = vadd.f32 %v600_v63, %v496_v59  ;;  %v772_v1 = vpop.f32.mrf.mxu0 }
 0x17f   : > { %v640_v3 = vmax.f32 %v606_v61, 0.0  ;;  %v812_v4 = vpop.f32.mrf.mxu1  ;;  %v506_v5 = vadd.f32 %v771_v62, %v377_v52 }
 0x180   : > { %v639_v6 = vmax.f32 %v601_v0, 0.0  ;;  %v773_v7 = vpop.f32.mrf.mxu0 }
 0x181   : > { %648 = vst.msk [vmem:[%s1081_s11 + $0x8] sm:$0xff] %vm187_vm0, %v640_v3  ;;  %v774_v8 = vadd.f32 %v773_v7, %v772_v1  ;;  %v610_v9 = vpop.f32.mrf.mxu1 }
 0x182   : > { %647 = vst.msk [vmem:[%s1081_s11] sm:$0xff] %vm187_vm0, %v639_v6  ;;  %v611_v11 = vadd.f32 %v610_v9, %v506_v5  ;;  %v775_v12 = vpop.f32.mrf.mxu0 }
 0x183   : > { %v511_v14 = vadd.f32 %v774_v8, %v382_v48  ;;  %v815_v15 = vpop.f32.mrf.mxu1 }
 0x184   : > { %v641_v17 = vmax.f32 %v611_v11, 0.0  ;;  %v776_v18 = vpop.f32.mrf.mxu0 }
 0x185   : > { %v616_v20 = vadd.f32 %v812_v4, %v511_v14  ;;  %v777_v21 = vadd.f32 %v776_v18, %v775_v12  ;;  %v620_v22 = vpop.f32.mrf.mxu1 }
 0x186   : > { %649 = vst.msk [vmem:[%s1081_s11 + $0x10] sm:$0xff] %vm187_vm0, %v641_v17  ;;  %v778_v24 = vpop.f32.mrf.mxu0 }
 0x187   : > { %v642_v25 = vmax.f32 %v616_v20, 0.0  ;;  %v516_v26 = vadd.f32 %v777_v21, %v387_v2  ;;  %v818_v27 = vpop.f32.mrf.mxu1 }
 0x188   : > { %v636_v29 = vadd.f32 %v818_v27, %v531_v23  ;;  %v779_v30 = vpop.f32.mrf.mxu0 }
 0x189   : > { %650 = vst.msk [vmem:[%s1081_s11 + $0x18] sm:$0xff] %vm187_vm0, %v642_v25  ;;  %v621_v31 = vadd.f32 %v620_v22, %v516_v26  ;;  %v780_v32 = vadd.f32 %v779_v30, %v778_v24  ;;  %v630_v33 = vpop.f32.mrf.mxu1 }
 0x18a   : > { %v646_v34 = vmax.f32 %v636_v29, 0.0  ;;  %v631_v35 = vadd.f32 %v630_v33, %v526_v28 }
 0x18b   : > { %v643_v36 = vmax.f32 %v621_v31, 0.0  ;;  %v521_v37 = vadd.f32 %v780_v32, %v392_v60 }
 0x18c   : > { %654 = vst.msk [vmem:[%s1081_s11 + $0x38] sm:$0xff] %vm187_vm0, %v646_v34  ;;  %v645_v38 = vmax.f32 %v631_v35, 0.0 }
 0x18d   : > { %651 = vst.msk [vmem:[%s1081_s11 + $0x20] sm:$0xff] %vm187_vm0, %v643_v36  ;;  %v626_v39 = vadd.f32 %v815_v15, %v521_v37 }
 0x18e   : > { %653 = vst.msk [vmem:[%s1081_s11 + $0x30] sm:$0xff] %vm187_vm0, %v645_v38 }
 0x18f   : > { %v644_v40 = vmax.f32 %v626_v39, 0.0 }
 0x191   : > { %652 = vst.msk [vmem:[%s1081_s11 + $0x28] sm:$0xff] %vm187_vm0, %v644_v40 }
 0x192 PF: > { %s13_s12 = sadd.s32 1, %s871_s12  }
 0x193   : > { %p10_p4 = scmp.ge.s32.totalorder %s13_s12, 4  }
 0x195   :  { %12 = sbr.rel (!%p10_p4) target bundleno = 1 (0x1), region = 62 }

// kernel: stn_forward.7
= control target key start
LH: loop header
LB: loop body
LE: loop exit
PB: predicated region body
PF: predicated region fallthrough
CT: control target
= control target key end

     0   :  { %s1554_s12 = smov 0   ;;  %s2207_s0 = inlined_call_operand.vmem [shape: f32[2,256,10], index: 0, kind: input, shape index: {}]   ;;  %s2208_s1 = inlined_call_operand.vmem [shape: f32[128,576], index: 1, kind: input, shape index: {}]   ;;  %s2209_s2 = inlined_call_operand.vmem [shape: f32[128,1], index: 2, kind: input, shape index: {}]   ;;  %s2210_s3 = inlined_call_operand.vmem [shape: f32[2,128,6], index: 3, kind: output, shape index: {}]  }
   0x1 LB: > { %s1239_s13 = sadd.s32 4294967295, %s1528_s12   ;;  %p1243_p0 = scmp.ge.s32.totalorder %s1528_s12, 1  ;;  %s1528_s12 = sphi %s1554_s12, %s13_s12  }
   0x2   : > { %p137_p1 = scmp.lt.s32.totalorder %s1528_s12, 3 }
   0x4   : > { %p138_p2 = pnand %p1243_p0, %p137_p1 }
   0x6   : > { %141 = sbr.rel (%p138_p2) target bundleno = 479 (0x1df), region = 32 }
   0xb   : > { %p161_p3 = scmp.lt.s32.totalorder %s1239_s13, 1  ;;  %vm203_vm0 = vcmask 48128   ;;  %s1530_s18 = smov 125   ;;  %v421_v48 = vld [vmem:[%s2208_s1 + $0x8] sm:$0xff]  ;;  %v423_v49 = vld [vmem:[%s2208_s1 + $0x18] sm:$0xff]  ;;  %v1533_v61 = vmov 0  }
   0xc   : > { %s1531_s19 = smov 127   ;;  %781 = vmatprep.mubr.f32.mxu0 %v421_v48  ;;  %926 = vmatprep.mubr.f32.mxu1 %v423_v49  ;;  %s1532_s24 = smov 124   ;;  %v572_v63 = vld [vmem:[%s2209_s2] sm:$0xff]  ;;  %vm668_vm1 = vcmask 523264  }
   0xd   : > { %s2236_s13 = smov (!%p161_p3, %s1239_s13), 1  ;;  %1520 = vset.pattern.permute.xlu0 %v1533_v61  ;;  %1521 = vset.pattern.permute.xlu1 %v1533_v61 }
   0xe   : > { %s1266_s14 = sshll.u32 %s2236_s13, 8  ;;  %s1267_s11 = sshll.u32 %s2236_s13, 7 }
   0xf   : > { %s1568_s17 = scalar_lea.vmem %s2207_s0, %s1266_s14  ;;  %s2156_s15 = scalar_lea.vmem %s2210_s3, %s1267_s11 }
  0x10   : > { %v186_v0 = vld [vmem:[%s1568_s17 + $0x78] sm:$0xff]  ;;  %v185_v1 = vld [vmem:[%s1568_s17 + $0x70] sm:$0xff]  ;;  %v192_v4 = vld [vmem:[%s1568_s17 + $0xa8] sm:$0xff] }
  0x11   : > { %v194_v2 = vld [vmem:[%s1568_s17 + $0xb8] sm:$0xff]  ;;  %370 = vrot.lane.b32.xlu0 %v186_v0, %s1530_s18  ;;  %219 = vst.msk [vmem:[#allocation2 + $0x78] sm:$0xff] %vm203_vm0, %v186_v0  ;;  %368 = vrot.lane.b32.xlu1 %v185_v1, %s1530_s18  ;;  %218 = vst.msk [vmem:[#allocation2 + $0x70] sm:$0xff] %vm203_vm0, %v185_v1  ;;  %v193_v3 = vld [vmem:[%s1568_s17 + $0xb0] sm:$0xff] }
  0x12   : > { %267 = vst.msk [vmem:[#allocation2 + $0xf8] sm:$0xff] %vm203_vm0, %v194_v2  ;;  %266 = vst.msk [vmem:[#allocation2 + $0xf0] sm:$0xff] %vm203_vm0, %v193_v3  ;;  %v184_v5 = vld [vmem:[%s1568_s17 + $0x68] sm:$0xff]  ;;  %v191_v6 = vld [vmem:[%s1568_s17 + $0xa0] sm:$0xff] }
  0x13   : > { %265 = vst.msk [vmem:[#allocation2 + $0xe8] sm:$0xff] %vm203_vm0, %v192_v4  ;;  %v183_v7 = vld [vmem:[%s1568_s17 + $0x60] sm:$0xff]  ;;  %217 = vst.msk [vmem:[#allocation2 + $0x68] sm:$0xff] %vm203_vm0, %v184_v5  ;;  %v190_v8 = vld [vmem:[%s1568_s17 + $0x98] sm:$0xff] }
  0x14   : > { %264 = vst.msk [vmem:[#allocation2 + $0xe0] sm:$0xff] %vm203_vm0, %v191_v6  ;;  %216 = vst.msk [vmem:[#allocation2 + $0x60] sm:$0xff] %vm203_vm0, %v183_v7  ;;  %v182_v9 = vld [vmem:[%s1568_s17 + $0x58] sm:$0xff]  ;;  %v189_v10 = vld [vmem:[%s1568_s17 + $0x90] sm:$0xff] }
  0x15   : > { %263 = vst.msk [vmem:[#allocation2 + $0xd8] sm:$0xff] %vm203_vm0, %v190_v8  ;;  %215 = vst.msk [vmem:[#allocation2 + $0x58] sm:$0xff] %vm203_vm0, %v182_v9  ;;  %v181_v11 = vld [vmem:[%s1568_s17 + $0x50] sm:$0xff]  ;;  %v188_v12 = vld [vmem:[%s1568_s17 + $0x88] sm:$0xff]  ;;  %298 = vrot.lane.b32.xlu0 %v194_v2, %s1531_s19  ;;  %296 = vrot.lane.b32.xlu1 %v193_v3, %s1531_s19 }
  0x16   : > { %262 = vst.msk [vmem:[#allocation2 + $0xd0] sm:$0xff] %vm203_vm0, %v189_v10  ;;  %v180_v13 = vld [vmem:[%s1568_s17 + $0x48] sm:$0xff]  ;;  %214 = vst.msk [vmem:[#allocation2 + $0x50] sm:$0xff] %vm203_vm0, %v181_v11  ;;  %v187_v14 = vld [vmem:[%s1568_s17 + $0x80] sm:$0xff] }
  0x17   : > { %261 = vst.msk [vmem:[#allocation2 + $0xc8] sm:$0xff] %vm203_vm0, %v188_v12  ;;  %213 = vst.msk [vmem:[#allocation2 + $0x48] sm:$0xff] %vm203_vm0, %v180_v13  ;;  %v179_v15 = vld [vmem:[%s1568_s17 + $0x40] sm:$0xff]  ;;  %v1607_v16 = vld [vmem:[%s1568_s17 + $0x38] sm:$0xff] }
  0x18   : > { %260 = vst.msk [vmem:[#allocation2 + $0xc0] sm:$0xff] %vm203_vm0, %v187_v14  ;;  %212 = vst.msk [vmem:[#allocation2 + $0x40] sm:$0xff] %vm203_vm0, %v179_v15  ;;  %v1610_v17 = vld [vmem:[%s1568_s17 + $0x30] sm:$0xff]  ;;  %v1613_v18 = vld [vmem:[%s1568_s17 + $0x28] sm:$0xff] }
  0x19   : > { %211 = vst.msk [vmem:[#allocation2 + $0x38] sm:$0xff] %vm203_vm0, %v1607_v16  ;;  %210 = vst.msk [vmem:[#allocation2 + $0x30] sm:$0xff] %vm203_vm0, %v1610_v17  ;;  %v1622_v19 = vld [vmem:[%s1568_s17 + $0x20] sm:$0xff]  ;;  %v1625_v20 = vld [vmem:[%s1568_s17 + $0x18] sm:$0xff]  ;;  %294 = vrot.lane.b32.xlu1 %v192_v4, %s1531_s19  ;;  %366 = vrot.lane.b32.xlu0 %v184_v5, %s1530_s18 }
  0x1a   : > { %209 = vst.msk [vmem:[#allocation2 + $0x28] sm:$0xff] %vm203_vm0, %v1613_v18  ;;  %v1628_v21 = vld [vmem:[%s1568_s17 + $0x10] sm:$0xff]  ;;  %208 = vst.msk [vmem:[#allocation2 + $0x20] sm:$0xff] %vm203_vm0, %v1622_v19  ;;  %v1637_v22 = vld [vmem:[%s1568_s17 + $0x8] sm:$0xff] }
  0x1b   : > { %207 = vst.msk [vmem:[#allocation2 + $0x18] sm:$0xff] %vm203_vm0, %v1625_v20  ;;  %206 = vst.msk [vmem:[#allocation2 + $0x10] sm:$0xff] %vm203_vm0, %v1628_v21  ;;  %v1640_v23 = vld [vmem:[%s1568_s17] sm:$0xff]  ;;  %v531_v24 = vld [vmem:[#allocation2 + $0xf8] sm:$0xff] }
  0x1c   : > { %205 = vst.msk [vmem:[#allocation2 + $0x8] sm:$0xff] %vm203_vm0, %v1637_v22  ;;  %204 = vst.msk [vmem:[#allocation2] sm:$0xff] %vm203_vm0, %v1640_v23  ;;  %1268 = vmatprep.subr.mxu0 %v531_v24  ;;  %v515_v25 = vld [vmem:[#allocation2 + $0x78] sm:$0xff]  ;;  %v530_v26 = vld [vmem:[#allocation2 + $0xf0] sm:$0xff] }
  0x1d   : > { %292 = vrot.lane.b32.xlu1 %v191_v6, %s1531_s19  ;;  %364 = vrot.lane.b32.xlu0 %v183_v7, %s1530_s18  ;;  %v514_v27 = vld [vmem:[#allocation2 + $0x70] sm:$0xff]  ;;  %v529_v28 = vld [vmem:[#allocation2 + $0xe8] sm:$0xff]  ;;  %v528_v30 = vld [vmem:[#allocation2 + $0xe0] sm:$0xff] }
  0x1e   : > { %1269 = vmatpush3.msra.mxu0 %v515_v25  ;;  %v513_v29 = vld [vmem:[#allocation2 + $0x68] sm:$0xff]  ;;  %v512_v31 = vld [vmem:[#allocation2 + $0x60] sm:$0xff]  ;;  %v527_v32 = vld [vmem:[#allocation2 + $0xd8] sm:$0xff] }
  0x1f   : > { %1270 = vmatprep.subr.mxu0 %v530_v26  ;;  %v511_v33 = vld [vmem:[#allocation2 + $0x58] sm:$0xff]  ;;  %v526_v35 = vld [vmem:[#allocation2 + $0xd0] sm:$0xff]  ;;  %v525_v37 = vld [vmem:[#allocation2 + $0xc8] sm:$0xff] }
  0x20   : > { %1271 = vmatpush3.msra.mxu0 %v514_v27  ;;  %v202_v34 = vld [vmem:[%s1568_s17 + $0xf8] sm:$0xff]  ;;  %v510_v36 = vld [vmem:[#allocation2 + $0x50] sm:$0xff]  ;;  %v509_v39 = vld [vmem:[#allocation2 + $0x48] sm:$0xff] }
  0x21   : > { %290 = vrot.lane.b32.xlu1 %v190_v8, %s1531_s19  ;;  %362 = vrot.lane.b32.xlu0 %v182_v9, %s1530_s18  ;;  %275 = vst.msk [vmem:[#allocation2 + $0x138] sm:$0xff] %vm203_vm0, %v202_v34  ;;  %v201_v38 = vld [vmem:[%s1568_s17 + $0xf0] sm:$0xff]  ;;  %v524_v40 = vld [vmem:[#allocation2 + $0xc0] sm:$0xff]  ;;  %v200_v42 = vld [vmem:[%s1568_s17 + $0xe8] sm:$0xff] }
  0x22   : > { %1272 = vmatprep.subr.mxu0 %v529_v28  ;;  %274 = vst.msk [vmem:[#allocation2 + $0x130] sm:$0xff] %vm203_vm0, %v201_v38  ;;  %v508_v41 = vld [vmem:[#allocation2 + $0x40] sm:$0xff]  ;;  %273 = vst.msk [vmem:[#allocation2 + $0x128] sm:$0xff] %vm203_vm0, %v200_v42  ;;  %v198_v44 = vld [vmem:[%s1568_s17 + $0xd8] sm:$0xff] }
  0x23   : > { %1273 = vmatpush3.msra.mxu0 %v513_v29  ;;  %v199_v43 = vld [vmem:[%s1568_s17 + $0xe0] sm:$0xff]  ;;  %271 = vst.msk [vmem:[#allocation2 + $0x118] sm:$0xff] %vm203_vm0, %v198_v44  ;;  %v197_v45 = vld [vmem:[%s1568_s17 + $0xd0] sm:$0xff]  ;;  %v196_v46 = vld [vmem:[%s1568_s17 + $0xc8] sm:$0xff] }
  0x24   : > { %1274 = vmatprep.subr.mxu0 %v528_v30  ;;  %272 = vst.msk [vmem:[#allocation2 + $0x120] sm:$0xff] %vm203_vm0, %v199_v43  ;;  %270 = vst.msk [vmem:[#allocation2 + $0x110] sm:$0xff] %vm203_vm0, %v197_v45  ;;  %v195_v47 = vld [vmem:[%s1568_s17 + $0xc0] sm:$0xff]  ;;  %v573_v4 = vld [vmem:[%s2209_s2 + $0x8] sm:$0xff] }
  0x25   : > { %288 = vrot.lane.b32.xlu1 %v189_v10, %s1531_s19  ;;  %360 = vrot.lane.b32.xlu0 %v181_v11, %s1530_s18  ;;  %269 = vst.msk [vmem:[#allocation2 + $0x108] sm:$0xff] %vm203_vm0, %v196_v46  ;;  %268 = vst.msk [vmem:[#allocation2 + $0x100] sm:$0xff] %vm203_vm0, %v195_v47  ;;  %v575_v5 = vld [vmem:[%s2209_s2 + $0x18] sm:$0xff]  ;;  %v574_v10 = vld [vmem:[%s2209_s2 + $0x10] sm:$0xff] }
  0x26   : > { %1275 = vmatpush3.msra.mxu0 %v512_v31  ;;  %v577_v11 = vld [vmem:[%s2209_s2 + $0x28] sm:$0xff]  ;;  %v580_v28 = vld [vmem:[%s2209_s2 + $0x40] sm:$0xff]  ;;  %v583_v29 = vld [vmem:[%s2209_s2 + $0x58] sm:$0xff] }
  0x27   : > { %1276 = vmatprep.subr.mxu0 %v527_v32  ;;  %v582_v34 = vld [vmem:[%s2209_s2 + $0x50] sm:$0xff]  ;;  %v584_v42 = vld [vmem:[%s2209_s2 + $0x60] sm:$0xff]  ;;  %v587_v43 = vld [vmem:[%s2209_s2 + $0x78] sm:$0xff] }
  0x28   : > { %1277 = vmatpush3.msra.mxu0 %v511_v33  ;;  %v506_v44 = vld [vmem:[#allocation2 + $0x30] sm:$0xff] }
  0x29   : > { %286 = vrot.lane.b32.xlu1 %v188_v12, %s1531_s19  ;;  %358 = vrot.lane.b32.xlu0 %v180_v13, %s1530_s18  ;;  %v538_v45 = vld [vmem:[#allocation2 + $0x130] sm:$0xff] }
  0x2a   : > { %1278 = vmatprep.subr.mxu0 %v526_v35  ;;  %v585_v35 = vld [vmem:[%s2209_s2 + $0x68] sm:$0xff] }
  0x2b   : > { %1279 = vmatpush3.msra.mxu0 %v510_v36  ;;  %v507_v36 = vld [vmem:[#allocation2 + $0x38] sm:$0xff] }
  0x2c   : > { %1280 = vmatprep.subr.mxu0 %v525_v37  ;;  %v539_v37 = vld [vmem:[#allocation2 + $0x138] sm:$0xff] }
  0x2d   : > { %284 = vrot.lane.b32.xlu1 %v187_v14, %s1531_s19  ;;  %356 = vrot.lane.b32.xlu0 %v179_v15, %s1530_s18 }
  0x2e   : > { %1281 = vmatpush3.msra.mxu0 %v509_v39 }
  0x2f   : > { %1282 = vmatprep.subr.mxu0 %v524_v40 }
  0x30   : > { %1283 = vmatpush3.msra.mxu0 %v508_v41 }
  0x31   : > { %330 = vrot.lane.b32.xlu1 %v1607_v16, %s1530_s18  ;;  %242 = vrot.lane.b32.xlu0 %v1607_v16, %s1531_s19 }
  0x35   : > { %328 = vrot.lane.b32.xlu1 %v1610_v17, %s1530_s18  ;;  %240 = vrot.lane.b32.xlu0 %v1610_v17, %s1531_s19 }
  0x39   : > { %326 = vrot.lane.b32.xlu1 %v1613_v18, %s1530_s18  ;;  %238 = vrot.lane.b32.xlu0 %v1613_v18, %s1531_s19 }
  0x3d   : > { %324 = vrot.lane.b32.xlu1 %v1622_v19, %s1530_s18  ;;  %236 = vrot.lane.b32.xlu0 %v1622_v19, %s1531_s19 }
  0x41   : > { %322 = vrot.lane.b32.xlu1 %v1625_v20, %s1530_s18  ;;  %234 = vrot.lane.b32.xlu0 %v1625_v20, %s1531_s19 }
  0x45   : > { %320 = vrot.lane.b32.xlu1 %v1628_v21, %s1530_s18  ;;  %232 = vrot.lane.b32.xlu0 %v1628_v21, %s1531_s19 }
  0x49   : > { %318 = vrot.lane.b32.xlu1 %v1637_v22, %s1530_s18  ;;  %230 = vrot.lane.b32.xlu0 %v1637_v22, %s1531_s19 }
  0x4d   : > { %316 = vrot.lane.b32.xlu1 %v1640_v23, %s1530_s18  ;;  %228 = vrot.lane.b32.xlu0 %v1640_v23, %s1531_s19 }
  0x51   : > { %402 = vrot.lane.b32.xlu0 %v1607_v16, %s1532_s24  ;;  %400 = vrot.lane.b32.xlu1 %v1610_v17, %s1532_s24  ;;  %v576_v16 = vld [vmem:[%s2209_s2 + $0x20] sm:$0xff]  ;;  %v579_v17 = vld [vmem:[%s2209_s2 + $0x38] sm:$0xff] }
  0x55   : > { %398 = vrot.lane.b32.xlu0 %v1613_v18, %s1532_s24  ;;  %396 = vrot.lane.b32.xlu1 %v1622_v19, %s1532_s24 }
  0x59   : > { %394 = vrot.lane.b32.xlu0 %v1625_v20, %s1532_s24  ;;  %392 = vrot.lane.b32.xlu1 %v1628_v21, %s1532_s24 }
  0x5d   : > { %390 = vrot.lane.b32.xlu0 %v1637_v22, %s1532_s24  ;;  %388 = vrot.lane.b32.xlu1 %v1640_v23, %s1532_s24  ;;  %v578_v22 = vld [vmem:[%s2209_s2 + $0x30] sm:$0xff]  ;;  %v581_v23 = vld [vmem:[%s2209_s2 + $0x48] sm:$0xff] }
  0x61   : > { %590 = vperm.xlu0 %1520, %v572_v63   ;;  %595 = vperm.xlu1 %1521, %v573_v4   ;;  %v503_v63 = vld [vmem:[#allocation2 + $0x18] sm:$0xff] }
  0x65   : > { %605 = vperm.xlu0 %1520, %v575_v5   ;;  %600 = vperm.xlu1 %1521, %v574_v10   ;;  %v502_v5 = vld [vmem:[#allocation2 + $0x10] sm:$0xff] }
  0x69   : > { %615 = vperm.xlu0 %1520, %v577_v11   ;;  %610 = vperm.xlu1 %1521, %v576_v16   ;;  %v501_v11 = vld [vmem:[#allocation2 + $0x8] sm:$0xff] }
  0x6d   : > { %625 = vperm.xlu0 %1520, %v579_v17   ;;  %620 = vperm.xlu1 %1521, %v578_v22   ;;  %v500_v17 = vld [vmem:[#allocation2] sm:$0xff] }
  0x6e   : > { %v420_v22 = vld [vmem:[%s2208_s1] sm:$0xff] }
  0x71   : > { %635 = vperm.xlu0 %1520, %v581_v23   ;;  %630 = vperm.xlu1 %1521, %v580_v28   ;;  %v425_v28 = vld [vmem:[%s2208_s1 + $0x28] sm:$0xff] }
  0x75   : > { %645 = vperm.xlu0 %1520, %v583_v29   ;;  %640 = vperm.xlu1 %1521, %v582_v34   ;;  %v427_v29 = vld [vmem:[%s2208_s1 + $0x38] sm:$0xff] }
  0x79   : > { %655 = vperm.xlu0 %1520, %v585_v35   ;;  %650 = vperm.xlu1 %1521, %v584_v42   ;;  %v432_v35 = vld [vmem:[%s2208_s1 + $0x60] sm:$0xff]  ;;  %v435_v42 = vld [vmem:[%s2208_s1 + $0x78] sm:$0xff] }
  0x7d   : > { %665 = vperm.xlu0 %1520, %v587_v43   ;;  %v437_v43 = vld [vmem:[%s2208_s1 + $0x88] sm:$0xff] }
  0x83   : > { %v371_v50 = vpop.permute.xlu0 %370  ;;  %v369_v51 = vpop.permute.xlu1 %368 }
  0x84   : > { %387 = vst.msk [vmem:[#allocation2 + $0x1f8] sm:$0xff] %vm203_vm0, %v371_v50  ;;  %386 = vst.msk [vmem:[#allocation2 + $0x1f0] sm:$0xff] %vm203_vm0, %v369_v51  ;;  %v586_v50 = vld [vmem:[%s2209_s2 + $0x70] sm:$0xff]  ;;  %v505_v51 = vld [vmem:[#allocation2 + $0x28] sm:$0xff] }
  0x85   : > { %660 = vperm.xlu1 %1521, %v586_v50   ;;  %v448_v50 = vld [vmem:[%s2208_s1 + $0xe0] sm:$0xff] }
  0x87   : > { %v299_v52 = vpop.permute.xlu0 %298  ;;  %v297_v53 = vpop.permute.xlu1 %296 }
  0x88   : > { %315 = vst.msk [vmem:[#allocation2 + $0x178] sm:$0xff] %vm203_vm0, %v299_v52  ;;  %314 = vst.msk [vmem:[#allocation2 + $0x170] sm:$0xff] %vm203_vm0, %v297_v53  ;;  %v537_v52 = vld [vmem:[#allocation2 + $0x128] sm:$0xff] }
  0x8b   : > { %v295_v54 = vpop.permute.xlu1 %294  ;;  %v367_v55 = vpop.permute.xlu0 %366  ;;  %v563_v56 = vld [vmem:[#allocation2 + $0x1f8] sm:$0xff]  ;;  %v562_v60 = vld [vmem:[#allocation2 + $0x1f0] sm:$0xff] }
  0x8c   : > { %313 = vst.msk [vmem:[#allocation2 + $0x168] sm:$0xff] %vm203_vm0, %v295_v54  ;;  %385 = vst.msk [vmem:[#allocation2 + $0x1e8] sm:$0xff] %vm203_vm0, %v367_v55  ;;  %1348 = vmatprep.subr.mxu1 %v563_v56 }
  0x8f   : > { %v293_v57 = vpop.permute.xlu1 %292  ;;  %v365_v58 = vpop.permute.xlu0 %364  ;;  %v547_v59 = vld [vmem:[#allocation2 + $0x178] sm:$0xff]  ;;  %v546_v62 = vld [vmem:[#allocation2 + $0x170] sm:$0xff] }
  0x90   : > { %312 = vst.msk [vmem:[#allocation2 + $0x160] sm:$0xff] %vm203_vm0, %v293_v57  ;;  %384 = vst.msk [vmem:[#allocation2 + $0x1e0] sm:$0xff] %vm203_vm0, %v365_v58  ;;  %1349 = vmatpush3.msra.mxu1 %v547_v59  ;;  %v504_v57 = vld [vmem:[#allocation2 + $0x20] sm:$0xff] }
  0x91   : > { %1350 = vmatprep.subr.mxu1 %v562_v60  ;;  %v536_v58 = vld [vmem:[#allocation2 + $0x120] sm:$0xff] }
  0x92   : > { %1351 = vmatpush3.msra.mxu1 %v546_v62 }
  0x93   : > { %v291_v0 = vpop.permute.xlu1 %290  ;;  %v363_v1 = vpop.permute.xlu0 %362  ;;  %v561_v2 = vld [vmem:[#allocation2 + $0x1e8] sm:$0xff] }
  0x94   : > { %v545_v3 = vld [vmem:[#allocation2 + $0x168] sm:$0xff]  ;;  %311 = vst.msk [vmem:[#allocation2 + $0x158] sm:$0xff] %vm203_vm0, %v291_v0  ;;  %383 = vst.msk [vmem:[#allocation2 + $0x1d8] sm:$0xff] %vm203_vm0, %v363_v1  ;;  %1352 = vmatprep.subr.mxu1 %v561_v2  ;;  %v535_v0 = vld [vmem:[#allocation2 + $0x118] sm:$0xff] }
  0x95   : > { %1353 = vmatpush3.msra.mxu1 %v545_v3 }
  0x97   : > { %v289_v6 = vpop.permute.xlu1 %288  ;;  %v361_v7 = vpop.permute.xlu0 %360  ;;  %v560_v8 = vld [vmem:[#allocation2 + $0x1e0] sm:$0xff] }
  0x98   : > { %v544_v9 = vld [vmem:[#allocation2 + $0x160] sm:$0xff]  ;;  %310 = vst.msk [vmem:[#allocation2 + $0x150] sm:$0xff] %vm203_vm0, %v289_v6  ;;  %382 = vst.msk [vmem:[#allocation2 + $0x1d0] sm:$0xff] %vm203_vm0, %v361_v7  ;;  %1354 = vmatprep.subr.mxu1 %v560_v8  ;;  %v534_v6 = vld [vmem:[#allocation2 + $0x110] sm:$0xff] }
  0x99   : > { %1355 = vmatpush3.msra.mxu1 %v544_v9 }
  0x9b   : > { %v287_v12 = vpop.permute.xlu1 %286  ;;  %v359_v13 = vpop.permute.xlu0 %358  ;;  %v559_v14 = vld [vmem:[#allocation2 + $0x1d8] sm:$0xff] }
  0x9c   : > { %v543_v15 = vld [vmem:[#allocation2 + $0x158] sm:$0xff]  ;;  %309 = vst.msk [vmem:[#allocation2 + $0x148] sm:$0xff] %vm203_vm0, %v287_v12  ;;  %381 = vst.msk [vmem:[#allocation2 + $0x1c8] sm:$0xff] %vm203_vm0, %v359_v13  ;;  %1356 = vmatprep.subr.mxu1 %v559_v14  ;;  %v533_v12 = vld [vmem:[#allocation2 + $0x108] sm:$0xff] }
  0x9d   : > { %1357 = vmatpush3.msra.mxu1 %v543_v15 }
  0x9f   : > { %v285_v18 = vpop.permute.xlu1 %284  ;;  %v357_v19 = vpop.permute.xlu0 %356  ;;  %v558_v20 = vld [vmem:[#allocation2 + $0x1d0] sm:$0xff] }
  0xa0   : > { %v542_v21 = vld [vmem:[#allocation2 + $0x150] sm:$0xff]  ;;  %308 = vst.msk [vmem:[#allocation2 + $0x140] sm:$0xff] %vm203_vm0, %v285_v18  ;;  %380 = vst.msk [vmem:[#allocation2 + $0x1c0] sm:$0xff] %vm203_vm0, %v357_v19  ;;  %1358 = vmatprep.subr.mxu1 %v558_v20  ;;  %v532_v18 = vld [vmem:[#allocation2 + $0x100] sm:$0xff] }
  0xa1   : > { %1359 = vmatpush3.msra.mxu1 %v542_v21  ;;  %v422_v19 = vld [vmem:[%s2208_s1 + $0x10] sm:$0xff] }
  0xa3   : > { %v331_v24 = vpop.permute.xlu1 %330  ;;  %v243_v25 = vpop.permute.xlu0 %242  ;;  %v557_v26 = vld [vmem:[#allocation2 + $0x1c8] sm:$0xff] }
  0xa4   : > { %v541_v27 = vld [vmem:[#allocation2 + $0x148] sm:$0xff]  ;;  %347 = vst.msk [vmem:[#allocation2 + $0x1b8] sm:$0xff] %vm203_vm0, %v331_v24  ;;  %259 = vst.msk [vmem:[#allocation2 + $0xb8] sm:$0xff] %vm203_vm0, %v243_v25  ;;  %1360 = vmatprep.subr.mxu1 %v557_v26  ;;  %v426_v25 = vld [vmem:[%s2208_s1 + $0x30] sm:$0xff] }
  0xa5   : > { %1361 = vmatpush3.msra.mxu1 %v541_v27  ;;  %v428_v26 = vld [vmem:[%s2208_s1 + $0x40] sm:$0xff] }
  0xa7   : > { %v329_v30 = vpop.permute.xlu1 %328  ;;  %v241_v31 = vpop.permute.xlu0 %240  ;;  %v556_v32 = vld [vmem:[#allocation2 + $0x1c0] sm:$0xff] }
  0xa8   : > { %v540_v33 = vld [vmem:[#allocation2 + $0x140] sm:$0xff]  ;;  %346 = vst.msk [vmem:[#allocation2 + $0x1b0] sm:$0xff] %vm203_vm0, %v329_v30  ;;  %258 = vst.msk [vmem:[#allocation2 + $0xb0] sm:$0xff] %vm203_vm0, %v241_v31  ;;  %1362 = vmatprep.subr.mxu1 %v556_v32  ;;  %v431_v32 = vld [vmem:[%s2208_s1 + $0x58] sm:$0xff] }
  0xa9   : > { %1363 = vmatpush3.msra.mxu1 %v540_v33  ;;  %v433_v33 = vld [vmem:[%s2208_s1 + $0x68] sm:$0xff] }
  0xab   : > { %v327_v38 = vpop.permute.xlu1 %326  ;;  %v239_v39 = vpop.permute.xlu0 %238  ;;  %v523_v40 = vld [vmem:[#allocation2 + $0xb8] sm:$0xff] }
  0xac   : > { %v555_v41 = vld [vmem:[#allocation2 + $0x1b8] sm:$0xff]  ;;  %345 = vst.msk [vmem:[#allocation2 + $0x1a8] sm:$0xff] %vm203_vm0, %v327_v38  ;;  %257 = vst.msk [vmem:[#allocation2 + $0xa8] sm:$0xff] %vm203_vm0, %v239_v39  ;;  %1284 = vmatprep.subr.mxu0 %v523_v40  ;;  %v436_v39 = vld [vmem:[%s2208_s1 + $0x80] sm:$0xff] }
  0xad   : > { %1364 = vmatprep.subr.mxu1 %v555_v41  ;;  %1285 = vmatpush3.msra.mxu0 %v507_v36  ;;  %v430_v36 = vld [vmem:[%s2208_s1 + $0x50] sm:$0xff] }
  0xae   : > { %1365 = vmatpush3.msra.mxu1 %v539_v37  ;;  %v438_v40 = vld [vmem:[%s2208_s1 + $0x90] sm:$0xff] }
  0xaf   : > { %v325_v46 = vpop.permute.xlu1 %324  ;;  %v237_v47 = vpop.permute.xlu0 %236  ;;  %v522_v48 = vld [vmem:[#allocation2 + $0xb0] sm:$0xff] }
  0xb0   : > { %v554_v49 = vld [vmem:[#allocation2 + $0x1b0] sm:$0xff]  ;;  %344 = vst.msk [vmem:[#allocation2 + $0x1a0] sm:$0xff] %vm203_vm0, %v325_v46  ;;  %256 = vst.msk [vmem:[#allocation2 + $0xa0] sm:$0xff] %vm203_vm0, %v237_v47  ;;  %1286 = vmatprep.subr.mxu0 %v522_v48  ;;  %v440_v48 = vld [vmem:[%s2208_s1 + $0xa0] sm:$0xff] }
  0xb1   : > { %1366 = vmatprep.subr.mxu1 %v554_v49  ;;  %1287 = vmatpush3.msra.mxu0 %v506_v44  ;;  %v441_v44 = vld [vmem:[%s2208_s1 + $0xa8] sm:$0xff]  ;;  %v442_v47 = vld [vmem:[%s2208_s1 + $0xb0] sm:$0xff] }
  0xb2   : > { %1367 = vmatpush3.msra.mxu1 %v538_v45  ;;  %v443_v45 = vld [vmem:[%s2208_s1 + $0xb8] sm:$0xff]  ;;  %v446_v49 = vld [vmem:[%s2208_s1 + $0xd0] sm:$0xff] }
  0xb3   : > { %v323_v53 = vpop.permute.xlu1 %322  ;;  %v235_v54 = vpop.permute.xlu0 %234  ;;  %v521_v55 = vld [vmem:[#allocation2 + $0xa8] sm:$0xff] }
  0xb4   : > { %v553_v56 = vld [vmem:[#allocation2 + $0x1a8] sm:$0xff]  ;;  %343 = vst.msk [vmem:[#allocation2 + $0x198] sm:$0xff] %vm203_vm0, %v323_v53  ;;  %255 = vst.msk [vmem:[#allocation2 + $0x98] sm:$0xff] %vm203_vm0, %v235_v54  ;;  %1288 = vmatprep.subr.mxu0 %v521_v55  ;;  %v447_v53 = vld [vmem:[%s2208_s1 + $0xd8] sm:$0xff] }
  0xb5   : > { %1368 = vmatprep.subr.mxu1 %v553_v56  ;;  %1289 = vmatpush3.msra.mxu0 %v505_v51  ;;  %v451_v54 = vld [vmem:[%s2208_s1 + $0xf8] sm:$0xff]  ;;  %v453_v55 = vld [vmem:[%s2208_s1 + $0x108] sm:$0xff] }
  0xb6   : > { %1369 = vmatpush3.msra.mxu1 %v537_v52  ;;  %v445_v52 = vld [vmem:[%s2208_s1 + $0xc8] sm:$0xff] }
  0xb7   : > { %v321_v59 = vpop.permute.xlu1 %320  ;;  %v233_v60 = vpop.permute.xlu0 %232  ;;  %v520_v61 = vld [vmem:[#allocation2 + $0xa0] sm:$0xff] }
  0xb8   : > { %v552_v62 = vld [vmem:[#allocation2 + $0x1a0] sm:$0xff]  ;;  %342 = vst.msk [vmem:[#allocation2 + $0x190] sm:$0xff] %vm203_vm0, %v321_v59  ;;  %254 = vst.msk [vmem:[#allocation2 + $0x90] sm:$0xff] %vm203_vm0, %v233_v60  ;;  %1290 = vmatprep.subr.mxu0 %v520_v61  ;;  %v458_v60 = vld [vmem:[%s2208_s1 + $0x130] sm:$0xff] }
  0xb9   : > { %1370 = vmatprep.subr.mxu1 %v552_v62  ;;  %1291 = vmatpush3.msra.mxu0 %v504_v57  ;;  %v452_v57 = vld [vmem:[%s2208_s1 + $0x100] sm:$0xff]  ;;  %v455_v62 = vld [vmem:[%s2208_s1 + $0x118] sm:$0xff] }
  0xba   : > { %1371 = vmatpush3.msra.mxu1 %v536_v58  ;;  %v450_v58 = vld [vmem:[%s2208_s1 + $0xf0] sm:$0xff]  ;;  %v456_v59 = vld [vmem:[%s2208_s1 + $0x120] sm:$0xff] }
  0xbb   : > { %v319_v1 = vpop.permute.xlu1 %318  ;;  %v231_v2 = vpop.permute.xlu0 %230  ;;  %v519_v3 = vld [vmem:[#allocation2 + $0x98] sm:$0xff] }
  0xbc   : > { %v551_v4 = vld [vmem:[#allocation2 + $0x198] sm:$0xff]  ;;  %341 = vst.msk [vmem:[#allocation2 + $0x188] sm:$0xff] %vm203_vm0, %v319_v1  ;;  %253 = vst.msk [vmem:[#allocation2 + $0x88] sm:$0xff] %vm203_vm0, %v231_v2  ;;  %1292 = vmatprep.subr.mxu0 %v519_v3  ;;  %v462_v3 = vld [vmem:[%s2208_s1 + $0x150] sm:$0xff] }
  0xbd   : > { %1372 = vmatprep.subr.mxu1 %v551_v4  ;;  %1293 = vmatpush3.msra.mxu0 %v503_v63  ;;  %v457_v63 = vld [vmem:[%s2208_s1 + $0x128] sm:$0xff]  ;;  %v463_v1 = vld [vmem:[%s2208_s1 + $0x158] sm:$0xff]  ;;  %v460_v4 = vld [vmem:[%s2208_s1 + $0x140] sm:$0xff] }
  0xbe   : > { %1373 = vmatpush3.msra.mxu1 %v535_v0  ;;  %v461_v0 = vld [vmem:[%s2208_s1 + $0x148] sm:$0xff] }
  0xbf   : > { %v317_v7 = vpop.permute.xlu1 %316  ;;  %v229_v8 = vpop.permute.xlu0 %228  ;;  %v518_v9 = vld [vmem:[#allocation2 + $0x90] sm:$0xff] }
  0xc0   : > { %v550_v10 = vld [vmem:[#allocation2 + $0x190] sm:$0xff]  ;;  %340 = vst.msk [vmem:[#allocation2 + $0x180] sm:$0xff] %vm203_vm0, %v317_v7  ;;  %252 = vst.msk [vmem:[#allocation2 + $0x80] sm:$0xff] %vm203_vm0, %v229_v8  ;;  %1294 = vmatprep.subr.mxu0 %v518_v9  ;;  %v465_v7 = vld [vmem:[%s2208_s1 + $0x168] sm:$0xff] }
  0xc1   : > { %1374 = vmatprep.subr.mxu1 %v550_v10  ;;  %1295 = vmatpush3.msra.mxu0 %v502_v5  ;;  %v466_v5 = vld [vmem:[%s2208_s1 + $0x170] sm:$0xff]  ;;  %v467_v8 = vld [vmem:[%s2208_s1 + $0x178] sm:$0xff]  ;;  %v473_v10 = vld [vmem:[%s2208_s1 + $0x1a8] sm:$0xff] }
  0xc2   : > { %1375 = vmatpush3.msra.mxu1 %v534_v6  ;;  %v468_v6 = vld [vmem:[%s2208_s1 + $0x180] sm:$0xff]  ;;  %v471_v9 = vld [vmem:[%s2208_s1 + $0x198] sm:$0xff] }
  0xc3   : > { %v403_v13 = vpop.permute.xlu0 %402  ;;  %v517_v14 = vld [vmem:[#allocation2 + $0x88] sm:$0xff]  ;;  %v401_v16 = vpop.permute.xlu1 %400 }
  0xc4   : > { %v549_v15 = vld [vmem:[#allocation2 + $0x188] sm:$0xff]  ;;  %419 = vst.msk [vmem:[#allocation2 + $0x238] sm:$0xff] %vm203_vm0, %v403_v13  ;;  %1296 = vmatprep.subr.mxu0 %v517_v14  ;;  %418 = vst.msk [vmem:[#allocation2 + $0x230] sm:$0xff] %vm203_vm0, %v401_v16  ;;  %v476_v13 = vld [vmem:[%s2208_s1 + $0x1c0] sm:$0xff] }
  0xc5   : > { %1376 = vmatprep.subr.mxu1 %v549_v15  ;;  %1297 = vmatpush3.msra.mxu0 %v501_v11  ;;  %v472_v11 = vld [vmem:[%s2208_s1 + $0x1a0] sm:$0xff]  ;;  %v478_v14 = vld [vmem:[%s2208_s1 + $0x1d0] sm:$0xff]  ;;  %v475_v15 = vld [vmem:[%s2208_s1 + $0x1b8] sm:$0xff] }
  0xc6   : > { %1377 = vmatpush3.msra.mxu1 %v533_v12  ;;  %v470_v12 = vld [vmem:[%s2208_s1 + $0x190] sm:$0xff]  ;;  %v477_v16 = vld [vmem:[%s2208_s1 + $0x1c8] sm:$0xff] }
  0xc7   : > { %v516_v20 = vld [vmem:[#allocation2 + $0x80] sm:$0xff]  ;;  %v399_v23 = vpop.permute.xlu0 %398  ;;  %v397_v24 = vpop.permute.xlu1 %396 }
  0xc8   : > { %v548_v21 = vld [vmem:[#allocation2 + $0x180] sm:$0xff]  ;;  %1298 = vmatprep.subr.mxu0 %v516_v20  ;;  %417 = vst.msk [vmem:[#allocation2 + $0x228] sm:$0xff] %vm203_vm0, %v399_v23  ;;  %416 = vst.msk [vmem:[#allocation2 + $0x220] sm:$0xff] %vm203_vm0, %v397_v24  ;;  %v485_v23 = vld [vmem:[%s2208_s1 + $0x208] sm:$0xff] }
  0xc9   : > { %1378 = vmatprep.subr.mxu1 %v548_v21  ;;  %1299 = vmatpush3.msra.mxu0 %v500_v17  ;;  %v481_v17 = vld [vmem:[%s2208_s1 + $0x1e8] sm:$0xff]  ;;  %v480_v20 = vld [vmem:[%s2208_s1 + $0x1e0] sm:$0xff]  ;;  %v486_v21 = vld [vmem:[%s2208_s1 + $0x210] sm:$0xff] }
  0xca   : > { %1379 = vmatpush3.msra.mxu1 %v532_v18  ;;  %782 = vmatmul.mubr.f32.vlgmr.msra.gmra.mxu0 %v420_v22  ;;  %v483_v18 = vld [vmem:[%s2208_s1 + $0x1f8] sm:$0xff]  ;;  %v488_v22 = vld [vmem:[%s2208_s1 + $0x220] sm:$0xff] }
  0xcb   : > { %927 = vmatmul.mubr.f32.vlgmr.msra.gmra.mxu1 %v422_v19  ;;  %v571_v27 = vld [vmem:[#allocation2 + $0x238] sm:$0xff]  ;;  %786 = vmatprep.mubr.f32.mxu0 %v426_v25  ;;  %v395_v30 = vpop.permute.xlu0 %394  ;;  %v393_v31 = vpop.permute.xlu1 %392  ;;  %v570_v34 = vld [vmem:[#allocation2 + $0x230] sm:$0xff] }
  0xcc   : > { %931 = vmatprep.mubr.f32.mxu1 %v428_v26  ;;  %1452 = vmatprep.subr.mxu0 %v571_v27  ;;  %415 = vst.msk [vmem:[#allocation2 + $0x218] sm:$0xff] %vm203_vm0, %v395_v30  ;;  %414 = vst.msk [vmem:[#allocation2 + $0x210] sm:$0xff] %vm203_vm0, %v393_v31  ;;  %v482_v19 = vld [vmem:[%s2208_s1 + $0x1f0] sm:$0xff]  ;;  %v487_v24 = vld [vmem:[%s2208_s1 + $0x218] sm:$0xff] }
  0xcd   : > { %1492 = vmatprep.subr.mxu1 %v571_v27  ;;  %1453 = vmatpush3.msra.mxu0 %v571_v27  ;;  %v491_v25 = vld [vmem:[%s2208_s1 + $0x238] sm:$0xff]  ;;  %v493_v26 = vld [vmem:[%s2208_s1 + $0x248] sm:$0xff]  ;;  %v498_v30 = vld [vmem:[%s2208_s1 + $0x270] sm:$0xff] }
  0xce   : > { %1500 = vmatpush3.msra.mxu1 %v571_v27  ;;  %787 = vmatmul.mubr.f32.gmra.mxu0 %v425_v28  ;;  %v490_v27 = vld [vmem:[%s2208_s1 + $0x230] sm:$0xff]  ;;  %v492_v28 = vld [vmem:[%s2208_s1 + $0x240] sm:$0xff]  ;;  %v495_v31 = vld [vmem:[%s2208_s1 + $0x258] sm:$0xff] }
  0xcf   : > { %932 = vmatmul.mubr.f32.gmra.mxu1 %v427_v29  ;;  %791 = vmatprep.mubr.f32.mxu0 %v431_v32  ;;  %v391_v37 = vpop.permute.xlu0 %390  ;;  %v389_v38 = vpop.permute.xlu1 %388  ;;  %v569_v41 = vld [vmem:[#allocation2 + $0x228] sm:$0xff]  ;;  %v568_v46 = vld [vmem:[#allocation2 + $0x220] sm:$0xff] }
  0xd0   : > { %936 = vmatprep.mubr.f32.mxu1 %v433_v33  ;;  %1454 = vmatprep.subr.mxu0 %v570_v34  ;;  %413 = vst.msk [vmem:[#allocation2 + $0x208] sm:$0xff] %vm203_vm0, %v391_v37  ;;  %412 = vst.msk [vmem:[#allocation2 + $0x200] sm:$0xff] %vm203_vm0, %v389_v38  ;;  %v496_v29 = vld [vmem:[%s2208_s1 + $0x260] sm:$0xff]  ;;  %v497_v32 = vld [vmem:[%s2208_s1 + $0x268] sm:$0xff] }
  0xd1   : > { %1493 = vmatprep.subr.mxu1 %v570_v34  ;;  %1455 = vmatpush3.msra.mxu0 %v570_v34  ;;  %v424_v33 = vld [vmem:[%s2208_s1 + $0x20] sm:$0xff]  ;;  %v434_v37 = vld [vmem:[%s2208_s1 + $0x70] sm:$0xff] }
  0xd2   : > { %1501 = vmatpush3.msra.mxu1 %v570_v34  ;;  %792 = vmatmul.mubr.f32.gmra.mxu0 %v430_v36  ;;  %v464_v34 = vld [vmem:[%s2208_s1 + $0x160] sm:$0xff]  ;;  %v469_v36 = vld [vmem:[%s2208_s1 + $0x188] sm:$0xff]  ;;  %v474_v38 = vld [vmem:[%s2208_s1 + $0x1b0] sm:$0xff] }
  0xd3   : > { %937 = vmatmul.mubr.f32.gmra.mxu1 %v432_v35  ;;  %796 = vmatprep.mubr.f32.mxu0 %v436_v39  ;;  %v567_v51 = vld [vmem:[#allocation2 + $0x218] sm:$0xff]  ;;  %v566_v56 = vld [vmem:[#allocation2 + $0x210] sm:$0xff]  ;;  %v429_v35 = vld [vmem:[%s2208_s1 + $0x48] sm:$0xff] }
  0xd4   : > { %941 = vmatprep.mubr.f32.mxu1 %v438_v40  ;;  %1456 = vmatprep.subr.mxu0 %v569_v41  ;;  %v439_v39 = vld [vmem:[%s2208_s1 + $0x98] sm:$0xff] }
  0xd5   : > { %1494 = vmatprep.subr.mxu1 %v569_v41  ;;  %1457 = vmatpush3.msra.mxu0 %v569_v41  ;;  %v479_v40 = vld [vmem:[%s2208_s1 + $0x1d8] sm:$0xff] }
  0xd6   : > { %1502 = vmatpush3.msra.mxu1 %v569_v41  ;;  %797 = vmatmul.mubr.f32.gmra.mxu0 %v435_v42  ;;  %v444_v41 = vld [vmem:[%s2208_s1 + $0xc0] sm:$0xff] }
  0xd7   : > { %942 = vmatmul.mubr.f32.gmra.mxu1 %v437_v43  ;;  %801 = vmatprep.mubr.f32.mxu0 %v441_v44  ;;  %v565_v61 = vld [vmem:[#allocation2 + $0x208] sm:$0xff]  ;;  %v564_v2 = vld [vmem:[#allocation2 + $0x200] sm:$0xff] }
  0xd8   : > { %946 = vmatprep.mubr.f32.mxu1 %v443_v45  ;;  %1458 = vmatprep.subr.mxu0 %v568_v46  ;;  %v484_v42 = vld [vmem:[%s2208_s1 + $0x200] sm:$0xff]  ;;  %v449_v43 = vld [vmem:[%s2208_s1 + $0xe8] sm:$0xff]  ;;  %v454_v45 = vld [vmem:[%s2208_s1 + $0x110] sm:$0xff] }
  0xd9   : > { %1495 = vmatprep.subr.mxu1 %v568_v46  ;;  %1459 = vmatpush3.msra.mxu0 %v568_v46  ;;  %v489_v44 = vld [vmem:[%s2208_s1 + $0x228] sm:$0xff] }
  0xda   : > { %1503 = vmatpush3.msra.mxu1 %v568_v46  ;;  %802 = vmatmul.mubr.f32.gmra.mxu0 %v440_v48  ;;  %v494_v46 = vld [vmem:[%s2208_s1 + $0x250] sm:$0xff]  ;;  %v499_v48 = vld [vmem:[%s2208_s1 + $0x278] sm:$0xff] }
  0xdb   : > { %947 = vmatmul.mubr.f32.gmra.mxu1 %v442_v47  ;;  %806 = vmatprep.mubr.f32.mxu0 %v446_v49  ;;  %v459_v47 = vld [vmem:[%s2208_s1 + $0x138] sm:$0xff] }
  0xdc   : > { %951 = vmatprep.mubr.f32.mxu1 %v448_v50  ;;  %1460 = vmatprep.subr.mxu0 %v567_v51 }
  0xdd   : > { %1496 = vmatprep.subr.mxu1 %v567_v51  ;;  %1461 = vmatpush3.msra.mxu0 %v567_v51 }
  0xde   : > { %1504 = vmatpush3.msra.mxu1 %v567_v51  ;;  %807 = vmatmul.mubr.f32.gmra.mxu0 %v445_v52 }
  0xdf   : > { %952 = vmatmul.mubr.f32.gmra.mxu1 %v447_v53  ;;  %811 = vmatprep.mubr.f32.mxu0 %v451_v54 }
  0xe0   : > { %956 = vmatprep.mubr.f32.mxu1 %v453_v55  ;;  %1462 = vmatprep.subr.mxu0 %v566_v56 }
  0xe1   : > { %1497 = vmatprep.subr.mxu1 %v566_v56  ;;  %1463 = vmatpush3.msra.mxu0 %v566_v56 }
  0xe2   : > { %1505 = vmatpush3.msra.mxu1 %v566_v56  ;;  %812 = vmatmul.mubr.f32.gmra.mxu0 %v450_v58 }
  0xe3   : > { %957 = vmatmul.mubr.f32.gmra.mxu1 %v452_v57  ;;  %816 = vmatprep.mubr.f32.mxu0 %v456_v59 }
  0xe4   : > { %961 = vmatprep.mubr.f32.mxu1 %v458_v60  ;;  %1464 = vmatprep.subr.mxu0 %v565_v61 }
  0xe5   : > { %1498 = vmatprep.subr.mxu1 %v565_v61  ;;  %1465 = vmatpush3.msra.mxu0 %v565_v61 }
  0xe6   : > { %1506 = vmatpush3.msra.mxu1 %v565_v61  ;;  %817 = vmatmul.mubr.f32.gmra.mxu0 %v455_v62 }
  0xe7   : > { %962 = vmatmul.mubr.f32.gmra.mxu1 %v457_v63  ;;  %821 = vmatprep.mubr.f32.mxu0 %v461_v0 }
  0xe8   : > { %966 = vmatprep.mubr.f32.mxu1 %v463_v1  ;;  %1466 = vmatprep.subr.mxu0 %v564_v2 }
  0xe9   : > { %1499 = vmatprep.subr.mxu1 %v564_v2  ;;  %1467 = vmatpush3.msra.mxu0 %v564_v2 }
  0xea   : > { %1507 = vmatpush3.msra.mxu1 %v564_v2  ;;  %822 = vmatmul.mubr.f32.gmra.mxu0 %v460_v4 }
  0xeb   : > { %967 = vmatmul.mubr.f32.gmra.mxu1 %v462_v3  ;;  %826 = vmatprep.mubr.f32.mxu0 %v466_v5 }
  0xec   : > { %971 = vmatprep.mubr.f32.mxu1 %v468_v6 }
  0xee   : > { %827 = vmatmul.mubr.f32.gmra.mxu0 %v465_v7 }
  0xef   : > { %972 = vmatmul.mubr.f32.gmra.mxu1 %v467_v8  ;;  %831 = vmatprep.mubr.f32.mxu0 %v471_v9 }
  0xf0   : > { %976 = vmatprep.mubr.f32.mxu1 %v473_v10 }
  0xf2   : > { %832 = vmatmul.mubr.f32.gmra.mxu0 %v470_v12 }
  0xf3   : > { %977 = vmatmul.mubr.f32.gmra.mxu1 %v472_v11  ;;  %836 = vmatprep.mubr.f32.mxu0 %v476_v13 }
  0xf4   : > { %981 = vmatprep.mubr.f32.mxu1 %v478_v14 }
  0xf6   : > { %837 = vmatmul.mubr.f32.gmra.mxu0 %v475_v15 }
  0xf7   : > { %982 = vmatmul.mubr.f32.gmra.mxu1 %v477_v16  ;;  %841 = vmatprep.mubr.f32.mxu0 %v481_v17 }
  0xf8   : > { %986 = vmatprep.mubr.f32.mxu1 %v483_v18 }
  0xfa   : > { %842 = vmatmul.mubr.f32.gmra.mxu0 %v480_v20 }
  0xfb   : > { %987 = vmatmul.mubr.f32.gmra.mxu1 %v482_v19  ;;  %846 = vmatprep.mubr.f32.mxu0 %v486_v21  ;;  %v591_v19 = vpop.permute.xlu0 %590 }
  0xfc   : > { %991 = vmatprep.mubr.f32.mxu1 %v488_v22  ;;  %v596_v22 = vpop.permute.xlu1 %595 }
  0xfe   : > { %847 = vmatmul.mubr.f32.gmra.mxu0 %v485_v23 }
  0xff   : > { %992 = vmatmul.mubr.f32.gmra.mxu1 %v487_v24  ;;  %851 = vmatprep.mubr.f32.mxu0 %v491_v25  ;;  %v606_v25 = vpop.permute.xlu0 %605 }
 0x100   : > { %996 = vmatprep.mubr.f32.mxu1 %v493_v26 }
 0x102   : > { %852 = vmatmul.mubr.f32.gmra.mxu0 %v490_v27 }
 0x103   : > { %997 = vmatmul.mubr.f32.gmra.mxu1 %v492_v28  ;;  %856 = vmatprep.mubr.f32.mxu0 %v496_v29 }
 0x104   : > { %1001 = vmatprep.mubr.f32.mxu1 %v498_v30  ;;  %v601_v30 = vpop.permute.xlu1 %600 }
 0x106   : > { %857 = vmatmul.mubr.f32.gmra.mxu0 %v495_v31  ;;  %v616_v31 = vpop.permute.xlu0 %615 }
 0x107   : > { %1002 = vmatmul.mubr.f32.gmra.mxu1 %v497_v32  ;;  %1468 = vmatprep.mubr.msk.f32.mxu0 %vm668_vm1, %v424_v33 }
 0x108   : > { %1480 = vmatprep.mubr.msk.f32.mxu1 %vm668_vm1, %v464_v34 }
 0x10a   : > { %1469 = vmatmul.mubr.msk.f32.vlgmr.msra.gmra.mxu0 %vm668_vm1, %v429_v35 }
 0x10b   : > { %1481 = vmatmul.mubr.msk.f32.vlgmr.msra.gmra.mxu1 %vm668_vm1, %v469_v36  ;;  %1471 = vmatprep.mubr.msk.f32.mxu0 %vm668_vm1, %v434_v37  ;;  %v611_v36 = vpop.permute.xlu1 %610  ;;  %v2110_v37 = vpop.permute.xlu0 %625 }
 0x10c   : > { %1483 = vmatprep.mubr.msk.f32.mxu1 %vm668_vm1, %v474_v38  ;;  %2220 = vst [vmem:[#allocation12_spill] sm:$0xff] %v2110_v37 }
 0x10e   : > { %1472 = vmatmul.mubr.msk.f32.gmra.mxu0 %vm668_vm1, %v439_v39 }
 0x10f   : > { %1484 = vmatmul.mubr.msk.f32.gmra.mxu1 %vm668_vm1, %v479_v40  ;;  %1474 = vmatprep.mubr.msk.f32.mxu0 %vm668_vm1, %v444_v41 }
 0x110   : > { %1486 = vmatprep.mubr.msk.f32.mxu1 %vm668_vm1, %v484_v42  ;;  %v621_v42 = vpop.permute.xlu1 %620 }
 0x112   : > { %1475 = vmatmul.mubr.msk.f32.gmra.mxu0 %vm668_vm1, %v449_v43 }
 0x113   : > { %1487 = vmatmul.mubr.msk.f32.gmra.mxu1 %vm668_vm1, %v489_v44  ;;  %1477 = vmatprep.mubr.msk.f32.mxu0 %vm668_vm1, %v454_v45 }
 0x114   : > { %1489 = vmatprep.mubr.msk.f32.mxu1 %vm668_vm1, %v494_v46  ;;  %v636_v46 = vpop.permute.xlu0 %635 }
 0x116   : > { %1478 = vmatmul.mubr.msk.f32.gmra.mxu0 %vm668_vm1, %v459_v47 }
 0x117   : > { %1490 = vmatmul.mubr.msk.f32.gmra.mxu1 %vm668_vm1, %v499_v48 }
 0x18a   : > { %v1300_v49 = vpop.f32.mrf.mxu0 }
 0x18b   : > { %v2058_v50 = vpop.f32.mrf.mxu1 }
 0x18c   : > { %v1301_v51 = vpop.f32.mrf.mxu0 }
 0x18d   : > { %v2060_v52 = vpop.f32.mrf.mxu1  ;;  %v1302_v43 = vadd.f32 %v1301_v51, %v1300_v49 }
 0x18e   : > { %v1303_v54 = vpop.f32.mrf.mxu0  ;;  %v1382_v49 = vadd.f32 %v2060_v52, %v2058_v50 }
 0x18f   : > { %v2062_v53 = vpop.f32.mrf.mxu1 }
 0x190   : > { %v1304_v55 = vpop.f32.mrf.mxu0 }
 0x191   : > { %v2064_v56 = vpop.f32.mrf.mxu1  ;;  %v1305_v47 = vadd.f32 %v1304_v55, %v1303_v54 }
 0x192   : > { %v1306_v58 = vpop.f32.mrf.mxu0  ;;  %v1385_v54 = vadd.f32 %v2064_v56, %v2062_v53 }
 0x193   : > { %v2066_v57 = vpop.f32.mrf.mxu1  ;;  %v789_v51 = vadd.f32 %v1305_v47, %v596_v22 }
 0x194   : > { %v1307_v59 = vpop.f32.mrf.mxu0 }
 0x195   : > { %v2068_v60 = vpop.f32.mrf.mxu1 }
 0x196   : > { %v1309_v62 = vpop.f32.mrf.mxu0 }
 0x197   : > { %v2070_v61 = vpop.f32.mrf.mxu1 }
 0x198   : > { %v1310_v63 = vpop.f32.mrf.mxu0 }
 0x199   : > { %v2072_v0 = vpop.f32.mrf.mxu1 }
 0x19a   : > { %v1312_v2 = vpop.f32.mrf.mxu0  ;;  %v1391_v22 = vadd.f32 %v2072_v0, %v2070_v61 }
 0x19b   : > { %v2074_v1 = vpop.f32.mrf.mxu1 }
 0x19c   : > { %v1313_v3 = vpop.f32.mrf.mxu0 }
 0x19d   : > { %v2076_v4 = vpop.f32.mrf.mxu1 }
 0x19e   : > { %v1315_v6 = vpop.f32.mrf.mxu0 }
 0x19f   : > { %v2078_v5 = vpop.f32.mrf.mxu1 }
 0x1a0   : > { %v1316_v7 = vpop.f32.mrf.mxu0 }
 0x1a1   : > { %v2080_v8 = vpop.f32.mrf.mxu1 }
 0x1a2   : > { %v2084_v10 = vpop.f32.mrf.mxu0 }
 0x1a3   : > { %v2082_v9 = vpop.f32.mrf.mxu1 }
 0x1a4   : > { %2211 = vst [vmem:[#allocation3_spill] sm:$0xff] %v2082_v9  ;;  %v2086_v11 = vpop.f32.mrf.mxu0  ;;  %v631_v9 = vpop.permute.xlu1 %630 }
 0x1a5   : > { %v2088_v12 = vpop.f32.mrf.mxu1  ;;  %v1320_v53 = vadd.f32 %v2086_v11, %v2084_v10 }
 0x1a6   : > { %2212 = vst [vmem:[#allocation4_spill] sm:$0xff] %v2088_v12  ;;  %v2092_v14 = vpop.f32.mrf.mxu0 }
 0x1a7   : > { %v2090_v13 = vpop.f32.mrf.mxu1  ;;  %2214 = vst [vmem:[#allocation6_spill] sm:$0xff] %v2092_v14  ;;  %v1317_v14 = vadd.f32 %v1316_v7, %v1315_v6 }
 0x1a8   : > { %2213 = vst [vmem:[#allocation5_spill] sm:$0xff] %v2090_v13  ;;  %v2094_v15 = vpop.f32.mrf.mxu0  ;;  %v1308_v13 = vadd.f32 %v1307_v59, %v1306_v58  ;;  %v641_v7 = vpop.permute.xlu1 %640 }
 0x1a9   : > { %2215 = vst [vmem:[#allocation7_spill] sm:$0xff] %v2094_v15  ;;  %v2096_v16 = vpop.f32.mrf.mxu1  ;;  %v1314_v15 = vadd.f32 %v1313_v3, %v1312_v2  ;;  %v1388_v3 = vadd.f32 %v2068_v60, %v2066_v57  ;;  %v809_v52 = vadd.f32 %v1317_v14, %v616_v31  ;;  %v1397_v57 = vadd.f32 %v2080_v8, %v2078_v5 }
 0x1aa   : > { %2216 = vst [vmem:[#allocation8_spill] sm:$0xff] %v2096_v16  ;;  %v1324_v18 = vpop.f32.mrf.mxu0  ;;  %v784_v16 = vadd.f32 %v1302_v43, %v591_v19  ;;  %v646_v19 = vpop.permute.xlu0 %645  ;;  %v794_v58 = vadd.f32 %v1308_v13, %v601_v30 }
 0x1ab   : > { %v2098_v17 = vpop.f32.mrf.mxu1  ;;  %v804_v50 = vadd.f32 %v1314_v15, %v611_v36  ;;  %v954_v30 = vadd.f32 %v1397_v57, %v809_v52 }
 0x1ac   : > { %v1325_v20 = vpop.f32.mrf.mxu0  ;;  %v929_v2 = vadd.f32 %v1382_v49, %v784_v16  ;;  %v1394_v16 = vadd.f32 %v2076_v4, %v2074_v1  ;;  %v939_v11 = vadd.f32 %v1388_v3, %v794_v58  ;;  %v2146_v4 = vadd.f32 %v1320_v53, %v621_v42  ;;  %v651_v36 = vpop.permute.xlu1 %650 }
 0x1ad   : > { %v2100_v21 = vpop.f32.mrf.mxu1  ;;  %v1326_v55 = vadd.f32 %v1325_v20, %v1324_v18  ;;  %v934_v20 = vadd.f32 %v1385_v54, %v789_v51 }
 0x1ae   : > { %v1327_v24 = vpop.f32.mrf.mxu0  ;;  %v2144_v1 = vadd.f32 %v1394_v16, %v804_v50 }
 0x1af   : > { %v2102_v23 = vpop.f32.mrf.mxu1  ;;  %v824_v60 = vadd.f32 %v1326_v55, %v631_v9 }
 0x1b0   : > { %v1328_v26 = vpop.f32.mrf.mxu0  ;;  %v661_v16 = vpop.permute.xlu1 %660 }
 0x1b1   : > { %v1408_v27 = vpop.f32.mrf.mxu1 }
 0x1b2   : > { %v1330_v28 = vpop.f32.mrf.mxu0  ;;  %v1409_v14 = vadd.f32 %v1408_v27, %v2102_v23 }
 0x1b3   : > { %v2104_v29 = vpop.f32.mrf.mxu1 }
 0x1b4   : > { %2217 = vst [vmem:[#allocation9_spill] sm:$0xff] %v2104_v29  ;;  %v1331_v32 = vpop.f32.mrf.mxu0 }
 0x1b5   : > { %v2106_v33 = vpop.f32.mrf.mxu1  ;;  %v1332_v56 = vadd.f32 %v1331_v32, %v1330_v28  ;;  %v2224_v32 = vld [vmem:[#allocation6_spill] sm:$0xff] }
 0x1b6   : > { %2218 = vst [vmem:[#allocation10_spill] sm:$0xff] %v2106_v33  ;;  %v1333_v34 = vpop.f32.mrf.mxu0  ;;  %v1311_v33 = vadd.f32 %v1310_v63, %v1309_v62 }
 0x1b7   : > { %v2108_v35 = vpop.f32.mrf.mxu1  ;;  %v834_v5 = vadd.f32 %v1332_v56, %v641_v7 }
 0x1b8   : > { %2219 = vst [vmem:[#allocation11_spill] sm:$0xff] %v2108_v35  ;;  %v1334_v38 = vpop.f32.mrf.mxu0  ;;  %v799_v59 = vadd.f32 %v1311_v33, %v606_v25  ;;  %v1406_v25 = vadd.f32 %v2100_v21, %v2098_v17  ;;  %v2225_v33 = vld [vmem:[#allocation7_spill] sm:$0xff] }
 0x1b9   : > { %v1414_v39 = vpop.f32.mrf.mxu1  ;;  %v1335_v62 = vadd.f32 %v1334_v38, %v1333_v34  ;;  %v1323_v34 = vadd.f32 %v2225_v33, %v2224_v32  ;;  %v2234_v32 = vld [vmem:[#allocation4_spill] sm:$0xff] }
 0x1ba   : > { %v1336_v40 = vpop.f32.mrf.mxu0  ;;  %v944_v10 = vadd.f32 %v1391_v22, %v799_v59  ;;  %v969_v21 = vadd.f32 %v1406_v25, %v824_v60  ;;  %v2228_v22 = vld [vmem:[#allocation12_spill] sm:$0xff] }
 0x1bb   : > { %v2112_v41 = vpop.f32.mrf.mxu1  ;;  %v839_v15 = vadd.f32 %v1335_v62, %v646_v19  ;;  %v2226_v38 = vld [vmem:[#allocation9_spill] sm:$0xff]  ;;  %v819_v53 = vadd.f32 %v1323_v34, %v2228_v22 }
 0x1bc   : > { %2221 = vst [vmem:[#allocation13_spill] sm:$0xff] %v2112_v41  ;;  %v1337_v44 = vpop.f32.mrf.mxu0  ;;  %v1329_v41 = vadd.f32 %v1328_v26, %v1327_v24  ;;  %v656_v26 = vpop.permute.xlu0 %655 }
 0x1bd   : > { %v2114_v45 = vpop.f32.mrf.mxu1  ;;  %v1338_v23 = vadd.f32 %v1337_v44, %v1336_v40 }
 0x1be   : > { %2222 = vst [vmem:[#allocation14_spill] sm:$0xff] %v2114_v45  ;;  %v1339_v48 = vpop.f32.mrf.mxu0  ;;  %v829_v6 = vadd.f32 %v1329_v41, %v636_v46  ;;  %v2227_v41 = vld [vmem:[#allocation10_spill] sm:$0xff] }
 0x1bf   : > { %v2116_v12 = vpop.f32.mrf.mxu1  ;;  %v2223_v8 = vld [vmem:[#allocation11_spill] sm:$0xff]  ;;  %v1412_v46 = vadd.f32 %v2227_v41, %v2226_v38  ;;  %v844_v55 = vadd.f32 %v1338_v23, %v651_v36 }
 0x1c0   : > { %v1340_v37 = vpop.f32.mrf.mxu0  ;;  %v974_v28 = vadd.f32 %v1409_v14, %v829_v6  ;;  %v1415_v9 = vadd.f32 %v1414_v39, %v2223_v8  ;;  %v666_v50 = vpop.permute.xlu0 %665 }
 0x1c1   : > { %v2118_v29 = vpop.f32.mrf.mxu1  ;;  %v1341_v61 = vadd.f32 %v1340_v37, %v1339_v48  ;;  %v979_v3 = vadd.f32 %v1412_v46, %v834_v5 }
 0x1c2   : > { %v1342_v45 = vpop.f32.mrf.mxu0  ;;  %v984_v42 = vadd.f32 %v1415_v9, %v839_v15  ;;  %v1421_v19 = vadd.f32 %v2118_v29, %v2116_v12 }
 0x1c3   : > { %v2122_v35 = vpop.f32.mrf.mxu1  ;;  %v849_v47 = vadd.f32 %v1341_v61, %v656_v26  ;;  %v2229_v56 = vld [vmem:[#allocation13_spill] sm:$0xff] }
 0x1c4   : > { %v1343_v63 = vpop.f32.mrf.mxu0  ;;  %v2231_v61 = vld [vmem:[#allocation5_spill] sm:$0xff] }
 0x1c5   : > { %v2126_v43 = vpop.f32.mrf.mxu1  ;;  %v1344_v58 = vadd.f32 %v1343_v63, %v1342_v45 }
 0x1c6   : > { %v1345_v13 = vpop.f32.mrf.mxu0 }
 0x1c7   : > { %v2134_v18 = vpop.f32.mrf.mxu1  ;;  %v854_v25 = vadd.f32 %v1344_v58, %v661_v16 }
 0x1c8   : > { %v1346_v0 = vpop.f32.mrf.mxu0 }
 0x1c9   : > { %v1426_v24 = vpop.f32.mrf.mxu1  ;;  %v1347_v48 = vadd.f32 %v1346_v0, %v1345_v13  ;;  %v2230_v13 = vld [vmem:[#allocation14_spill] sm:$0xff]  ;;  %v2232_v0 = vld [vmem:[#allocation8_spill] sm:$0xff] }
 0x1ca   : > { %v1470_v27 = vpop.f32.mrf.mxu0  ;;  %v1418_v12 = vadd.f32 %v2230_v13, %v2229_v56  ;;  %v1427_v26 = vadd.f32 %v1426_v24, %v2134_v18  ;;  %v1424_v18 = vadd.f32 %v2126_v43, %v2122_v35 }
 0x1cb   : > { %v1482_v31 = vpop.f32.mrf.mxu1  ;;  %v1079_v37 = vadd.f32 %v1470_v27, %v934_v20  ;;  %v859_v29 = vadd.f32 %v1347_v48, %v666_v50  ;;  %v994_v20 = vadd.f32 %v1421_v19, %v849_v47 }
 0x1cc   : > { %v1119_v17 = vadd.f32 %v1482_v31, %v974_v28  ;;  %v1073_v39 = vpop.f32.mrf.mxu0  ;;  %v989_v8 = vadd.f32 %v1418_v12, %v844_v55  ;;  %v2233_v31 = vld [vmem:[#allocation3_spill] sm:$0xff]  ;;  %v999_v43 = vadd.f32 %v1424_v18, %v854_v25 }
 0x1cd   : > { %v1113_v40 = vpop.f32.mrf.mxu1  ;;  %v1153_v44 = vmax.f32 %v1079_v37, 0.0  ;;  %v1074_v51 = vadd.f32 %v1073_v39, %v929_v2  ;;  %v1400_v33 = vadd.f32 %v2234_v32, %v2233_v31  ;;  %v1004_v37 = vadd.f32 %v1427_v26, %v859_v29 }
 0x1ce   : > { %v1161_v49 = vmax.f32 %v1119_v17, 0.0  ;;  %v1114_v54 = vadd.f32 %v1113_v40, %v969_v21  ;;  %v1473_v59 = vpop.f32.mrf.mxu0 }
 0x1cf   : > { %v1485_v62 = vpop.f32.mrf.mxu1  ;;  %1169 = vst.msk [vmem:[%s2156_s15 + $0x8] sm:$0xff] %vm203_vm0, %v1153_v44  ;;  %v1152_v52 = vmax.f32 %v1074_v51, 0.0  ;;  %v1089_v7 = vadd.f32 %v1473_v59, %v944_v10  ;;  %v1403_v10 = vadd.f32 %v2232_v0, %v2231_v61  ;;  %v959_v35 = vadd.f32 %v1400_v33, %v2146_v4 }
 0x1d0   : > { %1177 = vst.msk [vmem:[%s2156_s15 + $0x48] sm:$0xff] %vm203_vm0, %v1161_v49  ;;  %v1160_v6 = vmax.f32 %v1114_v54, 0.0  ;;  %v1129_v2 = vadd.f32 %v1485_v62, %v984_v42  ;;  %v1083_v45 = vpop.f32.mrf.mxu0 }
 0x1d1   : > { %v1123_v63 = vpop.f32.mrf.mxu1  ;;  %1168 = vst.msk [vmem:[%s2156_s15] sm:$0xff] %vm203_vm0, %v1152_v52  ;;  %v1155_v57 = vmax.f32 %v1089_v7, 0.0  ;;  %v1084_v14 = vadd.f32 %v1083_v45, %v939_v11  ;;  %v964_v36 = vadd.f32 %v1403_v10, %v819_v53 }
 0x1d2   : > { %1176 = vst.msk [vmem:[%s2156_s15 + $0x40] sm:$0xff] %vm203_vm0, %v1160_v6  ;;  %v1163_v60 = vmax.f32 %v1129_v2, 0.0  ;;  %v1124_v15 = vadd.f32 %v1123_v63, %v979_v3  ;;  %v1476_v28 = vpop.f32.mrf.mxu0 }
 0x1d3   : > { %v1488_v5 = vpop.f32.mrf.mxu1  ;;  %1171 = vst.msk [vmem:[%s2156_s15 + $0x18] sm:$0xff] %vm203_vm0, %v1155_v57  ;;  %v1154_v9 = vmax.f32 %v1084_v14, 0.0  ;;  %v1099_v27 = vadd.f32 %v1476_v28, %v954_v30 }
 0x1d4   : > { %1179 = vst.msk [vmem:[%s2156_s15 + $0x58] sm:$0xff] %vm203_vm0, %v1163_v60  ;;  %v1162_v23 = vmax.f32 %v1124_v15, 0.0  ;;  %v1139_v11 = vadd.f32 %v1488_v5, %v994_v20  ;;  %v1093_v24 = vpop.f32.mrf.mxu0 }
 0x1d5   : > { %v1133_v34 = vpop.f32.mrf.mxu1  ;;  %1170 = vst.msk [vmem:[%s2156_s15 + $0x10] sm:$0xff] %vm203_vm0, %v1154_v9  ;;  %v1157_v17 = vmax.f32 %v1099_v27, 0.0  ;;  %v1094_v21 = vadd.f32 %v1093_v24, %v2144_v1 }
 0x1d6   : > { %1178 = vst.msk [vmem:[%s2156_s15 + $0x50] sm:$0xff] %vm203_vm0, %v1162_v23  ;;  %v1165_v30 = vmax.f32 %v1139_v11, 0.0  ;;  %v1134_v38 = vadd.f32 %v1133_v34, %v989_v8  ;;  %v1479_v41 = vpop.f32.mrf.mxu0 }
 0x1d7   : > { %v1491_v46 = vpop.f32.mrf.mxu1  ;;  %1173 = vst.msk [vmem:[%s2156_s15 + $0x28] sm:$0xff] %vm203_vm0, %v1157_v17  ;;  %v1156_v47 = vmax.f32 %v1094_v21, 0.0  ;;  %v1109_v39 = vadd.f32 %v1479_v41, %v964_v36 }
 0x1d8   : > { %1181 = vst.msk [vmem:[%s2156_s15 + $0x68] sm:$0xff] %vm203_vm0, %v1165_v30  ;;  %v1164_v48 = vmax.f32 %v1134_v38, 0.0  ;;  %v1149_v40 = vadd.f32 %v1491_v46, %v1004_v37  ;;  %v1103_v42 = vpop.f32.mrf.mxu0 }
 0x1d9   : > { %v1143_v1 = vpop.f32.mrf.mxu1  ;;  %1172 = vst.msk [vmem:[%s2156_s15 + $0x20] sm:$0xff] %vm203_vm0, %v1156_v47  ;;  %v1159_v4 = vmax.f32 %v1109_v39, 0.0  ;;  %v1104_v49 = vadd.f32 %v1103_v42, %v959_v35 }
 0x1da   : > { %1180 = vst.msk [vmem:[%s2156_s15 + $0x60] sm:$0xff] %vm203_vm0, %v1164_v48  ;;  %v1167_v44 = vmax.f32 %v1149_v40, 0.0  ;;  %v1144_v51 = vadd.f32 %v1143_v1, %v999_v43 }
 0x1db   : > { %1175 = vst.msk [vmem:[%s2156_s15 + $0x38] sm:$0xff] %vm203_vm0, %v1159_v4  ;;  %v1158_v54 = vmax.f32 %v1104_v49, 0.0 }
 0x1dc   : > { %1183 = vst.msk [vmem:[%s2156_s15 + $0x78] sm:$0xff] %vm203_vm0, %v1167_v44  ;;  %v1166_v55 = vmax.f32 %v1144_v51, 0.0 }
 0x1dd   : > { %1174 = vst.msk [vmem:[%s2156_s15 + $0x30] sm:$0xff] %vm203_vm0, %v1158_v54 }
 0x1de   : > { %1182 = vst.msk [vmem:[%s2156_s15 + $0x70] sm:$0xff] %vm203_vm0, %v1166_v55 }
 0x1df PF: > { %s13_s12 = sadd.s32 1, %s1528_s12  }
 0x1e0   : > { %p10_p4 = scmp.ge.s32.totalorder %s13_s12, 4  }
 0x1e2   :  { %12 = sbr.rel (!%p10_p4) target bundleno = 1 (0x1), region = 62 }

// kernel: stn_forward.8
= control target key start
LH: loop header
LB: loop body
LE: loop exit
PB: predicated region body
PF: predicated region fallthrough
CT: control target
= control target key end

     0   :  { %s659_s18 = smov 0   ;;  %s776_s0 = inlined_call_operand.vmem [shape: f32[2,512], index: 0, kind: input, shape index: {}]   ;;  %s777_s1 = inlined_call_operand.vmem [shape: f32[512,128], index: 1, kind: input, shape index: {}]   ;;  %s778_s2 = inlined_call_operand.vmem [shape: f32[1,128], index: 2, kind: input, shape index: {}]   ;;  %s779_s3 = inlined_call_operand.vmem [shape: f32[128,6], index: 3, kind: input, shape index: {}]   ;;  %s780_s4 = inlined_call_operand.vmem [shape: f32[1,6], index: 4, kind: input, shape index: {}]   ;;  %s781_s5 = inlined_call_operand.vmem [shape: f32[2,6], index: 5, kind: output, shape index: {}]  }
   0x1 LB: > { %s665_s19 = sadd.s32 4294967295, %s624_s18   ;;  %p508_p0 = scmp.ge.s32.totalorder %s624_s18, 1  ;;  %s624_s18 = sphi %s659_s18, %s15_s18  }
   0x2   : > { %p194_p1 = scmp.lt.s32.totalorder %s624_s18, 3 }
   0x4   : > { %p195_p2 = pnand %p508_p0, %p194_p1 }
   0x5   : > { %s509_s20 = sshll.u32 (!%p195_p2), %s665_s19, 1  ;;  %s511_s21 = sshll.u32 (!%p195_p2), %s665_s19, 5 }
   0x6   : > { %198 = sbr.rel (%p195_p2) target bundleno = 483 (0x1e3), region = 40  ;;  %p223_p3 = scmp.lt.s32.totalorder (!%p195_p2), %s509_s20, 3 }
   0x7   : > { %p229_p4 = scmp.lt.s32.totalorder (!%p195_p2), %s511_s21, 63  ;;  %p513_p5 = scmp.ne.s32.totalorder (!%p195_p2), %s665_s19, 0 }
   0xb   : > { %s783_s20 = smov (!%p223_p3, %s509_s20), 3  ;;  %s785_s21 = smov (!%p229_p4, %s511_s21), 63 }
   0xc   : > { %s510_s22 = sshll.u32 %s783_s20, 1  ;;  %s512_s26 = sshll.u32 %s785_s21, 3 }
   0xd   : > { %s674_s25 = scalar_lea.vmem %s776_s0, %s510_s22  ;;  %s679_s29 = scalar_lea.vmem %s777_s1, %s512_s26 }
   0xe   : > { %237 = sbr.rel (%p513_p5) target bundleno = 21 (0x15), region = 44 }
  0x13   : > { %v626_v0 = vmov 0.0  }
  0x14   : > { %238 = vst [vmem:[#allocation2] sm:$0x3] %v626_v0 }
  0x15 PF: > { %v272_v1 = vld [vmem:[%s679_s29 + $0xf8] sm:$0xff]  ;;  %v271_v3 = vld [vmem:[%s679_s29 + $0xf0] sm:$0xff]  ;;  %v270_v5 = vld [vmem:[%s679_s29 + $0xe8] sm:$0xff]  ;;  %p515_p6 = scmp.ne.s32.totalorder %s665_s19, 1 }
  0x16   : > { %v256_v2 = vld [vmem:[%s679_s29 + $0x78] sm:$0xff]  ;;  %520 = vmatprep.subr.mxu0 %v272_v1  ;;  %v255_v4 = vld [vmem:[%s679_s29 + $0x70] sm:$0xff]  ;;  %v254_v6 = vld [vmem:[%s679_s29 + $0x68] sm:$0xff] }
  0x17   : > { %521 = vmatpush3.msra.mxu0 %v256_v2  ;;  %v269_v7 = vld [vmem:[%s679_s29 + $0xe0] sm:$0xff]  ;;  %v268_v9 = vld [vmem:[%s679_s29 + $0xd8] sm:$0xff]  ;;  %v267_v11 = vld [vmem:[%s679_s29 + $0xd0] sm:$0xff] }
  0x18   : > { %522 = vmatprep.subr.mxu0 %v271_v3  ;;  %v253_v8 = vld [vmem:[%s679_s29 + $0x60] sm:$0xff]  ;;  %v252_v10 = vld [vmem:[%s679_s29 + $0x58] sm:$0xff]  ;;  %v251_v12 = vld [vmem:[%s679_s29 + $0x50] sm:$0xff] }
  0x19   : > { %523 = vmatpush3.msra.mxu0 %v255_v4  ;;  %v266_v13 = vld [vmem:[%s679_s29 + $0xc8] sm:$0xff]  ;;  %v514_v14 = vld.sshfl [vmem:[%s674_s25] sm:$0x33 pattern:$0x76325410]  ;;  %v264_v19 = vld [vmem:[%s679_s29 + $0xb8] sm:$0xff] }
  0x1a   : > { %524 = vmatprep.subr.mxu0 %v270_v5  ;;  %v250_v15 = vld [vmem:[%s679_s29 + $0x48] sm:$0xff]  ;;  %v281_v16 = vcombine.high %v514_v14, %v514_v14  ;;  %v265_v17 = vld [vmem:[%s679_s29 + $0xc0] sm:$0xff]  ;;  %v248_v20 = vld [vmem:[%s679_s29 + $0x38] sm:$0xff] }
  0x1b   : > { %525 = vmatpush3.msra.mxu0 %v254_v6  ;;  %v249_v18 = vld [vmem:[%s679_s29 + $0x40] sm:$0xff]  ;;  %v263_v21 = vld [vmem:[%s679_s29 + $0xb0] sm:$0xff]  ;;  %v262_v23 = vld [vmem:[%s679_s29 + $0xa8] sm:$0xff] }
  0x1c   : > { %526 = vmatprep.subr.mxu0 %v269_v7  ;;  %348 = vmatprep.mubr.f32.mxu0 %v281_v16  ;;  %v247_v22 = vld [vmem:[%s679_s29 + $0x30] sm:$0xff]  ;;  %v246_v24 = vld [vmem:[%s679_s29 + $0x28] sm:$0xff]  ;;  %v261_v25 = vld [vmem:[%s679_s29 + $0xa0] sm:$0xff] }
  0x1d   : > { %527 = vmatpush3.msra.mxu0 %v253_v8  ;;  %v245_v26 = vld [vmem:[%s679_s29 + $0x20] sm:$0xff]  ;;  %v260_v27 = vld [vmem:[%s679_s29 + $0x98] sm:$0xff]  ;;  %v259_v29 = vld [vmem:[%s679_s29 + $0x90] sm:$0xff] }
  0x1e   : > { %528 = vmatprep.subr.mxu0 %v268_v9  ;;  %v244_v28 = vld [vmem:[%s679_s29 + $0x18] sm:$0xff]  ;;  %v243_v30 = vld [vmem:[%s679_s29 + $0x10] sm:$0xff]  ;;  %v258_v31 = vld [vmem:[%s679_s29 + $0x88] sm:$0xff] }
  0x1f   : > { %529 = vmatpush3.msra.mxu0 %v252_v10  ;;  %v242_v32 = vld [vmem:[%s679_s29 + $0x8] sm:$0xff]  ;;  %v257_v33 = vld [vmem:[%s679_s29 + $0x80] sm:$0xff] }
  0x20   : > { %530 = vmatprep.subr.mxu0 %v267_v11  ;;  %v241_v34 = vld [vmem:[%s679_s29] sm:$0xff] }
  0x21   : > { %531 = vmatpush3.msra.mxu0 %v251_v12  ;;  %v239_v36 = vld [vmem:[#allocation2] sm:$0x3] }
  0x22   : > { %532 = vmatprep.subr.mxu0 %v266_v13 }
  0x23   : > { %533 = vmatpush3.msra.mxu0 %v250_v15 }
  0x24   : > { %534 = vmatprep.subr.mxu0 %v265_v17 }
  0x25   : > { %535 = vmatpush3.msra.mxu0 %v249_v18 }
  0x26   : > { %536 = vmatprep.subr.mxu0 %v264_v19 }
  0x27   : > { %537 = vmatpush3.msra.mxu0 %v248_v20 }
  0x28   : > { %538 = vmatprep.subr.mxu0 %v263_v21 }
  0x29   : > { %539 = vmatpush3.msra.mxu0 %v247_v22 }
  0x2a   : > { %540 = vmatprep.subr.mxu0 %v262_v23 }
  0x2b   : > { %541 = vmatpush3.msra.mxu0 %v246_v24 }
  0x2c   : > { %542 = vmatprep.subr.mxu0 %v261_v25 }
  0x2d   : > { %543 = vmatpush3.msra.mxu0 %v245_v26 }
  0x2e   : > { %544 = vmatprep.subr.mxu0 %v260_v27 }
  0x2f   : > { %545 = vmatpush3.msra.mxu0 %v244_v28 }
  0x30   : > { %546 = vmatprep.subr.mxu0 %v259_v29 }
  0x31   : > { %547 = vmatpush3.msra.mxu0 %v243_v30 }
  0x32   : > { %548 = vmatprep.subr.mxu0 %v258_v31 }
  0x33   : > { %549 = vmatpush3.msra.mxu0 %v242_v32 }
  0x34   : > { %550 = vmatprep.subr.mxu0 %v257_v33 }
  0x35   : > { %551 = vmatpush3.msra.mxu0 %v241_v34 }
  0x36   : > { %349 = vmatmul.mubr.f32.vlgmr.msra.gmra.mxu0 %v514_v14 }
  0xf6   : > { %v552_v35 = vpop.f32.mrf.mxu0 }
  0xf8   : > { %v553_v37 = vpop.f32.mrf.mxu0 }
  0xf9   : > { %v554_v38 = vadd.f32 %v553_v37, %v552_v35  ;;  %359 = sbr.rel (%p515_p6) target bundleno = 483 (0x1e3), region = 48 }
  0xfb   : > { %v354_v39 = vadd.f32 %v554_v38, %v239_v36 }
  0xfd   : > { %355 = vst [vmem:[#allocation2] sm:$0x3] %v354_v39 }
  0xfe   : > { %v385_v40 = vld [vmem:[%s779_s3 + $0x78] sm:$0xff]  ;;  %v627_v41 = vmov 0.0   ;;  %v384_v42 = vld [vmem:[%s779_s3 + $0x70] sm:$0xff]  ;;  %vm628_vm0 = vmmov 0   ;;  %v383_v43 = vld [vmem:[%s779_s3 + $0x68] sm:$0xff]  ;;  %vm463_vm1 = vcmask 41984  }
  0xff   : > { %572 = vmatprep.subr.mxu0 %v627_v41  ;;  %604 = vmatprep.mubr.msk.f32.mxu0 %vm628_vm0, %v627_v41  ;;  %v382_v44 = vld [vmem:[%s779_s3 + $0x60] sm:$0xff]  ;;  %v381_v45 = vld [vmem:[%s779_s3 + $0x58] sm:$0xff]  ;;  %v380_v46 = vld [vmem:[%s779_s3 + $0x50] sm:$0xff] }
 0x100   : > { %573 = vmatpush3.msra.mxu0 %v385_v40  ;;  %v379_v47 = vld [vmem:[%s779_s3 + $0x48] sm:$0xff]  ;;  %v378_v48 = vld [vmem:[%s779_s3 + $0x40] sm:$0xff]  ;;  %v377_v49 = vld [vmem:[%s779_s3 + $0x38] sm:$0xff] }
 0x101   : > { %574 = vmatprep.subr.mxu0 %v627_v41  ;;  %v376_v50 = vld [vmem:[%s779_s3 + $0x30] sm:$0xff]  ;;  %v375_v51 = vld [vmem:[%s779_s3 + $0x28] sm:$0xff]  ;;  %v374_v52 = vld [vmem:[%s779_s3 + $0x20] sm:$0xff] }
 0x102   : > { %575 = vmatpush3.msra.mxu0 %v384_v42  ;;  %v516_v54 = vld [vmem:[%s778_s2] ss:$0 sm:$0xff]  ;;  %v373_v55 = vld [vmem:[%s779_s3 + $0x18] sm:$0xff]  ;;  %v372_v56 = vld [vmem:[%s779_s3 + $0x10] sm:$0xff] }
 0x103   : > { %576 = vmatprep.subr.mxu0 %v627_v41  ;;  %v371_v58 = vld [vmem:[%s779_s3 + $0x8] sm:$0xff]  ;;  %v370_v59 = vld [vmem:[%s779_s3] sm:$0xff] }
 0x104   : > { %577 = vmatpush3.msra.mxu0 %v383_v43  ;;  %v360_v53 = vld [vmem:[#allocation2] sm:$0x3] }
 0x105   : > { %578 = vmatprep.subr.mxu0 %v627_v41  ;;  %v368_v57 = vadd.f32 %v516_v54, %v360_v53  ;;  %v517_v61 = vld [vmem:[%s780_s4] ss:$0 sm:$0xff] }
 0x106   : > { %579 = vmatpush3.msra.mxu0 %v382_v44 }
 0x107   : > { %580 = vmatprep.subr.mxu0 %v627_v41  ;;  %v369_v60 = vmax.f32 %v368_v57, 0.0 }
 0x108   : > { %581 = vmatpush3.msra.mxu0 %v381_v45 }
 0x109   : > { %582 = vmatprep.subr.mxu0 %v627_v41 }
 0x10a   : > { %583 = vmatpush3.msra.mxu0 %v380_v46 }
 0x10b   : > { %584 = vmatprep.subr.mxu0 %v627_v41 }
 0x10c   : > { %585 = vmatpush3.msra.mxu0 %v379_v47 }
 0x10d   : > { %586 = vmatprep.subr.mxu0 %v627_v41 }
 0x10e   : > { %587 = vmatpush3.msra.mxu0 %v378_v48 }
 0x10f   : > { %588 = vmatprep.subr.mxu0 %v627_v41 }
 0x110   : > { %589 = vmatpush3.msra.mxu0 %v377_v49 }
 0x111   : > { %590 = vmatprep.subr.mxu0 %v627_v41 }
 0x112   : > { %591 = vmatpush3.msra.mxu0 %v376_v50 }
 0x113   : > { %592 = vmatprep.subr.mxu0 %v627_v41 }
 0x114   : > { %593 = vmatpush3.msra.mxu0 %v375_v51 }
 0x115   : > { %594 = vmatprep.subr.mxu0 %v627_v41 }
 0x116   : > { %595 = vmatpush3.msra.mxu0 %v374_v52 }
 0x117   : > { %596 = vmatprep.subr.mxu0 %v627_v41 }
 0x118   : > { %597 = vmatpush3.msra.mxu0 %v373_v55 }
 0x119   : > { %598 = vmatprep.subr.mxu0 %v627_v41 }
 0x11a   : > { %599 = vmatpush3.msra.mxu0 %v372_v56 }
 0x11b   : > { %600 = vmatprep.subr.mxu0 %v627_v41 }
 0x11c   : > { %601 = vmatpush3.msra.mxu0 %v371_v58 }
 0x11d   : > { %602 = vmatprep.subr.mxu0 %v627_v41 }
 0x11e   : > { %603 = vmatpush3.msra.mxu0 %v370_v59 }
 0x11f   : > { %605 = vmatmul.mubr.f32.vlgmr.msra.gmra.mxu0 %v369_v60 }
 0x1df   : > { %v459_v62 = vpop.f32.mrf.mxu0 }
 0x1e0   : > { %v460_v63 = vadd.f32 %v517_v61, %v459_v62 }
 0x1e1   : > { %v606_v0 = vpop.f32.mrf.mxu0 }
 0x1e2   : > { %464 = vst.msk [vmem:[%s781_s5] sm:$0x3] %vm463_vm1, %v460_v63 }
 0x1e3 PF: > { %s15_s18 = sadd.s32 1, %s624_s18  }
 0x1e4   : > { %p12_p7 = scmp.ge.s32.totalorder %s15_s18, 4  }
 0x1e6   :  { %14 = sbr.rel (!%p12_p7) target bundleno = 1 (0x1), region = 77 }

// kernel: stn_forward.9
= control target key start
LH: loop header
LB: loop body
LE: loop exit
PB: predicated region body
PF: predicated region fallthrough
CT: control target
= control target key end

     0   :  { %s1401_s9 = smov 0   ;;  %s2388_s0 = inlined_call_operand.vmem [shape: f32[2,3,256], index: 0, kind: input, shape index: {}]   ;;  %s2389_s1 = inlined_call_operand.vmem [shape: f32[2,1,6], index: 1, kind: input, shape index: {}]   ;;  %s2390_s2 = inlined_call_operand.vmem [shape: f32[2,3,256], index: 2, kind: output, shape index: {}]  }
   0x1 LB: > { %s1329_s10 = sadd.s32 4294967295, %s1378_s9   ;;  %p1333_p0 = scmp.ge.s32.totalorder %s1378_s9, 1  ;;  %s1378_s9 = sphi %s1401_s9, %s12_s9  }
   0x2   : > { %p120_p1 = scmp.lt.s32.totalorder %s1378_s9, 3 }
   0x4   : > { %p121_p2 = pnand %p1333_p0, %p120_p1 }
   0x5   : > { %p145_p3 = scmp.lt.s32.totalorder (!%p121_p2), %s1329_s10, 1 }
   0x6   : > { %124 = sbr.rel (%p121_p2) target bundleno = 562 (0x232), region = 28 }
   0xb   : > { %v1380_v0 = vmov 3   ;;  %v1381_v1 = vmov 0   ;;  %s2414_s10 = smov (!%p145_p3, %s1329_s10), 1  ;;  %v1382_v3 = vmov 1   ;;  %v1383_v4 = vmov 4  }
   0xc   : > { %1364 = vset.pattern.permute.xlu0 %v1380_v0  ;;  %1366 = vset.pattern.permute.xlu1 %v1381_v1  ;;  %s152_s13 = scalar_lea.vmem %s2389_s1, %s2414_s10  ;;  %v1384_v5 = vmov 5   ;;  %v1385_v6 = vmov 2   ;;  %v159_v7 = vlaneseq  ;;  %s1348_s14 = sshll.u32 %s2414_s10, 3 }
   0xd   : > { %v158_v2 = vld [vmem:[%s152_s13] sm:$0x1]  ;;  %s149_s17 = scalar_lea.vmem %s2388_s0, %s1348_s14  ;;  %s157_s20 = scalar_lea.vmem %s2390_s2, %s1348_s14 }
   0xe   : > { %193 = vperm.xlu1 %1366, %v158_v2   ;;  %225 = vperm.xlu0 %1364, %v158_v2   ;;  %v160_v8 = vand.u32 127, %v159_v7  ;;  %v1415_v28 = vshrl.u32 %v159_v7, 7 }
  0x10   : > { %v161_v9 = vadd.s32 128, %v160_v8  ;;  %v162_v10 = vcvt.s32.f32 %v160_v8  ;;  %v198_v33 = vsub.s32 0, %v1415_v28  ;;  %v304_v46 = vadd.s32 120, %v1415_v28 }
  0x11   : > { %v303_v47 = vadd.s32 112, %v1415_v28  ;;  %v302_v48 = vadd.s32 104, %v1415_v28  ;;  %v301_v49 = vadd.s32 96, %v1415_v28  ;;  %v300_v52 = vadd.s32 88, %v1415_v28 }
  0x12   : > { %1367 = vset.pattern.permute.xlu1 %v1382_v3  ;;  %1365 = vset.pattern.permute.xlu0 %v1383_v4  ;;  %v163_v11 = vcvt.s32.f32 %v161_v9  ;;  %v164_v12 = vadd.f32 0.5, %v162_v10  ;;  %v299_v53 = vadd.s32 80, %v1415_v28  ;;  %v1424_v62 = vcvt.s32.f32 %v304_v46 }
  0x13   : > { %203 = vperm.xlu1 %1367, %v158_v2   ;;  %235 = vperm.xlu0 %1365, %v158_v2   ;;  %v1426_v63 = vcvt.s32.f32 %v303_v47  ;;  %v298_v0 = vadd.s32 72, %v1415_v28  ;;  %v297_v1 = vadd.s32 64, %v1415_v28  ;;  %v319_v47 = vadd.s32 240, %v1415_v28 }
  0x14   : > { %v165_v13 = vadd.f32 0.5, %v163_v11  ;;  %v167_v14 = vmul.f32 0.0625, %v164_v12  ;;  %v1434_v12 = vcvt.s32.f32 %v300_v52 }
  0x16   : > { %v168_v15 = vmul.f32 0.0625, %v165_v13  ;;  %v169_v16 = vfloor.f32 %v167_v14  ;;  %v1436_v13 = vcvt.s32.f32 %v299_v53  ;;  %v296_v14 = vadd.s32 56, %v1415_v28 }
  0x17   : > { %1368 = vset.pattern.permute.xlu1 %v1384_v5  ;;  %1369 = vset.pattern.permute.xlu0 %v1385_v6 }
  0x18   : > { %247 = vperm.xlu1 %1368, %v158_v2   ;;  %215 = vperm.xlu0 %1369, %v158_v2   ;;  %v170_v17 = vfloor.f32 %v168_v15  ;;  %v171_v18 = vmul.f32 16.0, %v169_v16  ;;  %v183_v24 = vmul.f32 2.0, %v169_v16  ;;  %v295_v15 = vadd.s32 48, %v1415_v28 }
  0x1a   : > { %v172_v19 = vmul.f32 16.0, %v170_v17  ;;  %v173_v20 = vsub.f32 %v162_v10, %v171_v18  ;;  %v184_v25 = vmul.f32 2.0, %v170_v17  ;;  %v185_v29 = vadd.f32 1.0, %v183_v24 }
  0x1b   : > { %v1430_v10 = vcvt.s32.f32 %v302_v48  ;;  %v318_v48 = vadd.s32 232, %v1415_v28 }
  0x1c   : > { %1370 = vset.pattern.permute.xlu0 %v1384_v5  ;;  %v174_v21 = vsub.f32 %v163_v11, %v172_v19  ;;  %v175_v22 = vmul.f32 2.0, %v173_v20  ;;  %v186_v30 = vadd.f32 1.0, %v184_v25  ;;  %v187_v36 = vmul.f32 0.0625, %v185_v29 }
  0x1d   : > { %v1432_v11 = vcvt.s32.f32 %v301_v49  ;;  %v1440_v20 = vcvt.s32.f32 %v298_v0  ;;  %v1446_v29 = vcvt.s32.f32 %v296_v14 }
  0x1e   : > { %v176_v23 = vmul.f32 2.0, %v174_v21  ;;  %v177_v26 = vadd.f32 1.0, %v175_v22  ;;  %v188_v37 = vmul.f32 0.0625, %v186_v30  ;;  %v1340_v42 = vadd.f32 -1.0, %v187_v36 }
  0x1f   : > { %v1442_v21 = vcvt.s32.f32 %v297_v1  ;;  %v294_v22 = vadd.s32 40, %v1415_v28  ;;  %v1448_v30 = vcvt.s32.f32 %v295_v15  ;;  %v1478_v1 = vcvt.s32.f32 %v319_v47 }
  0x20   : > { %v178_v27 = vadd.f32 1.0, %v176_v23  ;;  %v179_v31 = vmul.f32 0.0625, %v177_v26  ;;  %v1341_v43 = vadd.f32 -1.0, %v188_v37  ;;  %v293_v23 = vadd.s32 32, %v1415_v28 }
  0x21   : > { %v1452_v37 = vcvt.s32.f32 %v294_v22 }
  0x22   : > { %v180_v32 = vmul.f32 0.0625, %v178_v27  ;;  %v1338_v38 = vadd.f32 -1.0, %v179_v31  ;;  %v292_v31 = vadd.s32 24, %v1415_v28 }
  0x24   : > { %v1339_v39 = vadd.f32 -1.0, %v180_v32  ;;  %v291_v32 = vadd.s32 16, %v1415_v28 }
  0x26   : > { %v1460_v46 = vcvt.s32.f32 %v291_v32 }
  0x89   : > { %v194_v34 = vpop.permute.xlu1 %193  ;;  %v226_v35 = vpop.permute.xlu0 %225 }
  0x8a   : > { %v199_v40 = vrot.slane %v194_v34, %v198_v33  ;;  %v231_v41 = vrot.slane %v226_v35, %v198_v33 }
  0x8c   : > { %v200_v54 = vmul.f32 %v1338_v38, %v199_v40  ;;  %v201_v55 = vmul.f32 %v1339_v39, %v199_v40  ;;  %v232_v56 = vmul.f32 %v1338_v38, %v231_v41  ;;  %v233_v57 = vmul.f32 %v1339_v39, %v231_v41 }
  0x8d   : > { %v1454_v38 = vcvt.s32.f32 %v293_v23  ;;  %v290_v39 = vadd.s32 8, %v1415_v28  ;;  %v320_v40 = vadd.s32 248, %v1415_v28 }
  0x8e   : > { %v204_v44 = vpop.permute.xlu1 %203  ;;  %v236_v45 = vpop.permute.xlu0 %235 }
  0x8f   : > { %v209_v50 = vrot.slane %v204_v44, %v198_v33  ;;  %v241_v51 = vrot.slane %v236_v45, %v198_v33  ;;  %v1458_v45 = vcvt.s32.f32 %v292_v31  ;;  %v1464_v53 = vcvt.s32.f32 %v290_v39 }
  0x91   : > { %v210_v58 = vmul.f32 %v1340_v42, %v209_v50  ;;  %v211_v59 = vmul.f32 %v1341_v43, %v209_v50  ;;  %v242_v60 = vmul.f32 %v1340_v42, %v241_v51  ;;  %v243_v61 = vmul.f32 %v1341_v43, %v241_v51 }
  0x93   : > { %v248_v2 = vpop.permute.xlu1 %247  ;;  %v244_v3 = vadd.f32 %v242_v60, %v232_v56  ;;  %v245_v4 = vadd.f32 %v243_v61, %v233_v57  ;;  %v212_v5 = vadd.f32 %v210_v58, %v200_v54  ;;  %v213_v6 = vadd.f32 %v211_v59, %v201_v55  ;;  %v216_v7 = vpop.permute.xlu0 %215 }
  0x94   : > { %v253_v8 = vrot.slane %v248_v2, %v198_v33  ;;  %v221_v9 = vrot.slane %v216_v7, %v198_v33  ;;  %v317_v54 = vadd.s32 224, %v1415_v28  ;;  %v316_v55 = vadd.s32 216, %v1415_v28 }
  0x95   : > { %v315_v56 = vadd.s32 208, %v1415_v28  ;;  %v1474_v59 = vcvt.s32.f32 %v1415_v28  ;;  %v1476_v60 = vcvt.s32.f32 %v320_v40  ;;  %v1480_v2 = vcvt.s32.f32 %v318_v48 }
  0x96   : > { %v254_v16 = vadd.f32 %v253_v8, %v244_v3  ;;  %v255_v17 = vadd.f32 %v253_v8, %v245_v4  ;;  %v222_v18 = vadd.f32 %v221_v9, %v212_v5  ;;  %v223_v19 = vadd.f32 %v221_v9, %v213_v6 }
  0x97   : > { %v1491_v7 = vcvt.s32.f32 %v317_v54  ;;  %v1493_v8 = vcvt.s32.f32 %v316_v55  ;;  %v1495_v9 = vcvt.s32.f32 %v315_v56  ;;  %v1559_v55 = vadd.s32 200, %v1415_v28 }
  0x98   : > { %v264_v24 = vadd.f32 1.0, %v254_v16  ;;  %v265_v25 = vadd.f32 1.0, %v255_v17  ;;  %v256_v26 = vadd.f32 1.0, %v222_v18  ;;  %v257_v27 = vadd.f32 1.0, %v223_v19 }
  0x99   : > { %v1562_v56 = vadd.s32 192, %v1415_v28 }
  0x9a   : > { %v266_v33 = vmul.f32 16.0, %v264_v24  ;;  %v267_v34 = vmul.f32 16.0, %v265_v25  ;;  %v258_v35 = vmul.f32 16.0, %v256_v26  ;;  %v259_v36 = vmul.f32 16.0, %v257_v27 }
  0x9c   : > { %v1344_v41 = vadd.f32 -1.0, %v266_v33  ;;  %v1345_v42 = vadd.f32 -1.0, %v267_v34  ;;  %v1342_v43 = vadd.f32 -1.0, %v258_v35  ;;  %v1343_v44 = vadd.f32 -1.0, %v259_v36 }
  0x9e   : > { %v270_v49 = vmul.f32 0.5, %v1344_v41  ;;  %v271_v50 = vmul.f32 0.5, %v1345_v42  ;;  %v262_v51 = vmul.f32 0.5, %v1342_v43  ;;  %v263_v52 = vmul.f32 0.5, %v1343_v44 }
  0xa0   : > { %v1469_v57 = vfloor.f32 %v270_v49  ;;  %v1471_v58 = vfloor.f32 %v271_v50  ;;  %v272_v61 = vfloor.f32 %v262_v51  ;;  %v273_v0 = vfloor.f32 %v263_v52 }
  0xa2   : > { %v1483_v3 = vadd.f32 1.0, %v1469_v57  ;;  %v1486_v4 = vadd.f32 1.0, %v1471_v58  ;;  %v284_v5 = vsub.f32 %v270_v49, %v1469_v57  ;;  %v285_v6 = vsub.f32 %v271_v50, %v1471_v58 }
  0xa3   : > { %vm359_vm0 = vcmp.ge.f32.partialorder %v1469_v57, 0.0  ;;  %vm2394_vm1 = vcmp.ge.f32.partialorder %v1471_v58, 0.0  ;;  %vm2392_vm2 = vcmp.lt.f32.partialorder %v1469_v57, 16.0  ;;  %v367_v14 = vmul.f32 16.0, %v1469_v57 }
  0xa4   : > { %v368_v15 = vmul.f32 16.0, %v1471_v58  ;;  %v286_v16 = vsub.f32 1.0, %v284_v5  ;;  %v287_v17 = vsub.f32 1.0, %v285_v6  ;;  %vm2391_vm3 = vcmp.lt.f32.partialorder %v1471_v58, 16.0 }
  0xa5   : > { %vm2393_vm4 = vcmp.ge.f32.partialorder %v1483_v3, 0.0  ;;  %vm2395_vm5 = vcmp.ge.f32.partialorder %v1486_v4, 0.0  ;;  %v575_v18 = vmul.f32 16.0, %v1483_v3  ;;  %v576_v19 = vmul.f32 16.0, %v1486_v4 }
  0xa6   : > { %v276_v22 = vadd.f32 1.0, %v272_v61  ;;  %v1507_v23 = vadd.f32 1.0, %v273_v0  ;;  %v280_v24 = vsub.f32 %v262_v51, %v272_v61  ;;  %v281_v25 = vsub.f32 %v263_v52, %v273_v0 }
  0xa7   : > { %vm353_vm8 = vcmp.ge.f32.partialorder %v272_v61, 0.0  ;;  %vm354_vm9 = vcmp.ge.f32.partialorder %v273_v0, 0.0  ;;  %vm355_vm10 = vcmp.lt.f32.partialorder %v272_v61, 16.0  ;;  %vm356_vm11 = vcmp.lt.f32.partialorder %v273_v0, 16.0 }
  0xa8   : > { %v369_v26 = vadd.f32 %v367_v14, %v272_v61  ;;  %v370_v27 = vadd.f32 %v368_v15, %v273_v0  ;;  %v282_v31 = vsub.f32 1.0, %v280_v24  ;;  %v283_v32 = vsub.f32 1.0, %v281_v25  ;;  %vm1510_vm12 = vmand %vm353_vm8, %vm355_vm10 }
  0xa9   : > { %v577_v34 = vadd.f32 %v575_v18, %v272_v61  ;;  %v578_v35 = vadd.f32 %v576_v19, %v273_v0  ;;  %vm1514_vm13 = vmand %vm354_vm9, %vm356_vm11  ;;  %vm775_vm14 = vcmp.ge.f32.partialorder %v276_v22, 0.0  ;;  %vm776_vm15 = vcmp.ge.f32.partialorder %v1507_v23, 0.0 }
  0xaa   : > { %vm777_vm7 = vcmp.lt.f32.partialorder %v276_v22, 16.0  ;;  %vm778_vm6 = vcmp.lt.f32.partialorder %v1507_v23, 16.0  ;;  %vm361_vm8 = vmand %vm1510_vm12, %vm359_vm0  ;;  %v1524_v39 = vmul.f32 %v286_v16, %v282_v31  ;;  %v1526_v40 = vmul.f32 %v287_v17, %v283_v32 }
  0xab   : > { %v1528_v41 = vmul.f32 %v284_v5, %v282_v31  ;;  %v1530_v42 = vmul.f32 %v285_v6, %v283_v32  ;;  %vm362_vm9 = vmand %vm1514_vm13, %vm2394_vm1  ;;  %v785_v43 = vadd.f32 %v367_v14, %v276_v22  ;;  %v1537_v44 = vadd.f32 %v368_v15, %v1507_v23 }
  0xac   : > { %v1539_v47 = vmul.f32 %v286_v16, %v280_v24  ;;  %v1541_v48 = vmul.f32 %v287_v17, %v281_v25  ;;  %vm365_vm10 = vmand %vm361_vm8, %vm2392_vm2  ;;  %v1545_v49 = vadd.f32 %v575_v18, %v276_v22  ;;  %v1548_v50 = vadd.f32 %v576_v19, %v1507_v23 }
  0xad   : > { %v1550_v51 = vmul.f32 %v284_v5, %v280_v24  ;;  %v1552_v52 = vmul.f32 %v285_v6, %v281_v25  ;;  %vm366_vm11 = vmand %vm362_vm9, %vm2391_vm3  ;;  %v1556_v54 = vsel %vm365_vm10, %v369_v26, -1.0  ;;  %v1565_v61 = vadd.s32 184, %v1415_v28 }
  0xae   : > { %v1567_v0 = vsel %vm366_vm11, %v370_v27, -1.0  ;;  %vm569_vm8 = vmand %vm1510_vm12, %vm2393_vm4  ;;  %vm403_vm9 = vcmp.eq.f32.partialorder %v1424_v62, %v1556_v54  ;;  %vm401_vm10 = vcmp.eq.f32.partialorder %v1426_v63, %v1556_v54  ;;  %vm399_vm3 = vcmp.eq.f32.partialorder %v1430_v10, %v1556_v54 }
  0xaf   : > { %vm570_vm11 = vmand %vm1514_vm13, %vm2395_vm5  ;;  %vm404_vm2 = vcmp.eq.f32.partialorder %v1424_v62, %v1567_v0  ;;  %v469_v5 = vsel %vm403_vm9, %v1524_v39, 0.0  ;;  %vm402_vm12 = vcmp.eq.f32.partialorder %v1426_v63, %v1567_v0  ;;  %v467_v6 = vsel %vm401_vm10, %v1524_v39, 0.0 }
  0xb0   : > { %vm2400_vm4 = vcmp.lt.f32.partialorder %v1483_v3, 16.0  ;;  %v470_v14 = vsel %vm404_vm2, %v1526_v40, 0.0  ;;  %v468_v15 = vsel %vm402_vm12, %v1526_v40, 0.0  ;;  %vm400_vm13 = vcmp.eq.f32.partialorder %v1430_v10, %v1567_v0 }
  0xb1   : > { %vm573_vm1 = vmand %vm569_vm8, %vm2400_vm4  ;;  %v465_v16 = vsel %vm399_vm3, %v1524_v39, 0.0  ;;  %vm2401_vm5 = vcmp.lt.f32.partialorder %v1486_v4, 16.0  ;;  %v466_v18 = vsel %vm400_vm13, %v1526_v40, 0.0  ;;  %vm398_vm10 = vcmp.eq.f32.partialorder %v1432_v11, %v1567_v0 }
  0xb2   : > { %vm574_vm9 = vmand %vm570_vm11, %vm2401_vm5  ;;  %v1598_v17 = vsel %vm573_vm1, %v577_v34, -1.0  ;;  %vm397_vm2 = vcmp.eq.f32.partialorder %v1432_v11, %v1556_v54 }
  0xb3   : > { %v1605_v19 = vsel %vm574_vm9, %v578_v35, -1.0  ;;  %vm1609_vm4 = vmand %vm775_vm14, %vm777_vm7  ;;  %vm611_vm1 = vcmp.eq.f32.partialorder %v1424_v62, %v1598_v17  ;;  %vm609_vm3 = vcmp.eq.f32.partialorder %v1426_v63, %v1598_v17  ;;  %vm607_vm5 = vcmp.eq.f32.partialorder %v1430_v10, %v1598_v17 }
  0xb4   : > { %vm1623_vm8 = vmand %vm776_vm15, %vm778_vm6  ;;  %vm612_vm7 = vcmp.eq.f32.partialorder %v1424_v62, %v1605_v19  ;;  %v677_v22 = vsel %vm611_vm1, %v1528_v41, 0.0  ;;  %vm610_vm14 = vcmp.eq.f32.partialorder %v1426_v63, %v1605_v19  ;;  %v675_v26 = vsel %vm609_vm3, %v1528_v41, 0.0 }
  0xb5   : > { %vm781_vm11 = vmand %vm1609_vm4, %vm359_vm0  ;;  %v678_v23 = vsel %vm612_vm7, %v1530_v42, 0.0  ;;  %v741_v27 = vadd.f32 %v677_v22, %v469_v5  ;;  %v676_v31 = vsel %vm610_vm14, %v1530_v42, 0.0  ;;  %v739_v32 = vadd.f32 %v675_v26, %v467_v6 }
  0xb6   : > { %vm2406_vm6 = vcmp.ge.f32.partialorder %v1471_v58, 0.0  ;;  %v742_v33 = vadd.f32 %v678_v23, %v470_v14  ;;  %v740_v34 = vadd.f32 %v676_v31, %v468_v15  ;;  %vm608_vm12 = vcmp.eq.f32.partialorder %v1430_v10, %v1605_v19 }
  0xb7   : > { %vm782_vm15 = vmand %vm1623_vm8, %vm2406_vm6  ;;  %v673_v35 = vsel %vm607_vm5, %v1528_v41, 0.0  ;;  %vm2407_vm0 = vcmp.lt.f32.partialorder %v1469_v57, 16.0  ;;  %v674_v36 = vsel %vm608_vm12, %v1530_v42, 0.0  ;;  %v464_v6 = vsel %vm398_vm10, %v1526_v40, 0.0 }
  0xb8   : > { %vm783_vm13 = vmand %vm781_vm11, %vm2407_vm0  ;;  %v737_v5 = vadd.f32 %v673_v35, %v465_v16  ;;  %vm606_vm9 = vcmp.eq.f32.partialorder %v1432_v11, %v1605_v19  ;;  %vm2408_vm1 = vcmp.lt.f32.partialorder %v1471_v58, 16.0  ;;  %v738_v15 = vadd.f32 %v674_v36, %v466_v18 }
  0xb9   : > { %vm784_vm3 = vmand %vm782_vm15, %vm2408_vm1  ;;  %v1657_v14 = vsel %vm783_vm13, %v785_v43, -1.0  ;;  %v672_v57 = vsel %vm606_vm9, %v1530_v42, 0.0  ;;  %v463_v16 = vsel %vm397_vm2, %v1524_v39, 0.0  ;;  %vm2409_vm10 = vcmp.ge.f32.partialorder %v1483_v3, 0.0 }
  0xba   : > { %v1665_v22 = vsel %vm784_vm3, %v1537_v44, -1.0  ;;  %vm983_vm5 = vmand %vm1609_vm4, %vm2409_vm10  ;;  %vm819_vm7 = vcmp.eq.f32.partialorder %v1424_v62, %v1657_v14  ;;  %vm817_vm14 = vcmp.eq.f32.partialorder %v1426_v63, %v1657_v14  ;;  %vm815_vm11 = vcmp.eq.f32.partialorder %v1430_v10, %v1657_v14 }
  0xbb   : > { %vm2410_vm6 = vcmp.ge.f32.partialorder %v1486_v4, 0.0  ;;  %vm820_vm15 = vcmp.eq.f32.partialorder %v1424_v62, %v1665_v22  ;;  %v885_v58 = vsel %vm819_vm7, %v1539_v47, 0.0  ;;  %vm818_vm4 = vcmp.eq.f32.partialorder %v1426_v63, %v1665_v22 }
  0xbc   : > { %vm984_vm2 = vmand %vm1623_vm8, %vm2410_vm6  ;;  %v883_v43 = vsel %vm817_vm14, %v1539_v47, 0.0  ;;  %vm2411_vm12 = vcmp.lt.f32.partialorder %v1483_v3, 16.0  ;;  %v886_v44 = vsel %vm820_vm15, %v1541_v48, 0.0  ;;  %v949_v18 = vadd.f32 %v885_v58, %v741_v27 }
  0xbd   : > { %vm985_vm0 = vmand %vm983_vm5, %vm2411_vm12  ;;  %v884_v24 = vsel %vm818_vm4, %v1541_v48, 0.0  ;;  %v947_v25 = vadd.f32 %v883_v43, %v739_v32  ;;  %vm2412_vm8 = vcmp.lt.f32.partialorder %v1486_v4, 16.0  ;;  %v950_v23 = vadd.f32 %v886_v44, %v742_v33 }
  0xbe   : > { %vm986_vm13 = vmand %vm984_vm2, %vm2412_vm8  ;;  %v1694_v26 = vsel %vm985_vm0, %v1545_v49, -1.0  ;;  %v948_v31 = vadd.f32 %v884_v24, %v740_v34  ;;  %vm816_vm9 = vcmp.eq.f32.partialorder %v1430_v10, %v1665_v22  ;;  %v736_v43 = vadd.f32 %v672_v57, %v464_v6 }
  0xbf   : > { %v1699_v3 = vsel %vm986_vm13, %v1548_v50, -1.0  ;;  %vm1021_vm1 = vcmp.eq.f32.partialorder %v1424_v62, %v1694_v26  ;;  %vm1019_vm3 = vcmp.eq.f32.partialorder %v1426_v63, %v1694_v26  ;;  %v882_v4 = vsel %vm816_vm9, %v1541_v48, 0.0 }
  0xc0   : > { %vm1022_vm10 = vcmp.eq.f32.partialorder %v1424_v62, %v1699_v3  ;;  %v1087_v49 = vsel %vm1021_vm1, %v1550_v51, 0.0  ;;  %vm1020_vm5 = vcmp.eq.f32.partialorder %v1426_v63, %v1699_v3  ;;  %v1085_v27 = vsel %vm1019_vm3, %v1550_v51, 0.0 }
  0xc1   : > { %v1088_v50 = vsel %vm1022_vm10, %v1552_v52, 0.0  ;;  %v1151_v32 = vadd.f32 %v1087_v49, %v949_v18  ;;  %v1086_v33 = vsel %vm1020_vm5, %v1552_v52, 0.0  ;;  %v1149_v34 = vadd.f32 %v1085_v27, %v947_v25 }
  0xc2   : > { %v1152_v35 = vadd.f32 %v1088_v50, %v950_v23  ;;  %v1150_v36 = vadd.f32 %v1086_v33, %v948_v31  ;;  %v946_v58 = vadd.f32 %v882_v4, %v738_v15  ;;  %vm1018_vm7 = vcmp.eq.f32.partialorder %v1430_v10, %v1699_v3 }
  0xc3   : > { %v1084_v62 = vsel %vm1018_vm7, %v1552_v52, 0.0  ;;  %v881_v63 = vsel %vm815_vm11, %v1539_v47, 0.0  ;;  %vm1017_vm14 = vcmp.eq.f32.partialorder %v1430_v10, %v1694_v26  ;;  %vm814_vm6 = vcmp.eq.f32.partialorder %v1432_v11, %v1665_v22 }
  0xc4   : > { %1189 = vmatprep.subr.mxu0 %v1152_v35  ;;  %v1148_v44 = vadd.f32 %v1084_v62, %v946_v58  ;;  %v945_v18 = vadd.f32 %v881_v63, %v737_v5  ;;  %v1083_v24 = vsel %vm1017_vm14, %v1550_v51, 0.0  ;;  %v880_v15 = vsel %vm814_vm6, %v1541_v48, 0.0 }
  0xc5   : > { %1190 = vmatpush1.msra.mxu0 %v1151_v32  ;;  %vm1016_vm2 = vcmp.eq.f32.partialorder %v1432_v11, %v1699_v3  ;;  %vm605_vm11 = vcmp.eq.f32.partialorder %v1432_v11, %v1598_v17  ;;  %vm813_vm15 = vcmp.eq.f32.partialorder %v1432_v11, %v1657_v14  ;;  %v944_v5 = vadd.f32 %v880_v15, %v736_v43 }
  0xc6   : > { %1191 = vmatprep.subr.mxu0 %v1150_v36  ;;  %v1147_v10 = vadd.f32 %v1083_v24, %v945_v18  ;;  %v1082_v6 = vsel %vm1016_vm2, %v1552_v52, 0.0  ;;  %v671_v57 = vsel %vm605_vm11, %v1528_v41, 0.0  ;;  %v879_v23 = vsel %vm813_vm15, %v1539_v47, 0.0 }
  0xc7   : > { %1192 = vmatpush1.msra.mxu0 %v1149_v34  ;;  %v735_v25 = vadd.f32 %v671_v57, %v463_v16  ;;  %vm1015_vm4 = vcmp.eq.f32.partialorder %v1432_v11, %v1694_v26  ;;  %vm396_vm12 = vcmp.eq.f32.partialorder %v1434_v12, %v1567_v0  ;;  %v1146_v31 = vadd.f32 %v1082_v6, %v944_v5 }
  0xc8   : > { %1193 = vmatprep.subr.mxu0 %v1148_v44  ;;  %v1081_v4 = vsel %vm1015_vm4, %v1550_v51, 0.0  ;;  %v462_v49 = vsel %vm396_vm12, %v1526_v40, 0.0  ;;  %vm604_vm0 = vcmp.eq.f32.partialorder %v1434_v12, %v1605_v19  ;;  %vm812_vm8 = vcmp.eq.f32.partialorder %v1434_v12, %v1665_v22 }
  0xc9   : > { %1194 = vmatpush1.msra.mxu0 %v1147_v10  ;;  %v943_v27 = vadd.f32 %v879_v23, %v735_v25  ;;  %v670_v16 = vsel %vm604_vm0, %v1530_v42, 0.0  ;;  %vm1014_vm13 = vcmp.eq.f32.partialorder %v1434_v12, %v1699_v3  ;;  %v878_v50 = vsel %vm812_vm8, %v1541_v48, 0.0 }
  0xca   : > { %1195 = vmatprep.subr.mxu0 %v1146_v31  ;;  %v734_v11 = vadd.f32 %v670_v16, %v462_v49  ;;  %v1080_v32 = vsel %vm1014_vm13, %v1552_v52, 0.0  ;;  %vm395_vm9 = vcmp.eq.f32.partialorder %v1434_v12, %v1556_v54  ;;  %vm603_vm1 = vcmp.eq.f32.partialorder %v1434_v12, %v1598_v17 }
  0xcb   : > { %v1145_v33 = vadd.f32 %v1081_v4, %v943_v27  ;;  %v461_v34 = vsel %vm395_vm9, %v1524_v39, 0.0  ;;  %vm811_vm3 = vcmp.eq.f32.partialorder %v1434_v12, %v1657_v14  ;;  %v669_v36 = vsel %vm603_vm1, %v1528_v41, 0.0 }
  0xcc   : > { %v942_v35 = vadd.f32 %v878_v50, %v734_v11  ;;  %v877_v58 = vsel %vm811_vm3, %v1539_v47, 0.0  ;;  %vm1013_vm10 = vcmp.eq.f32.partialorder %v1434_v12, %v1694_v26  ;;  %v733_v62 = vadd.f32 %v669_v36, %v461_v34 }
  0xcd   : > { %1196 = vmatpush1.msra.mxu0 %v1145_v33  ;;  %v1079_v63 = vsel %vm1013_vm10, %v1550_v51, 0.0  ;;  %vm394_vm5 = vcmp.eq.f32.partialorder %v1436_v13, %v1567_v0  ;;  %vm602_vm7 = vcmp.eq.f32.partialorder %v1436_v13, %v1605_v19  ;;  %vm810_vm14 = vcmp.eq.f32.partialorder %v1436_v13, %v1665_v22 }
  0xce   : > { %v1144_v43 = vadd.f32 %v1080_v32, %v942_v35  ;;  %v460_v44 = vsel %vm394_vm5, %v1526_v40, 0.0  ;;  %v668_v18 = vsel %vm602_vm7, %v1530_v42, 0.0  ;;  %v941_v24 = vadd.f32 %v877_v58, %v733_v62 }
  0xcf   : > { %v732_v12 = vadd.f32 %v668_v18, %v460_v44  ;;  %v876_v15 = vsel %vm810_vm14, %v1541_v48, 0.0  ;;  %vm1012_vm6 = vcmp.eq.f32.partialorder %v1436_v13, %v1699_v3  ;;  %vm393_vm2 = vcmp.eq.f32.partialorder %v1436_v13, %v1556_v54 }
  0xd0   : > { %1197 = vmatprep.subr.mxu0 %v1144_v43  ;;  %v1078_v10 = vsel %vm1012_vm6, %v1552_v52, 0.0  ;;  %vm601_vm11 = vcmp.eq.f32.partialorder %v1436_v13, %v1598_v17  ;;  %vm809_vm15 = vcmp.eq.f32.partialorder %v1436_v13, %v1657_v14  ;;  %v1143_v5 = vadd.f32 %v1079_v63, %v941_v24 }
  0xd1   : > { %v940_v6 = vadd.f32 %v876_v15, %v732_v12  ;;  %v459_v57 = vsel %vm393_vm2, %v1524_v39, 0.0  ;;  %v667_v25 = vsel %vm601_vm11, %v1528_v41, 0.0  ;;  %v875_v31 = vsel %vm809_vm15, %v1539_v47, 0.0 }
  0xd2   : > { %v731_v23 = vadd.f32 %v667_v25, %v459_v57  ;;  %vm1011_vm4 = vcmp.eq.f32.partialorder %v1436_v13, %v1694_v26  ;;  %vm392_vm12 = vcmp.eq.f32.partialorder %v1440_v20, %v1567_v0  ;;  %1198 = vmatpush1.msra.mxu0 %v1143_v5  ;;  %vm600_vm0 = vcmp.eq.f32.partialorder %v1440_v20, %v1605_v19 }
  0xd3   : > { %v1142_v4 = vadd.f32 %v1078_v10, %v940_v6  ;;  %v1077_v49 = vsel %vm1011_vm4, %v1550_v51, 0.0  ;;  %v458_v27 = vsel %vm392_vm12, %v1526_v40, 0.0  ;;  %v666_v11 = vsel %vm600_vm0, %v1530_v42, 0.0 }
  0xd4   : > { %v939_v16 = vadd.f32 %v875_v31, %v731_v23  ;;  %vm808_vm8 = vcmp.eq.f32.partialorder %v1440_v20, %v1665_v22  ;;  %vm1010_vm13 = vcmp.eq.f32.partialorder %v1440_v20, %v1699_v3  ;;  %v730_v13 = vadd.f32 %v666_v11, %v458_v27 }
  0xd5   : > { %1199 = vmatprep.subr.mxu0 %v1142_v4  ;;  %v874_v50 = vsel %vm808_vm8, %v1541_v48, 0.0  ;;  %v1076_v32 = vsel %vm1010_vm13, %v1552_v52, 0.0  ;;  %vm391_vm9 = vcmp.eq.f32.partialorder %v1440_v20, %v1556_v54  ;;  %vm599_vm1 = vcmp.eq.f32.partialorder %v1440_v20, %v1598_v17 }
  0xd6   : > { %v1141_v33 = vadd.f32 %v1077_v49, %v939_v16  ;;  %v457_v34 = vsel %vm391_vm9, %v1524_v39, 0.0  ;;  %vm807_vm3 = vcmp.eq.f32.partialorder %v1440_v20, %v1657_v14  ;;  %v938_v35 = vadd.f32 %v874_v50, %v730_v13 }
  0xd7   : > { %v665_v36 = vsel %vm599_vm1, %v1528_v41, 0.0  ;;  %v873_v58 = vsel %vm807_vm3, %v1539_v47, 0.0  ;;  %vm1009_vm10 = vcmp.eq.f32.partialorder %v1440_v20, %v1694_v26  ;;  %vm390_vm5 = vcmp.eq.f32.partialorder %v1442_v21, %v1567_v0 }
  0xd8   : > { %1200 = vmatpush1.msra.mxu0 %v1141_v33  ;;  %v729_v62 = vadd.f32 %v665_v36, %v457_v34  ;;  %v1075_v63 = vsel %vm1009_vm10, %v1550_v51, 0.0  ;;  %vm598_vm7 = vcmp.eq.f32.partialorder %v1442_v21, %v1605_v19  ;;  %v1140_v43 = vadd.f32 %v1076_v32, %v938_v35 }
  0xd9   : > { %v456_v44 = vsel %vm390_vm5, %v1526_v40, 0.0  ;;  %v664_v18 = vsel %vm598_vm7, %v1530_v42, 0.0  ;;  %vm806_vm14 = vcmp.eq.f32.partialorder %v1442_v21, %v1665_v22  ;;  %vm1008_vm6 = vcmp.eq.f32.partialorder %v1442_v21, %v1699_v3 }
  0xda   : > { %v937_v24 = vadd.f32 %v873_v58, %v729_v62  ;;  %v728_v20 = vadd.f32 %v664_v18, %v456_v44  ;;  %v872_v12 = vsel %vm806_vm14, %v1541_v48, 0.0  ;;  %1201 = vmatprep.subr.mxu0 %v1140_v43  ;;  %v1074_v15 = vsel %vm1008_vm6, %v1552_v52, 0.0 }
  0xdb   : > { %vm389_vm2 = vcmp.eq.f32.partialorder %v1442_v21, %v1556_v54  ;;  %vm597_vm11 = vcmp.eq.f32.partialorder %v1442_v21, %v1598_v17  ;;  %vm805_vm15 = vcmp.eq.f32.partialorder %v1442_v21, %v1657_v14  ;;  %vm1007_vm4 = vcmp.eq.f32.partialorder %v1442_v21, %v1694_v26 }
  0xdc   : > { %v1139_v10 = vadd.f32 %v1075_v63, %v937_v24  ;;  %v936_v5 = vadd.f32 %v872_v12, %v728_v20  ;;  %v455_v6 = vsel %vm389_vm2, %v1524_v39, 0.0  ;;  %v663_v57 = vsel %vm597_vm11, %v1528_v41, 0.0 }
  0xdd   : > { %v727_v25 = vadd.f32 %v663_v57, %v455_v6  ;;  %v871_v23 = vsel %vm805_vm15, %v1539_v47, 0.0  ;;  %vm388_vm12 = vcmp.eq.f32.partialorder %v1446_v29, %v1567_v0  ;;  %v1073_v4 = vsel %vm1007_vm4, %v1550_v51, 0.0 }
  0xde   : > { %1202 = vmatpush1.msra.mxu0 %v1139_v10  ;;  %v1138_v31 = vadd.f32 %v1074_v15, %v936_v5  ;;  %v454_v49 = vsel %vm388_vm12, %v1526_v40, 0.0  ;;  %vm596_vm0 = vcmp.eq.f32.partialorder %v1446_v29, %v1605_v19  ;;  %vm804_vm8 = vcmp.eq.f32.partialorder %v1446_v29, %v1665_v22 }
  0xdf   : > { %v935_v27 = vadd.f32 %v871_v23, %v727_v25  ;;  %v662_v16 = vsel %vm596_vm0, %v1530_v42, 0.0  ;;  %vm1006_vm13 = vcmp.eq.f32.partialorder %v1446_v29, %v1699_v3  ;;  %v870_v11 = vsel %vm804_vm8, %v1541_v48, 0.0 }
  0xe0   : > { %1203 = vmatprep.subr.mxu0 %v1138_v31  ;;  %v726_v21 = vadd.f32 %v662_v16, %v454_v49  ;;  %v1072_v13 = vsel %vm1006_vm13, %v1552_v52, 0.0  ;;  %vm387_vm9 = vcmp.eq.f32.partialorder %v1446_v29, %v1556_v54  ;;  %vm595_vm1 = vcmp.eq.f32.partialorder %v1446_v29, %v1598_v17 }
  0xe1   : > { %v1137_v50 = vadd.f32 %v1073_v4, %v935_v27  ;;  %v453_v32 = vsel %vm387_vm9, %v1524_v39, 0.0  ;;  %vm803_vm3 = vcmp.eq.f32.partialorder %v1446_v29, %v1657_v14  ;;  %v661_v34 = vsel %vm595_vm1, %v1528_v41, 0.0 }
  0xe2   : > { %v934_v33 = vadd.f32 %v870_v11, %v726_v21  ;;  %v869_v35 = vsel %vm803_vm3, %v1539_v47, 0.0  ;;  %vm1005_vm10 = vcmp.eq.f32.partialorder %v1446_v29, %v1694_v26  ;;  %v725_v36 = vadd.f32 %v661_v34, %v453_v32 }
  0xe3   : > { %1204 = vmatpush1.msra.mxu0 %v1137_v50  ;;  %v1071_v58 = vsel %vm1005_vm10, %v1550_v51, 0.0  ;;  %vm386_vm5 = vcmp.eq.f32.partialorder %v1448_v30, %v1567_v0  ;;  %vm594_vm7 = vcmp.eq.f32.partialorder %v1448_v30, %v1605_v19  ;;  %vm802_vm14 = vcmp.eq.f32.partialorder %v1448_v30, %v1665_v22 }
  0xe4   : > { %v1136_v62 = vadd.f32 %v1072_v13, %v934_v33  ;;  %v452_v63 = vsel %vm386_vm5, %v1526_v40, 0.0  ;;  %v660_v43 = vsel %vm594_vm7, %v1530_v42, 0.0  ;;  %v933_v44 = vadd.f32 %v869_v35, %v725_v36 }
  0xe5   : > { %v724_v29 = vadd.f32 %v660_v43, %v452_v63  ;;  %v868_v18 = vsel %vm802_vm14, %v1541_v48, 0.0  ;;  %vm1004_vm6 = vcmp.eq.f32.partialorder %v1448_v30, %v1699_v3  ;;  %vm385_vm2 = vcmp.eq.f32.partialorder %v1448_v30, %v1556_v54 }
  0xe6   : > { %1205 = vmatprep.subr.mxu0 %v1136_v62  ;;  %v1070_v24 = vsel %vm1004_vm6, %v1552_v52, 0.0  ;;  %vm593_vm11 = vcmp.eq.f32.partialorder %v1448_v30, %v1598_v17  ;;  %vm801_vm15 = vcmp.eq.f32.partialorder %v1448_v30, %v1657_v14  ;;  %v1135_v20 = vadd.f32 %v1071_v58, %v933_v44 }
  0xe7   : > { %v932_v12 = vadd.f32 %v868_v18, %v724_v29  ;;  %v451_v15 = vsel %vm385_vm2, %v1524_v39, 0.0  ;;  %v659_v10 = vsel %vm593_vm11, %v1528_v41, 0.0  ;;  %v867_v6 = vsel %vm801_vm15, %v1539_v47, 0.0 }
  0xe8   : > { %v723_v5 = vadd.f32 %v659_v10, %v451_v15  ;;  %vm1003_vm4 = vcmp.eq.f32.partialorder %v1448_v30, %v1694_v26  ;;  %vm384_vm12 = vcmp.eq.f32.partialorder %v1452_v37, %v1567_v0  ;;  %1206 = vmatpush1.msra.mxu0 %v1135_v20  ;;  %vm592_vm0 = vcmp.eq.f32.partialorder %v1452_v37, %v1605_v19 }
  0xe9   : > { %v1134_v57 = vadd.f32 %v1070_v24, %v932_v12  ;;  %v1069_v25 = vsel %vm1003_vm4, %v1550_v51, 0.0  ;;  %v450_v23 = vsel %vm384_vm12, %v1526_v40, 0.0  ;;  %v658_v4 = vsel %vm592_vm0, %v1530_v42, 0.0 }
  0xea   : > { %v931_v31 = vadd.f32 %v867_v6, %v723_v5  ;;  %vm800_vm8 = vcmp.eq.f32.partialorder %v1452_v37, %v1665_v22  ;;  %vm1002_vm13 = vcmp.eq.f32.partialorder %v1452_v37, %v1699_v3  ;;  %v722_v30 = vadd.f32 %v658_v4, %v450_v23 }
  0xeb   : > { %1207 = vmatprep.subr.mxu0 %v1134_v57  ;;  %v866_v49 = vsel %vm800_vm8, %v1541_v48, 0.0  ;;  %v1068_v27 = vsel %vm1002_vm13, %v1552_v52, 0.0  ;;  %vm383_vm9 = vcmp.eq.f32.partialorder %v1452_v37, %v1556_v54  ;;  %vm591_vm1 = vcmp.eq.f32.partialorder %v1452_v37, %v1598_v17 }
  0xec   : > { %v1133_v16 = vadd.f32 %v1069_v25, %v931_v31  ;;  %v449_v21 = vsel %vm383_vm9, %v1524_v39, 0.0  ;;  %vm799_vm3 = vcmp.eq.f32.partialorder %v1452_v37, %v1657_v14  ;;  %v930_v11 = vadd.f32 %v866_v49, %v722_v30 }
  0xed   : > { %v657_v13 = vsel %vm591_vm1, %v1528_v41, 0.0  ;;  %v865_v50 = vsel %vm799_vm3, %v1539_v47, 0.0  ;;  %vm1001_vm10 = vcmp.eq.f32.partialorder %v1452_v37, %v1694_v26  ;;  %vm382_vm5 = vcmp.eq.f32.partialorder %v1454_v38, %v1567_v0 }
  0xee   : > { %1208 = vmatpush1.msra.mxu0 %v1133_v16  ;;  %v721_v32 = vadd.f32 %v657_v13, %v449_v21  ;;  %v1067_v33 = vsel %vm1001_vm10, %v1550_v51, 0.0  ;;  %vm590_vm7 = vcmp.eq.f32.partialorder %v1454_v38, %v1605_v19  ;;  %v1132_v34 = vadd.f32 %v1068_v27, %v930_v11 }
  0xef   : > { %v448_v35 = vsel %vm382_vm5, %v1526_v40, 0.0  ;;  %v656_v36 = vsel %vm590_vm7, %v1530_v42, 0.0  ;;  %vm798_vm14 = vcmp.eq.f32.partialorder %v1454_v38, %v1665_v22  ;;  %vm1000_vm6 = vcmp.eq.f32.partialorder %v1454_v38, %v1699_v3 }
  0xf0   : > { %v929_v58 = vadd.f32 %v865_v50, %v721_v32  ;;  %v720_v37 = vadd.f32 %v656_v36, %v448_v35  ;;  %v864_v62 = vsel %vm798_vm14, %v1541_v48, 0.0  ;;  %1209 = vmatprep.subr.mxu0 %v1132_v34  ;;  %v1066_v63 = vsel %vm1000_vm6, %v1552_v52, 0.0 }
  0xf1   : > { %vm381_vm2 = vcmp.eq.f32.partialorder %v1454_v38, %v1556_v54  ;;  %vm589_vm11 = vcmp.eq.f32.partialorder %v1454_v38, %v1598_v17  ;;  %vm797_vm15 = vcmp.eq.f32.partialorder %v1454_v38, %v1657_v14  ;;  %vm999_vm4 = vcmp.eq.f32.partialorder %v1454_v38, %v1694_v26 }
  0xf2   : > { %v1131_v43 = vadd.f32 %v1067_v33, %v929_v58  ;;  %v928_v44 = vadd.f32 %v864_v62, %v720_v37  ;;  %v447_v29 = vsel %vm381_vm2, %v1524_v39, 0.0  ;;  %v655_v18 = vsel %vm589_vm11, %v1528_v41, 0.0 }
  0xf3   : > { %v719_v24 = vadd.f32 %v655_v18, %v447_v29  ;;  %v863_v20 = vsel %vm797_vm15, %v1539_v47, 0.0  ;;  %vm380_vm12 = vcmp.eq.f32.partialorder %v1458_v45, %v1567_v0  ;;  %v1065_v15 = vsel %vm999_vm4, %v1550_v51, 0.0 }
  0xf4   : > { %1210 = vmatpush1.msra.mxu0 %v1131_v43  ;;  %v1130_v12 = vadd.f32 %v1066_v63, %v928_v44  ;;  %v446_v10 = vsel %vm380_vm12, %v1526_v40, 0.0  ;;  %vm588_vm0 = vcmp.eq.f32.partialorder %v1458_v45, %v1605_v19  ;;  %vm796_vm8 = vcmp.eq.f32.partialorder %v1458_v45, %v1665_v22 }
  0xf5   : > { %v927_v5 = vadd.f32 %v863_v20, %v719_v24  ;;  %v654_v6 = vsel %vm588_vm0, %v1530_v42, 0.0  ;;  %vm998_vm13 = vcmp.eq.f32.partialorder %v1458_v45, %v1699_v3  ;;  %v862_v57 = vsel %vm796_vm8, %v1541_v48, 0.0 }
  0xf6   : > { %1211 = vmatprep.subr.mxu0 %v1130_v12  ;;  %v718_v38 = vadd.f32 %v654_v6, %v446_v10  ;;  %v1064_v25 = vsel %vm998_vm13, %v1552_v52, 0.0  ;;  %vm379_vm9 = vcmp.eq.f32.partialorder %v1458_v45, %v1556_v54  ;;  %vm587_vm1 = vcmp.eq.f32.partialorder %v1458_v45, %v1598_v17 }
  0xf7   : > { %v1129_v23 = vadd.f32 %v1065_v15, %v927_v5  ;;  %v445_v31 = vsel %vm379_vm9, %v1524_v39, 0.0  ;;  %vm795_vm3 = vcmp.eq.f32.partialorder %v1458_v45, %v1657_v14  ;;  %v653_v30 = vsel %vm587_vm1, %v1528_v41, 0.0 }
  0xf8   : > { %v926_v4 = vadd.f32 %v862_v57, %v718_v38  ;;  %v861_v49 = vsel %vm795_vm3, %v1539_v47, 0.0  ;;  %vm997_vm10 = vcmp.eq.f32.partialorder %v1458_v45, %v1694_v26  ;;  %v717_v27 = vadd.f32 %v653_v30, %v445_v31 }
  0xf9   : > { %1212 = vmatpush1.msra.mxu0 %v1129_v23  ;;  %v1063_v16 = vsel %vm997_vm10, %v1550_v51, 0.0  ;;  %vm378_vm5 = vcmp.eq.f32.partialorder %v1460_v46, %v1567_v0  ;;  %vm586_vm7 = vcmp.eq.f32.partialorder %v1460_v46, %v1605_v19  ;;  %vm794_vm14 = vcmp.eq.f32.partialorder %v1460_v46, %v1665_v22 }
  0xfa   : > { %v1128_v21 = vadd.f32 %v1064_v25, %v926_v4  ;;  %v444_v11 = vsel %vm378_vm5, %v1526_v40, 0.0  ;;  %v652_v13 = vsel %vm586_vm7, %v1530_v42, 0.0  ;;  %v925_v50 = vadd.f32 %v861_v49, %v717_v27 }
  0xfb   : > { %v716_v45 = vadd.f32 %v652_v13, %v444_v11  ;;  %v860_v32 = vsel %vm794_vm14, %v1541_v48, 0.0  ;;  %vm996_vm6 = vcmp.eq.f32.partialorder %v1460_v46, %v1699_v3  ;;  %vm377_vm2 = vcmp.eq.f32.partialorder %v1460_v46, %v1556_v54 }
  0xfc   : > { %1213 = vmatprep.subr.mxu0 %v1128_v21  ;;  %v1062_v33 = vsel %vm996_vm6, %v1552_v52, 0.0  ;;  %vm585_vm11 = vcmp.eq.f32.partialorder %v1460_v46, %v1598_v17  ;;  %vm793_vm15 = vcmp.eq.f32.partialorder %v1460_v46, %v1657_v14  ;;  %v1127_v34 = vadd.f32 %v1063_v16, %v925_v50 }
  0xfd   : > { %v924_v35 = vadd.f32 %v860_v32, %v716_v45  ;;  %v443_v36 = vsel %vm377_vm2, %v1524_v39, 0.0  ;;  %v651_v58 = vsel %vm585_vm11, %v1528_v41, 0.0  ;;  %v859_v62 = vsel %vm793_vm15, %v1539_v47, 0.0 }
  0xfe   : > { %v715_v37 = vadd.f32 %v651_v58, %v443_v36  ;;  %vm995_vm4 = vcmp.eq.f32.partialorder %v1460_v46, %v1694_v26  ;;  %vm376_vm12 = vcmp.eq.f32.partialorder %v1464_v53, %v1567_v0  ;;  %1214 = vmatpush1.msra.mxu0 %v1127_v34  ;;  %vm584_vm0 = vcmp.eq.f32.partialorder %v1464_v53, %v1605_v19 }
  0xff   : > { %v1126_v63 = vadd.f32 %v1062_v33, %v924_v35  ;;  %v1061_v43 = vsel %vm995_vm4, %v1550_v51, 0.0  ;;  %v442_v44 = vsel %vm376_vm12, %v1526_v40, 0.0  ;;  %v650_v18 = vsel %vm584_vm0, %v1530_v42, 0.0 }
 0x100   : > { %v923_v29 = vadd.f32 %v859_v62, %v715_v37  ;;  %vm792_vm8 = vcmp.eq.f32.partialorder %v1464_v53, %v1665_v22  ;;  %vm994_vm13 = vcmp.eq.f32.partialorder %v1464_v53, %v1699_v3  ;;  %v714_v46 = vadd.f32 %v650_v18, %v442_v44 }
 0x101   : > { %1215 = vmatprep.subr.mxu0 %v1126_v63  ;;  %v858_v24 = vsel %vm792_vm8, %v1541_v48, 0.0  ;;  %v1060_v20 = vsel %vm994_vm13, %v1552_v52, 0.0  ;;  %vm375_vm9 = vcmp.eq.f32.partialorder %v1464_v53, %v1556_v54  ;;  %vm583_vm1 = vcmp.eq.f32.partialorder %v1464_v53, %v1598_v17 }
 0x102   : > { %v1125_v12 = vadd.f32 %v1061_v43, %v923_v29  ;;  %v441_v15 = vsel %vm375_vm9, %v1524_v39, 0.0  ;;  %vm791_vm3 = vcmp.eq.f32.partialorder %v1464_v53, %v1657_v14  ;;  %v922_v10 = vadd.f32 %v858_v24, %v714_v46 }
 0x103   : > { %v649_v5 = vsel %vm583_vm1, %v1528_v41, 0.0  ;;  %v857_v6 = vsel %vm791_vm3, %v1539_v47, 0.0  ;;  %vm993_vm10 = vcmp.eq.f32.partialorder %v1464_v53, %v1694_v26  ;;  %vm374_vm5 = vcmp.eq.f32.partialorder %v1474_v59, %v1567_v0 }
 0x104   : > { %1216 = vmatpush1.msra.mxu0 %v1125_v12  ;;  %v713_v38 = vadd.f32 %v649_v5, %v441_v15  ;;  %v1059_v57 = vsel %vm993_vm10, %v1550_v51, 0.0  ;;  %vm582_vm7 = vcmp.eq.f32.partialorder %v1474_v59, %v1605_v19  ;;  %v1124_v25 = vadd.f32 %v1060_v20, %v922_v10 }
 0x105   : > { %v440_v23 = vsel %vm374_vm5, %v1526_v40, 0.0  ;;  %v648_v31 = vsel %vm582_vm7, %v1530_v42, 0.0  ;;  %vm790_vm14 = vcmp.eq.f32.partialorder %v1474_v59, %v1665_v22  ;;  %vm992_vm6 = vcmp.eq.f32.partialorder %v1474_v59, %v1699_v3 }
 0x106   : > { %v921_v4 = vadd.f32 %v857_v6, %v713_v38  ;;  %v712_v53 = vadd.f32 %v648_v31, %v440_v23  ;;  %v856_v30 = vsel %vm790_vm14, %v1541_v48, 0.0  ;;  %1217 = vmatprep.subr.mxu0 %v1124_v25  ;;  %v1058_v49 = vsel %vm992_vm6, %v1552_v52, 0.0 }
 0x107   : > { %vm373_vm2 = vcmp.eq.f32.partialorder %v1474_v59, %v1556_v54  ;;  %vm581_vm11 = vcmp.eq.f32.partialorder %v1474_v59, %v1598_v17  ;;  %vm789_vm15 = vcmp.eq.f32.partialorder %v1474_v59, %v1657_v14  ;;  %vm991_vm4 = vcmp.eq.f32.partialorder %v1474_v59, %v1694_v26 }
 0x108   : > { %v1123_v27 = vadd.f32 %v1059_v57, %v921_v4  ;;  %v920_v16 = vadd.f32 %v856_v30, %v712_v53  ;;  %v439_v21 = vsel %vm373_vm2, %v1524_v39, 0.0  ;;  %v647_v11 = vsel %vm581_vm11, %v1528_v41, 0.0 }
 0x109   : > { %v711_v13 = vadd.f32 %v647_v11, %v439_v21  ;;  %v855_v50 = vsel %vm789_vm15, %v1539_v47, 0.0  ;;  %vm436_vm12 = vcmp.eq.f32.partialorder %v1476_v60, %v1567_v0  ;;  %v1057_v32 = vsel %vm991_vm4, %v1550_v51, 0.0 }
 0x10a   : > { %1218 = vmatpush1.msra.mxu0 %v1123_v27  ;;  %v1122_v45 = vadd.f32 %v1058_v49, %v920_v16  ;;  %v502_v33 = vsel %vm436_vm12, %v1526_v40, 0.0  ;;  %vm644_vm0 = vcmp.eq.f32.partialorder %v1476_v60, %v1605_v19  ;;  %vm852_vm8 = vcmp.eq.f32.partialorder %v1476_v60, %v1665_v22 }
 0x10b   : > { %v919_v34 = vadd.f32 %v855_v50, %v711_v13  ;;  %v710_v35 = vsel %vm644_vm0, %v1530_v42, 0.0  ;;  %vm1054_vm13 = vcmp.eq.f32.partialorder %v1476_v60, %v1699_v3  ;;  %v918_v36 = vsel %vm852_vm8, %v1541_v48, 0.0 }
 0x10c   : > { %1219 = vmatprep.subr.mxu0 %v1122_v45  ;;  %v774_v59 = vadd.f32 %v710_v35, %v502_v33  ;;  %v1120_v58 = vsel %vm1054_vm13, %v1552_v52, 0.0  ;;  %vm435_vm9 = vcmp.eq.f32.partialorder %v1476_v60, %v1556_v54  ;;  %vm643_vm1 = vcmp.eq.f32.partialorder %v1476_v60, %v1598_v17 }
 0x10d   : > { %v1121_v37 = vadd.f32 %v1057_v32, %v919_v34  ;;  %v501_v62 = vsel %vm435_vm9, %v1524_v39, 0.0  ;;  %vm851_vm3 = vcmp.eq.f32.partialorder %v1476_v60, %v1657_v14  ;;  %v709_v43 = vsel %vm643_vm1, %v1528_v41, 0.0 }
 0x10e   : > { %v982_v63 = vadd.f32 %v918_v36, %v774_v59  ;;  %v917_v44 = vsel %vm851_vm3, %v1539_v47, 0.0  ;;  %vm1053_vm10 = vcmp.eq.f32.partialorder %v1476_v60, %v1694_v26  ;;  %v773_v29 = vadd.f32 %v709_v43, %v501_v62 }
 0x10f   : > { %1220 = vmatpush1.msra.mxu0 %v1121_v37  ;;  %v1119_v18 = vsel %vm1053_vm10, %v1550_v51, 0.0  ;;  %vm434_vm5 = vcmp.eq.f32.partialorder %v1478_v1, %v1567_v0  ;;  %vm642_vm7 = vcmp.eq.f32.partialorder %v1478_v1, %v1605_v19  ;;  %vm850_vm14 = vcmp.eq.f32.partialorder %v1478_v1, %v1665_v22 }
 0x110   : > { %v1184_v46 = vadd.f32 %v1120_v58, %v982_v63  ;;  %v500_v24 = vsel %vm434_vm5, %v1526_v40, 0.0  ;;  %v708_v20 = vsel %vm642_vm7, %v1530_v42, 0.0  ;;  %v981_v12 = vadd.f32 %v917_v44, %v773_v29 }
 0x111   : > { %v772_v60 = vadd.f32 %v708_v20, %v500_v24  ;;  %v916_v15 = vsel %vm850_vm14, %v1541_v48, 0.0  ;;  %vm1052_vm6 = vcmp.eq.f32.partialorder %v1478_v1, %v1699_v3  ;;  %vm433_vm2 = vcmp.eq.f32.partialorder %v1478_v1, %v1556_v54 }
 0x112   : > { %1221 = vmatprep.subr.mxu0 %v1184_v46  ;;  %v1118_v10 = vsel %vm1052_vm6, %v1552_v52, 0.0  ;;  %vm641_vm11 = vcmp.eq.f32.partialorder %v1478_v1, %v1598_v17  ;;  %vm849_vm15 = vcmp.eq.f32.partialorder %v1478_v1, %v1657_v14  ;;  %v1183_v5 = vadd.f32 %v1119_v18, %v981_v12 }
 0x113   : > { %v980_v6 = vadd.f32 %v916_v15, %v772_v60  ;;  %v499_v38 = vsel %vm433_vm2, %v1524_v39, 0.0  ;;  %v707_v57 = vsel %vm641_vm11, %v1528_v41, 0.0  ;;  %v915_v23 = vsel %vm849_vm15, %v1539_v47, 0.0 }
 0x114   : > { %v771_v25 = vadd.f32 %v707_v57, %v499_v38  ;;  %vm1051_vm4 = vcmp.eq.f32.partialorder %v1478_v1, %v1694_v26  ;;  %vm432_vm12 = vcmp.eq.f32.partialorder %v1480_v2, %v1567_v0  ;;  %1222 = vmatpush2.msra.mxu0 %v1183_v5  ;;  %vm640_vm0 = vcmp.eq.f32.partialorder %v1480_v2, %v1605_v19 }
 0x115   : > { %v1182_v31 = vadd.f32 %v1118_v10, %v980_v6  ;;  %v1117_v4 = vsel %vm1051_vm4, %v1550_v51, 0.0  ;;  %v498_v53 = vsel %vm432_vm12, %v1526_v40, 0.0  ;;  %v706_v49 = vsel %vm640_vm0, %v1530_v42, 0.0 }
 0x116   : > { %v979_v30 = vadd.f32 %v915_v23, %v771_v25  ;;  %vm848_vm8 = vcmp.eq.f32.partialorder %v1480_v2, %v1665_v22  ;;  %vm1050_vm13 = vcmp.eq.f32.partialorder %v1480_v2, %v1699_v3  ;;  %v770_v1 = vadd.f32 %v706_v49, %v498_v53 }
 0x117   : > { %1223 = vmatprep.subr.mxu0 %v1182_v31  ;;  %v914_v27 = vsel %vm848_vm8, %v1541_v48, 0.0  ;;  %v1116_v16 = vsel %vm1050_vm13, %v1552_v52, 0.0  ;;  %vm431_vm9 = vcmp.eq.f32.partialorder %v1480_v2, %v1556_v54  ;;  %vm639_vm1 = vcmp.eq.f32.partialorder %v1480_v2, %v1598_v17 }
 0x118   : > { %v1181_v21 = vadd.f32 %v1117_v4, %v979_v30  ;;  %v497_v11 = vsel %vm431_vm9, %v1524_v39, 0.0  ;;  %vm847_vm3 = vcmp.eq.f32.partialorder %v1480_v2, %v1657_v14  ;;  %v978_v13 = vadd.f32 %v914_v27, %v770_v1 }
 0x119   : > { %v705_v50 = vsel %vm639_vm1, %v1528_v41, 0.0  ;;  %v913_v45 = vsel %vm847_vm3, %v1539_v47, 0.0  ;;  %vm1049_vm10 = vcmp.eq.f32.partialorder %v1480_v2, %v1694_v26  ;;  %vm430_vm5 = vcmp.eq.f32.partialorder %v1491_v7, %v1567_v0 }
 0x11a   : > { %1224 = vmatpush2.msra.mxu0 %v1181_v21  ;;  %v769_v32 = vadd.f32 %v705_v50, %v497_v11  ;;  %v1115_v33 = vsel %vm1049_vm10, %v1550_v51, 0.0  ;;  %vm638_vm7 = vcmp.eq.f32.partialorder %v1491_v7, %v1605_v19  ;;  %v1180_v34 = vadd.f32 %v1116_v16, %v978_v13 }
 0x11b   : > { %v496_v35 = vsel %vm430_vm5, %v1526_v40, 0.0  ;;  %v704_v59 = vsel %vm638_vm7, %v1530_v42, 0.0  ;;  %vm846_vm14 = vcmp.eq.f32.partialorder %v1491_v7, %v1665_v22  ;;  %vm1048_vm6 = vcmp.eq.f32.partialorder %v1491_v7, %v1699_v3 }
 0x11c   : > { %v977_v36 = vadd.f32 %v913_v45, %v769_v32  ;;  %v768_v2 = vadd.f32 %v704_v59, %v496_v35  ;;  %v912_v58 = vsel %vm846_vm14, %v1541_v48, 0.0  ;;  %1225 = vmatprep.subr.mxu0 %v1180_v34  ;;  %v1114_v37 = vsel %vm1048_vm6, %v1552_v52, 0.0 }
 0x11d   : > { %vm429_vm2 = vcmp.eq.f32.partialorder %v1491_v7, %v1556_v54  ;;  %vm637_vm11 = vcmp.eq.f32.partialorder %v1491_v7, %v1598_v17  ;;  %vm845_vm15 = vcmp.eq.f32.partialorder %v1491_v7, %v1657_v14  ;;  %vm1047_vm4 = vcmp.eq.f32.partialorder %v1491_v7, %v1694_v26 }
 0x11e   : > { %v1179_v62 = vadd.f32 %v1115_v33, %v977_v36  ;;  %v976_v63 = vadd.f32 %v912_v58, %v768_v2  ;;  %v495_v43 = vsel %vm429_vm2, %v1524_v39, 0.0  ;;  %v703_v44 = vsel %vm637_vm11, %v1528_v41, 0.0 }
 0x11f   : > { %v767_v29 = vadd.f32 %v703_v44, %v495_v43  ;;  %v911_v18 = vsel %vm845_vm15, %v1539_v47, 0.0  ;;  %vm428_vm12 = vcmp.eq.f32.partialorder %v1493_v8, %v1567_v0  ;;  %v1113_v24 = vsel %vm1047_vm4, %v1550_v51, 0.0 }
 0x120   : > { %1226 = vmatpush2.msra.mxu0 %v1179_v62  ;;  %v1178_v46 = vadd.f32 %v1114_v37, %v976_v63  ;;  %v494_v20 = vsel %vm428_vm12, %v1526_v40, 0.0  ;;  %vm636_vm0 = vcmp.eq.f32.partialorder %v1493_v8, %v1605_v19  ;;  %vm844_vm8 = vcmp.eq.f32.partialorder %v1493_v8, %v1665_v22 }
 0x121   : > { %v975_v12 = vadd.f32 %v911_v18, %v767_v29  ;;  %v702_v60 = vsel %vm636_vm0, %v1530_v42, 0.0  ;;  %vm1046_vm13 = vcmp.eq.f32.partialorder %v1493_v8, %v1699_v3  ;;  %v910_v15 = vsel %vm844_vm8, %v1541_v48, 0.0 }
 0x122   : > { %1227 = vmatprep.subr.mxu0 %v1178_v46  ;;  %v766_v7 = vadd.f32 %v702_v60, %v494_v20  ;;  %v1112_v10 = vsel %vm1046_vm13, %v1552_v52, 0.0  ;;  %vm427_vm9 = vcmp.eq.f32.partialorder %v1493_v8, %v1556_v54  ;;  %vm635_vm1 = vcmp.eq.f32.partialorder %v1493_v8, %v1598_v17 }
 0x123   : > { %v1177_v5 = vadd.f32 %v1113_v24, %v975_v12  ;;  %v493_v6 = vsel %vm427_vm9, %v1524_v39, 0.0  ;;  %vm843_vm3 = vcmp.eq.f32.partialorder %v1493_v8, %v1657_v14  ;;  %v701_v57 = vsel %vm635_vm1, %v1528_v41, 0.0 }
 0x124   : > { %v974_v38 = vadd.f32 %v910_v15, %v766_v7  ;;  %v909_v25 = vsel %vm843_vm3, %v1539_v47, 0.0  ;;  %vm1045_vm10 = vcmp.eq.f32.partialorder %v1493_v8, %v1694_v26  ;;  %v765_v23 = vadd.f32 %v701_v57, %v493_v6 }
 0x125   : > { %1228 = vmatpush2.msra.mxu0 %v1177_v5  ;;  %v1111_v31 = vsel %vm1045_vm10, %v1550_v51, 0.0  ;;  %vm426_vm5 = vcmp.eq.f32.partialorder %v1495_v9, %v1567_v0  ;;  %vm634_vm7 = vcmp.eq.f32.partialorder %v1495_v9, %v1605_v19  ;;  %vm842_vm14 = vcmp.eq.f32.partialorder %v1495_v9, %v1665_v22 }
 0x126   : > { %v1176_v4 = vadd.f32 %v1112_v10, %v974_v38  ;;  %v492_v53 = vsel %vm426_vm5, %v1526_v40, 0.0  ;;  %v700_v30 = vsel %vm634_vm7, %v1530_v42, 0.0  ;;  %v973_v49 = vadd.f32 %v909_v25, %v765_v23 }
 0x127   : > { %v764_v8 = vadd.f32 %v700_v30, %v492_v53  ;;  %v908_v1 = vsel %vm842_vm14, %v1541_v48, 0.0  ;;  %vm1044_vm6 = vcmp.eq.f32.partialorder %v1495_v9, %v1699_v3  ;;  %vm425_vm2 = vcmp.eq.f32.partialorder %v1495_v9, %v1556_v54 }
 0x128   : > { %1229 = vmatprep.subr.mxu0 %v1176_v4  ;;  %v1110_v27 = vsel %vm1044_vm6, %v1552_v52, 0.0  ;;  %vm633_vm11 = vcmp.eq.f32.partialorder %v1495_v9, %v1598_v17  ;;  %vm841_vm15 = vcmp.eq.f32.partialorder %v1495_v9, %v1657_v14  ;;  %v1175_v16 = vadd.f32 %v1111_v31, %v973_v49 }
 0x129   : > { %v972_v21 = vadd.f32 %v908_v1, %v764_v8  ;;  %v491_v11 = vsel %vm425_vm2, %v1524_v39, 0.0  ;;  %v699_v13 = vsel %vm633_vm11, %v1528_v41, 0.0  ;;  %v907_v45 = vsel %vm841_vm15, %v1539_v47, 0.0 }
 0x12a   : > { %v763_v50 = vadd.f32 %v699_v13, %v491_v11  ;;  %vm1043_vm4 = vcmp.eq.f32.partialorder %v1495_v9, %v1694_v26  ;;  %v346_v32 = vcvt.s32.f32 %v1559_v55  ;;  %1230 = vmatpush2.msra.mxu0 %v1175_v16  ;;  %v345_v35 = vcvt.s32.f32 %v1562_v56 }
 0x12b   : > { %v1174_v33 = vadd.f32 %v1110_v27, %v972_v21  ;;  %v1109_v34 = vsel %vm1043_vm4, %v1550_v51, 0.0  ;;  %v2174_v59 = vcvt.s32.f32 %v1565_v61  ;;  %v311_v13 = vadd.s32 176, %v1415_v28 }
 0x12c   : > { %v971_v36 = vadd.f32 %v907_v45, %v763_v50  ;;  %vm424_vm12 = vcmp.eq.f32.partialorder %v346_v32, %v1567_v0  ;;  %vm632_vm0 = vcmp.eq.f32.partialorder %v346_v32, %v1605_v19  ;;  %vm840_vm8 = vcmp.eq.f32.partialorder %v346_v32, %v1665_v22 }
 0x12d   : > { %1231 = vmatprep.subr.mxu0 %v1174_v33  ;;  %v490_v9 = vsel %vm424_vm12, %v1526_v40, 0.0  ;;  %v698_v55 = vsel %vm632_vm0, %v1530_v42, 0.0  ;;  %v906_v2 = vsel %vm840_vm8, %v1541_v48, 0.0  ;;  %vm1042_vm13 = vcmp.eq.f32.partialorder %v346_v32, %v1699_v3 }
 0x12e   : > { %v1173_v56 = vadd.f32 %v1109_v34, %v971_v36  ;;  %v762_v58 = vadd.f32 %v698_v55, %v490_v9  ;;  %v1108_v61 = vsel %vm1042_vm13, %v1552_v52, 0.0  ;;  %vm423_vm9 = vcmp.eq.f32.partialorder %v346_v32, %v1556_v54 }
 0x12f   : > { %v489_v37 = vsel %vm423_vm9, %v1524_v39, 0.0  ;;  %vm631_vm1 = vcmp.eq.f32.partialorder %v346_v32, %v1598_v17  ;;  %vm839_vm3 = vcmp.eq.f32.partialorder %v346_v32, %v1657_v14  ;;  %vm1041_vm10 = vcmp.eq.f32.partialorder %v346_v32, %v1694_v26 }
 0x130   : > { %1232 = vmatpush2.msra.mxu0 %v1173_v56  ;;  %v970_v62 = vadd.f32 %v906_v2, %v762_v58  ;;  %v697_v63 = vsel %vm631_vm1, %v1528_v41, 0.0  ;;  %v905_v43 = vsel %vm839_vm3, %v1539_v47, 0.0  ;;  %v1107_v44 = vsel %vm1041_vm10, %v1550_v51, 0.0 }
 0x131   : > { %v761_v29 = vadd.f32 %v697_v63, %v489_v37  ;;  %vm422_vm5 = vcmp.eq.f32.partialorder %v345_v35, %v1567_v0  ;;  %vm630_vm7 = vcmp.eq.f32.partialorder %v345_v35, %v1605_v19  ;;  %vm838_vm14 = vcmp.eq.f32.partialorder %v345_v35, %v1665_v22 }
 0x132   : > { %v1172_v18 = vadd.f32 %v1108_v61, %v970_v62  ;;  %v488_v46 = vsel %vm422_vm5, %v1526_v40, 0.0  ;;  %v696_v24 = vsel %vm630_vm7, %v1530_v42, 0.0  ;;  %v904_v20 = vsel %vm838_vm14, %v1541_v48, 0.0 }
 0x133   : > { %v969_v12 = vadd.f32 %v905_v43, %v761_v29  ;;  %v760_v60 = vadd.f32 %v696_v24, %v488_v46  ;;  %vm1040_vm6 = vcmp.eq.f32.partialorder %v345_v35, %v1699_v3  ;;  %vm421_vm2 = vcmp.eq.f32.partialorder %v345_v35, %v1556_v54 }
 0x134   : > { %1233 = vmatprep.subr.mxu0 %v1172_v18  ;;  %v1106_v7 = vsel %vm1040_vm6, %v1552_v52, 0.0  ;;  %v487_v15 = vsel %vm421_vm2, %v1524_v39, 0.0  ;;  %vm629_vm11 = vcmp.eq.f32.partialorder %v345_v35, %v1598_v17  ;;  %vm837_vm15 = vcmp.eq.f32.partialorder %v345_v35, %v1657_v14 }
 0x135   : > { %v1171_v10 = vadd.f32 %v1107_v44, %v969_v12  ;;  %v968_v5 = vadd.f32 %v904_v20, %v760_v60  ;;  %v695_v6 = vsel %vm629_vm11, %v1528_v41, 0.0  ;;  %v903_v38 = vsel %vm837_vm15, %v1539_v47, 0.0 }
 0x136   : > { %v759_v57 = vadd.f32 %v695_v6, %v487_v15  ;;  %vm1039_vm4 = vcmp.eq.f32.partialorder %v345_v35, %v1694_v26  ;;  %vm420_vm12 = vcmp.eq.f32.partialorder %v2174_v59, %v1567_v0  ;;  %vm628_vm0 = vcmp.eq.f32.partialorder %v2174_v59, %v1605_v19 }
 0x137   : > { %1234 = vmatpush2.msra.mxu0 %v1171_v10  ;;  %v1170_v25 = vadd.f32 %v1106_v7, %v968_v5  ;;  %v1105_v23 = vsel %vm1039_vm4, %v1550_v51, 0.0  ;;  %v486_v31 = vsel %vm420_vm12, %v1526_v40, 0.0  ;;  %v694_v4 = vsel %vm628_vm0, %v1530_v42, 0.0 }
 0x138   : > { %v967_v53 = vadd.f32 %v903_v38, %v759_v57  ;;  %v758_v30 = vadd.f32 %v694_v4, %v486_v31  ;;  %vm836_vm8 = vcmp.eq.f32.partialorder %v2174_v59, %v1665_v22  ;;  %vm1038_vm13 = vcmp.eq.f32.partialorder %v2174_v59, %v1699_v3 }
 0x139   : > { %1235 = vmatprep.subr.mxu0 %v1170_v25  ;;  %v902_v49 = vsel %vm836_vm8, %v1541_v48, 0.0  ;;  %v1104_v8 = vsel %vm1038_vm13, %v1552_v52, 0.0  ;;  %vm419_vm9 = vcmp.eq.f32.partialorder %v2174_v59, %v1556_v54  ;;  %vm627_vm1 = vcmp.eq.f32.partialorder %v2174_v59, %v1598_v17 }
 0x13a   : > { %v1169_v1 = vadd.f32 %v1105_v23, %v967_v53  ;;  %v966_v27 = vadd.f32 %v902_v49, %v758_v30  ;;  %v485_v16 = vsel %vm419_vm9, %v1524_v39, 0.0  ;;  %v693_v21 = vsel %vm627_vm1, %v1528_v41, 0.0 }
 0x13b   : > { %v757_v11 = vadd.f32 %v693_v21, %v485_v16  ;;  %vm835_vm3 = vcmp.eq.f32.partialorder %v2174_v59, %v1657_v14  ;;  %vm1037_vm10 = vcmp.eq.f32.partialorder %v2174_v59, %v1694_v26  ;;  %v310_v32 = vadd.s32 168, %v1415_v28 }
 0x13c   : > { %1236 = vmatpush2.msra.mxu0 %v1169_v1  ;;  %v1168_v50 = vadd.f32 %v1104_v8, %v966_v27  ;;  %v901_v45 = vsel %vm835_vm3, %v1539_v47, 0.0  ;;  %v1103_v34 = vsel %vm1037_vm10, %v1550_v51, 0.0  ;;  %v343_v35 = vcvt.s32.f32 %v311_v13 }
 0x13d   : > { %v965_v33 = vadd.f32 %v901_v45, %v757_v11  ;;  %v309_v36 = vadd.s32 160, %v1415_v28  ;;  %v342_v9 = vcvt.s32.f32 %v310_v32  ;;  %v308_v55 = vadd.s32 152, %v1415_v28 }
 0x13e   : > { %1237 = vmatprep.subr.mxu0 %v1168_v50  ;;  %v307_v59 = vadd.s32 144, %v1415_v28  ;;  %v306_v2 = vadd.s32 136, %v1415_v28  ;;  %vm418_vm5 = vcmp.eq.f32.partialorder %v343_v35, %v1567_v0  ;;  %vm626_vm7 = vcmp.eq.f32.partialorder %v343_v35, %v1605_v19 }
 0x13f   : > { %v1167_v56 = vadd.f32 %v1103_v34, %v965_v33  ;;  %vm834_vm14 = vcmp.eq.f32.partialorder %v343_v35, %v1665_v22  ;;  %v484_v58 = vsel %vm418_vm5, %v1526_v40, 0.0  ;;  %v692_v61 = vsel %vm626_vm7, %v1530_v42, 0.0 }
 0x140   : > { %vm1036_vm6 = vcmp.eq.f32.partialorder %v343_v35, %v1699_v3  ;;  %v2245_v37 = vadd.s32 128, %v1415_v28  ;;  %v756_v62 = vadd.f32 %v692_v61, %v484_v58  ;;  %v900_v63 = vsel %vm834_vm14, %v1541_v48, 0.0 }
 0x141   : > { %1238 = vmatpush2.msra.mxu0 %v1167_v56  ;;  %vm417_vm2 = vcmp.eq.f32.partialorder %v343_v35, %v1556_v54  ;;  %vm625_vm11 = vcmp.eq.f32.partialorder %v343_v35, %v1598_v17  ;;  %v1102_v43 = vsel %vm1036_vm6, %v1552_v52, 0.0  ;;  %vm833_vm15 = vcmp.eq.f32.partialorder %v343_v35, %v1657_v14 }
 0x142   : > { %v483_v44 = vsel %vm417_vm2, %v1524_v39, 0.0  ;;  %v691_v29 = vsel %vm625_vm11, %v1528_v41, 0.0  ;;  %v964_v18 = vadd.f32 %v900_v63, %v756_v62  ;;  %v899_v28 = vsel %vm833_vm15, %v1539_v47, 0.0 }
 0x143   : > { %v755_v46 = vadd.f32 %v691_v29, %v483_v44  ;;  %vm1035_vm4 = vcmp.eq.f32.partialorder %v343_v35, %v1694_v26  ;;  %vm416_vm12 = vcmp.eq.f32.partialorder %v342_v9, %v1567_v0  ;;  %vm624_vm0 = vcmp.eq.f32.partialorder %v342_v9, %v1605_v19 }
 0x144   : > { %vm832_vm8 = vcmp.eq.f32.partialorder %v342_v9, %v1665_v22  ;;  %vm1034_vm13 = vcmp.eq.f32.partialorder %v342_v9, %v1699_v3  ;;  %v1166_v24 = vadd.f32 %v1102_v43, %v964_v18  ;;  %v482_v12 = vsel %vm416_vm12, %v1526_v40, 0.0 }
 0x145   : > { %v963_v20 = vadd.f32 %v899_v28, %v755_v46  ;;  %v690_v60 = vsel %vm624_vm0, %v1530_v42, 0.0  ;;  %v1101_v7 = vsel %vm1035_vm4, %v1550_v51, 0.0  ;;  %v898_v10 = vsel %vm832_vm8, %v1541_v48, 0.0 }
 0x146   : > { %v754_v15 = vadd.f32 %v690_v60, %v482_v12  ;;  %vm415_vm9 = vcmp.eq.f32.partialorder %v342_v9, %v1556_v54  ;;  %1239 = vmatprep.subr.mxu0 %v1166_v24  ;;  %v1100_v6 = vsel %vm1034_vm13, %v1552_v52, 0.0  ;;  %vm623_vm1 = vcmp.eq.f32.partialorder %v342_v9, %v1598_v17 }
 0x147   : > { %v1165_v5 = vadd.f32 %v1101_v7, %v963_v20  ;;  %vm831_vm3 = vcmp.eq.f32.partialorder %v342_v9, %v1657_v14  ;;  %v481_v57 = vsel %vm415_vm9, %v1524_v39, 0.0  ;;  %v689_v25 = vsel %vm623_vm1, %v1528_v41, 0.0 }
 0x148   : > { %v962_v38 = vadd.f32 %v898_v10, %v754_v15  ;;  %vm1033_vm10 = vcmp.eq.f32.partialorder %v342_v9, %v1694_v26  ;;  %v753_v23 = vadd.f32 %v689_v25, %v481_v57  ;;  %v897_v31 = vsel %vm831_vm3, %v1539_v47, 0.0 }
 0x149   : > { %1240 = vmatpush2.msra.mxu0 %v1165_v5  ;;  %v1099_v4 = vsel %vm1033_vm10, %v1550_v51, 0.0  ;;  %v341_v53 = vcvt.s32.f32 %v309_v36  ;;  %v340_v49 = vcvt.s32.f32 %v308_v55  ;;  %v2273_v8 = vcvt.s32.f32 %v307_v59 }
 0x14a   : > { %v1164_v30 = vadd.f32 %v1100_v6, %v962_v38  ;;  %v2275_v1 = vcvt.s32.f32 %v306_v2  ;;  %v961_v27 = vadd.f32 %v897_v31, %v753_v23 }
 0x14b   : > { %vm414_vm5 = vcmp.eq.f32.partialorder %v341_v53, %v1567_v0  ;;  %vm622_vm7 = vcmp.eq.f32.partialorder %v341_v53, %v1605_v19  ;;  %vm830_vm14 = vcmp.eq.f32.partialorder %v341_v53, %v1665_v22  ;;  %vm1032_vm6 = vcmp.eq.f32.partialorder %v341_v53, %v1699_v3 }
 0x14c   : > { %1241 = vmatprep.subr.mxu0 %v1164_v30  ;;  %v480_v16 = vsel %vm414_vm5, %v1526_v40, 0.0  ;;  %v688_v21 = vsel %vm622_vm7, %v1530_v42, 0.0  ;;  %v896_v11 = vsel %vm830_vm14, %v1541_v48, 0.0  ;;  %v1163_v13 = vadd.f32 %v1099_v4, %v961_v27 }
 0x14d   : > { %v752_v50 = vadd.f32 %v688_v21, %v480_v16  ;;  %v1098_v45 = vsel %vm1032_vm6, %v1552_v52, 0.0  ;;  %vm413_vm2 = vcmp.eq.f32.partialorder %v341_v53, %v1556_v54  ;;  %vm621_vm11 = vcmp.eq.f32.partialorder %v341_v53, %v1598_v17 }
 0x14e   : > { %v479_v32 = vsel %vm413_vm2, %v1524_v39, 0.0  ;;  %vm829_vm15 = vcmp.eq.f32.partialorder %v341_v53, %v1657_v14  ;;  %vm1031_vm4 = vcmp.eq.f32.partialorder %v341_v53, %v1694_v26  ;;  %1242 = vmatpush2.msra.mxu0 %v1163_v13  ;;  %v687_v34 = vsel %vm621_vm11, %v1528_v41, 0.0 }
 0x14f   : > { %v960_v33 = vadd.f32 %v896_v11, %v752_v50  ;;  %v895_v35 = vsel %vm829_vm15, %v1539_v47, 0.0  ;;  %v1097_v36 = vsel %vm1031_vm4, %v1550_v51, 0.0  ;;  %v751_v9 = vadd.f32 %v687_v34, %v479_v32 }
 0x150   : > { %vm412_vm12 = vcmp.eq.f32.partialorder %v340_v49, %v1567_v0  ;;  %vm620_vm0 = vcmp.eq.f32.partialorder %v340_v49, %v1605_v19  ;;  %vm828_vm8 = vcmp.eq.f32.partialorder %v340_v49, %v1665_v22  ;;  %vm1030_vm13 = vcmp.eq.f32.partialorder %v340_v49, %v1699_v3 }
 0x151   : > { %v1162_v55 = vadd.f32 %v1098_v45, %v960_v33  ;;  %v478_v59 = vsel %vm412_vm12, %v1526_v40, 0.0  ;;  %v686_v2 = vsel %vm620_vm0, %v1530_v42, 0.0  ;;  %v894_v56 = vsel %vm828_vm8, %v1541_v48, 0.0 }
 0x152   : > { %v959_v58 = vadd.f32 %v895_v35, %v751_v9  ;;  %v750_v61 = vadd.f32 %v686_v2, %v478_v59  ;;  %vm411_vm9 = vcmp.eq.f32.partialorder %v340_v49, %v1556_v54  ;;  %v1096_v62 = vsel %vm1030_vm13, %v1552_v52, 0.0 }
 0x153   : > { %1243 = vmatprep.subr.mxu0 %v1162_v55  ;;  %v477_v63 = vsel %vm411_vm9, %v1524_v39, 0.0  ;;  %vm619_vm1 = vcmp.eq.f32.partialorder %v340_v49, %v1598_v17  ;;  %vm827_vm3 = vcmp.eq.f32.partialorder %v340_v49, %v1657_v14  ;;  %vm1029_vm10 = vcmp.eq.f32.partialorder %v340_v49, %v1694_v26  ;;  %v1185_v55 = vld [vmem:[%s149_s17] sm:$0x77] }
 0x154   : > { %v1161_v43 = vadd.f32 %v1097_v36, %v959_v58  ;;  %v958_v44 = vadd.f32 %v894_v56, %v750_v61  ;;  %v685_v29 = vsel %vm619_vm1, %v1528_v41, 0.0  ;;  %v893_v18 = vsel %vm827_vm3, %v1539_v47, 0.0 }
 0x155   : > { %v749_v46 = vadd.f32 %v685_v29, %v477_v63  ;;  %vm410_vm5 = vcmp.eq.f32.partialorder %v2273_v8, %v1567_v0  ;;  %vm618_vm7 = vcmp.eq.f32.partialorder %v2273_v8, %v1605_v19  ;;  %v1095_v24 = vsel %vm1029_vm10, %v1550_v51, 0.0 }
 0x156   : > { %1244 = vmatpush2.msra.mxu0 %v1161_v43  ;;  %v1160_v28 = vadd.f32 %v1096_v62, %v958_v44  ;;  %v476_v20 = vsel %vm410_vm5, %v1526_v40, 0.0  ;;  %v684_v12 = vsel %vm618_vm7, %v1530_v42, 0.0  ;;  %vm826_vm14 = vcmp.eq.f32.partialorder %v2273_v8, %v1665_v22 }
 0x157   : > { %v957_v60 = vadd.f32 %v893_v18, %v749_v46  ;;  %v748_v7 = vadd.f32 %v684_v12, %v476_v20  ;;  %vm1028_vm6 = vcmp.eq.f32.partialorder %v2273_v8, %v1699_v3  ;;  %v892_v15 = vsel %vm826_vm14, %v1541_v48, 0.0 }
 0x158   : > { %1245 = vmatprep.subr.mxu0 %v1160_v28  ;;  %v1094_v10 = vsel %vm1028_vm6, %v1552_v52, 0.0  ;;  %vm409_vm2 = vcmp.eq.f32.partialorder %v2273_v8, %v1556_v54  ;;  %vm617_vm11 = vcmp.eq.f32.partialorder %v2273_v8, %v1598_v17  ;;  %vm825_vm15 = vcmp.eq.f32.partialorder %v2273_v8, %v1657_v14 }
 0x159   : > { %v1159_v5 = vadd.f32 %v1095_v24, %v957_v60  ;;  %v956_v6 = vadd.f32 %v892_v15, %v748_v7  ;;  %v475_v38 = vsel %vm409_vm2, %v1524_v39, 0.0  ;;  %v683_v57 = vsel %vm617_vm11, %v1528_v41, 0.0 }
 0x15a   : > { %v747_v25 = vadd.f32 %v683_v57, %v475_v38  ;;  %vm1027_vm4 = vcmp.eq.f32.partialorder %v2273_v8, %v1694_v26  ;;  %vm408_vm12 = vcmp.eq.f32.partialorder %v2275_v1, %v1567_v0  ;;  %v891_v31 = vsel %vm825_vm15, %v1539_v47, 0.0 }
 0x15b   : > { %1246 = vmatpush2.msra.mxu0 %v1159_v5  ;;  %v1158_v23 = vadd.f32 %v1094_v10, %v956_v6  ;;  %v1093_v4 = vsel %vm1027_vm4, %v1550_v51, 0.0  ;;  %v337_v53 = vcvt.s32.f32 %v2245_v37  ;;  %v474_v49 = vsel %vm408_vm12, %v1526_v40, 0.0 }
 0x15c   : > { %v955_v30 = vadd.f32 %v891_v31, %v747_v25  ;;  %vm616_vm0 = vcmp.eq.f32.partialorder %v2275_v1, %v1605_v19  ;;  %vm824_vm8 = vcmp.eq.f32.partialorder %v2275_v1, %v1665_v22  ;;  %vm1026_vm13 = vcmp.eq.f32.partialorder %v2275_v1, %v1699_v3 }
 0x15d   : > { %1247 = vmatprep.subr.mxu0 %v1158_v23  ;;  %v682_v8 = vsel %vm616_vm0, %v1530_v42, 0.0  ;;  %v890_v27 = vsel %vm824_vm8, %v1541_v48, 0.0  ;;  %vm407_vm9 = vcmp.eq.f32.partialorder %v2275_v1, %v1556_v54  ;;  %vm615_vm1 = vcmp.eq.f32.partialorder %v2275_v1, %v1598_v17 }
 0x15e   : > { %v1157_v37 = vadd.f32 %v1093_v4, %v955_v30  ;;  %v746_v16 = vadd.f32 %v682_v8, %v474_v49  ;;  %v473_v21 = vsel %vm407_vm9, %v1524_v39, 0.0  ;;  %v681_v11 = vsel %vm615_vm1, %v1528_v41, 0.0 }
 0x15f   : > { %vm823_vm3 = vcmp.eq.f32.partialorder %v2275_v1, %v1657_v14  ;;  %vm1025_vm10 = vcmp.eq.f32.partialorder %v2275_v1, %v1694_v26  ;;  %vm406_vm5 = vcmp.eq.f32.partialorder %v337_v53, %v1567_v0  ;;  %v1092_v50 = vsel %vm1026_vm13, %v1552_v52, 0.0 }
 0x160   : > { %1248 = vmatpush2.msra.mxu0 %v1157_v37  ;;  %v954_v13 = vadd.f32 %v890_v27, %v746_v16  ;;  %v745_v45 = vadd.f32 %v681_v11, %v473_v21  ;;  %v889_v32 = vsel %vm823_vm3, %v1539_v47, 0.0  ;;  %v1091_v33 = vsel %vm1025_vm10, %v1550_v51, 0.0 }
 0x161   : > { %v472_v34 = vsel %vm406_vm5, %v1526_v40, 0.0  ;;  %vm614_vm7 = vcmp.eq.f32.partialorder %v337_v53, %v1605_v19  ;;  %vm822_vm14 = vcmp.eq.f32.partialorder %v337_v53, %v1665_v22  ;;  %vm1024_vm6 = vcmp.eq.f32.partialorder %v337_v53, %v1699_v3 }
 0x162   : > { %v1156_v0 = vadd.f32 %v1092_v50, %v954_v13  ;;  %v953_v1 = vadd.f32 %v889_v32, %v745_v45  ;;  %v680_v35 = vsel %vm614_vm7, %v1530_v42, 0.0  ;;  %v888_v9 = vsel %vm822_vm14, %v1541_v48, 0.0 }
 0x163   : > { %v744_v36 = vadd.f32 %v680_v35, %v472_v34  ;;  %vm405_vm2 = vcmp.eq.f32.partialorder %v337_v53, %v1556_v54  ;;  %vm613_vm11 = vcmp.eq.f32.partialorder %v337_v53, %v1598_v17  ;;  %vm821_vm15 = vcmp.eq.f32.partialorder %v337_v53, %v1657_v14 }
 0x164   : > { %1249 = vmatprep.subr.mxu0 %v1156_v0  ;;  %v1155_v40 = vadd.f32 %v1091_v33, %v953_v1  ;;  %v471_v19 = vsel %vm405_vm2, %v1524_v39, 0.0  ;;  %v679_v22 = vsel %vm613_vm11, %v1528_v41, 0.0  ;;  %vm1023_vm4 = vcmp.eq.f32.partialorder %v337_v53, %v1694_v26 }
 0x165   : > { %v952_v59 = vadd.f32 %v888_v9, %v744_v36  ;;  %v743_v42 = vadd.f32 %v679_v22, %v471_v19  ;;  %v1090_v48 = vsel %vm1024_vm6, %v1552_v52, 0.0  ;;  %v887_v54 = vsel %vm821_vm15, %v1539_v47, 0.0 }
 0x166   : > { %1250 = vmatpush2.msra.mxu0 %v1155_v40  ;;  %v1187_v17 = vcombine.high %v1185_v55, %v1185_v55  ;;  %v1089_v56 = vsel %vm1023_vm4, %v1550_v51, 0.0 }
 0x167   : > { %v1154_v3 = vadd.f32 %v1090_v48, %v952_v59  ;;  %v951_v2 = vadd.f32 %v887_v54, %v743_v42 }
 0x168   : > { %1253 = vmatprep.mubr.f32.mxu0 %v1187_v17 }
 0x169   : > { %1251 = vmatprep.subr.mxu0 %v1154_v3  ;;  %v1153_v39 = vadd.f32 %v1089_v56, %v951_v2 }
 0x16b   : > { %1252 = vmatpush2.msra.mxu0 %v1153_v39 }
 0x16c   : > { %1254 = vmatmul.mubr.f32.vlgmr.msra.gmra.mxu0 %v1185_v55 }
 0x22c   : > { %v1255_v41 = vpop.f32.mrf.mxu0 }
 0x22e   : > { %v1257_v14 = vpop.f32.mrf.mxu0 }
 0x22f   : > { %v1262_v52 = vcombine.low %v1255_v41, %v1257_v14 }
 0x231   : > { %1264 = vst [vmem:[%s157_s20] sm:$0x77] %v1262_v52 }
 0x232 PF: > { %s12_s9 = sadd.s32 1, %s1378_s9  }
 0x233   : > { %p9_p4 = scmp.ge.s32.totalorder %s12_s9, 4  }
 0x235   :  { %11 = sbr.rel (!%p9_p4) target bundleno = 1 (0x1), region = 61 }

</bundles_post_ra>
